<compile_context>
chip_gen: v7x
topology: tpu7x:2x2x1
jax: 0.10.0
libtpu: 0.0.40
codegen_flags: <defaults>
</compile_context>

<pallas_src>
import functools

import jax
import jax.numpy as jnp
from jax import lax
from jax.experimental import pallas as pl
from jax.experimental.pallas import tpu as pltpu


# ----------------------------------------------------------------------------
# Fused DRRN forward kernel (one grid step == one image)
# ----------------------------------------------------------------------------
def _drrn_kernel(x_ref, w_in_ref, w1_ref, w2_ref, w_out_ref, out_ref, *,
                 num_layers, recurse_depth, H, W, compute_dtype):
    HW = H * W

    # Column-validity masks for the horizontally shifted taps (built once).
    pos = lax.broadcasted_iota(jnp.int32, (1, HW), 1)
    col = pos % W
    mask_l = col >= 1          # output columns that have a valid x-1 neighbour
    mask_r = col <= W - 2      # output columns that have a valid x+1 neighbour

    def conv3x3(a_f32, w_taps):
        """3x3 SAME conv, transposed im2col, 9 accumulating MXU contractions.

        a_f32 : (Cin, H*W) float32 activation (channels on sublanes, pixels on lanes)
        w_taps: (9, Cout, Cin) weights in the MXU compute dtype (tap-major)
        returns (Cout, H*W) float32
        """
        a = a_f32.astype(compute_dtype)          # cast once, before tap building
        cin = a.shape[0]
        # Flat-lane zero halo: covers all y-out-of-range reads for free.
        zpad = jnp.zeros((cin, W + 1), compute_dtype)
        ap = jnp.concatenate([zpad, a, zpad], axis=1)        # (Cin, HW + 2W + 2)
        acc = None
        k = 0
        for dy in (-1, 0, 1):
            for dx in (-1, 0, 1):
                start = (W + 1) + dy * W + dx
                t = ap[:, start:start + HW]                  # shifted tap (Cin, HW)
                if dx == -1:                                 # mask x-wraparound cols
                    t = jnp.where(mask_l, t, jnp.zeros_like(t))
                elif dx == 1:
                    t = jnp.where(mask_r, t, jnp.zeros_like(t))
                y = jnp.dot(w_taps[k], t, preferred_element_type=jnp.float32)
                acc = y if acc is None else acc + y
                k += 1
        return acc                                           # (Cout, HW) f32

    x = x_ref[...].astype(jnp.float32)                       # (Cin, HW)
    h0 = conv3x3(x, w_in_ref[...])                           # in_conv (no activation)

    def layer_body(l, h):
        w1 = w1_ref[l]                                       # (9, Cmid, Cmid)
        w2 = w2_ref[l]
        block_identity = h

        def rec_body(_, v):
            v = jnp.maximum(conv3x3(v, w1), 0.0)             # relu(conv_1(x))
            v = jnp.maximum(conv3x3(v, w2), 0.0)             # relu(conv_2(x))
            return v + block_identity                        # + identity
        return lax.fori_loop(0, recurse_depth, rec_body, h)

    h = lax.fori_loop(0, num_layers, layer_body, h0)

    out = conv3x3(h, w_out_ref[...]) + x                     # out_conv + global residual
    out_ref[...] = out.astype(out_ref.dtype)


# ----------------------------------------------------------------------------
# Host-side wrapper (NCHW in / NCHW out, PyTorch semantics)
# ----------------------------------------------------------------------------
def drrn_forward(x_nchw, params, recurse_depth, *, compute_dtype=jnp.float32):
    N, Cin, H, W = x_nchw.shape
    HW = H * W
    Cmid = params["in_conv"].shape[-1]
    num_layers = len(params["blocks"])

    def pack(w):
        # HWIO (3,3,Ci,Co) -> (9, Co, Ci): one (Cout, Cin) matrix per kernel
        # tap, ready for the transposed contraction (Cout, Cin) @ (Cin, H*W).
        k1, k2, ci, co = w.shape
        return jnp.transpose(w.reshape(k1 * k2, ci, co), (0, 2, 1)).astype(compute_dtype)

    w_in = pack(params["in_conv"])                                    # (9, Cmid, Cin)
    w1_all = jnp.stack([pack(w1) for (w1, _) in params["blocks"]])    # (L, 9, Cmid, Cmid)
    w2_all = jnp.stack([pack(w2) for (_, w2) in params["blocks"]])    # (L, 9, Cmid, Cmid)
    w_out = pack(params["out_conv"])                                  # (9, Cin, Cmid)

    # Lane-dense I/O slab: contiguous reshape, no transpose.
    x_slab = x_nchw.reshape(N, Cin, HW)

    kernel = functools.partial(
        _drrn_kernel, num_layers=num_layers, recurse_depth=recurse_depth,
        H=H, W=W, compute_dtype=compute_dtype)

    # Advisory cost hint for the XLA scheduler around the custom call.
    flops = 2 * N * HW * 9 * (
        Cin * Cmid + num_layers * recurse_depth * 2 * Cmid * Cmid + Cmid * Cin)
    w_itemsize = jnp.dtype(compute_dtype).itemsize
    bytes_accessed = (
        2 * N * HW * Cin * jnp.dtype(x_nchw.dtype).itemsize            # in + out
        + w_itemsize * (9 * Cin * Cmid + 2 * num_layers * 9 * Cmid * Cmid
                        + 9 * Cmid * Cin))

    out = pl.pallas_call(
        kernel,
        out_shape=jax.ShapeDtypeStruct((N, Cin, HW), x_nchw.dtype),
        grid_spec=pltpu.PrefetchScalarGridSpec(
            num_scalar_prefetch=0,
            grid=(N,),
            in_specs=[
                pl.BlockSpec((None, Cin, HW), lambda n: (n, 0, 0)),
                pl.BlockSpec((9, Cmid, Cin), lambda n: (0, 0, 0)),
                pl.BlockSpec((num_layers, 9, Cmid, Cmid), lambda n: (0, 0, 0, 0)),
                pl.BlockSpec((num_layers, 9, Cmid, Cmid), lambda n: (0, 0, 0, 0)),
                pl.BlockSpec((9, Cin, Cmid), lambda n: (0, 0, 0)),
            ],
            out_specs=pl.BlockSpec((None, Cin, HW), lambda n: (n, 0, 0)),
        ),
        compiler_params=pltpu.CompilerParams(
            dimension_semantics=("parallel",)),
        cost_estimate=pl.CostEstimate(
            flops=int(flops), transcendentals=0,
            bytes_accessed=int(bytes_accessed)),
    )(x_slab, w_in, w1_all, w2_all, w_out)

    return out.reshape(N, Cin, H, W)


# ----------------------------------------------------------------------------
# Parameter init (deterministic synthetic weights, HWIO layout)
# ----------------------------------------------------------------------------
def init_drrn_params(key, in_channel, mid_channel, num_layers, scale=0.05):
    keys = jax.random.split(key, 2 + 2 * num_layers)
    params = {
        "in_conv": scale * jax.random.normal(
            keys[0], (3, 3, in_channel, mid_channel), jnp.float32),
        "out_conv": scale * jax.random.normal(
            keys[1], (3, 3, mid_channel, in_channel), jnp.float32),
        "blocks": [],
    }
    for i in range(num_layers):
        w1 = scale * jax.random.normal(
            keys[2 + 2 * i], (3, 3, mid_channel, mid_channel), jnp.float32)
        w2 = scale * jax.random.normal(
            keys[3 + 2 * i], (3, 3, mid_channel, mid_channel), jnp.float32)
        params["blocks"].append((w1, w2))
    return params


# ----------------------------------------------------------------------------
# Pure-JAX reference (correctness check)
# ----------------------------------------------------------------------------
def _ref_conv(x, w):
    return lax.conv_general_dilated(
        x, w, window_strides=(1, 1), padding="SAME",
        dimension_numbers=("NHWC", "HWIO", "NHWC"))


def drrn_reference(x_nchw, params, recurse_depth):
    x = jnp.transpose(x_nchw, (0, 2, 3, 1))
    identity = x
    h = _ref_conv(x, params["in_conv"])
    for (w1, w2) in params["blocks"]:
        block_identity = h
        for _ in range(recurse_depth):
            h = jnp.maximum(_ref_conv(h, w1), 0.0)
            h = jnp.maximum(_ref_conv(h, w2), 0.0) + block_identity
    out = _ref_conv(h, params["out_conv"]) + identity
    return jnp.transpose(out, (0, 3, 1, 2))


# ----------------------------------------------------------------------------
if __name__ == "__main__":
    # DRRN(in_channel=4, mid_channel=32, num_layers=2, recurse_depth=2)
    in_channel, mid_channel, num_layers, recurse_depth = 4, 32, 2, 2
    N, H, W = 2, 16, 16

    key = jax.random.PRNGKey(0)
    k_x, k_p = jax.random.split(key)
    x = jax.random.normal(k_x, (N, in_channel, H, W), jnp.float32)
    params = init_drrn_params(k_p, in_channel, mid_channel, num_layers)

    ref = jax.block_until_ready(drrn_reference(x, params, recurse_depth))

    # f32 MXU path (default; recommended on v5e): strict check vs XLA reference.
    fwd_f32 = jax.jit(functools.partial(drrn_forward, recurse_depth=recurse_depth))
    out_f32 = jax.block_until_ready(fwd_f32(x, params))
    assert out_f32.shape == (N, in_channel, H, W)
    assert jnp.allclose(out_f32, ref, atol=1e-4, rtol=1e-4), "f32 mismatch vs reference"

    # bf16-MXU-input / f32-accumulate path (v6e/v7x fast path): loose check.
    fwd_bf16 = jax.jit(functools.partial(
        drrn_forward, recurse_depth=recurse_depth, compute_dtype=jnp.bfloat16))
    out_bf16 = jax.block_until_ready(fwd_bf16(x, params))
    assert jnp.allclose(out_bf16, ref, atol=1e-1, rtol=1e-1), "bf16 path diverged"

    print("KERNEL_OK")
</pallas_src>

<mosaic_0001>
module attributes {stable_mosaic.version = 11 : i64} {
  func.func @_drrn_kernel(%arg0: i32, %arg1: memref<1x4x256xf32, #tpu.memory_space<vmem>>, %arg2: memref<9x32x4xf32, #tpu.memory_space<vmem>>, %arg3: memref<2x9x32x32xf32, #tpu.memory_space<vmem>>, %arg4: memref<2x9x32x32xf32, #tpu.memory_space<vmem>>, %arg5: memref<9x4x32xf32, #tpu.memory_space<vmem>>, %arg6: memref<1x4x256xf32, #tpu.memory_space<vmem>>) attributes {dimension_semantics = [#tpu.dimension_semantics<parallel>], iteration_bounds = array<i64: 2>, scalar_prefetch = 0 : i64, scratch_operands = 0 : i64, tpu.core_type = #tpu.core_type<tc>, window_params = [{transform_indices = @transform_0, window_bounds = array<i64: 1, 4, 256>}, {pipeline_mode = #tpu.pipeline_mode<synchronous>, transform_indices = @transform_1, window_bounds = array<i64: 9, 32, 4>}, {pipeline_mode = #tpu.pipeline_mode<synchronous>, transform_indices = @transform_2, window_bounds = array<i64: 2, 9, 32, 32>}, {pipeline_mode = #tpu.pipeline_mode<synchronous>, transform_indices = @transform_3, window_bounds = array<i64: 2, 9, 32, 32>}, {pipeline_mode = #tpu.pipeline_mode<synchronous>, transform_indices = @transform_4, window_bounds = array<i64: 9, 4, 32>}, {transform_indices = @transform_5, window_bounds = array<i64: 1, 4, 256>}]} {
    %0 = tpu.iota {dimensions = array<i32: 1>} : vector<1x256xi32>
    %c16_i32 = arith.constant 16 : i32
    %c0_i32 = arith.constant 0 : i32
    %1 = arith.cmpi eq, %c16_i32, %c0_i32 : i32
    %c1_i32 = arith.constant 1 : i32
    %2 = arith.select %1, %c1_i32, %c16_i32 : i32
    %3 = vector.broadcast %2 : i32 to vector<1x256xi32>
    %4 = arith.remsi %0, %3 : vector<1x256xi32>
    %c0_i32_0 = arith.constant 0 : i32
    %5 = vector.broadcast %c0_i32_0 : i32 to vector<1x256xi32>
    %6 = arith.cmpi ne, %4, %5 : vector<1x256xi32>
    %c0_i32_1 = arith.constant 0 : i32
    %7 = vector.broadcast %c0_i32_1 : i32 to vector<1x256xi32>
    %8 = arith.cmpi slt, %4, %7 : vector<1x256xi32>
    %c0_i32_2 = arith.constant 0 : i32
    %9 = arith.cmpi slt, %2, %c0_i32_2 : i32
    %10 = vector.broadcast %9 : i1 to vector<1x256xi1>
    %11 = vector.broadcast %10 : vector<1x256xi1> to vector<1x256xi1>
    %12 = arith.xori %8, %11 : vector<1x256xi1>
    %13 = arith.andi %12, %6 : vector<1x256xi1>
    %14 = vector.broadcast %2 : i32 to vector<1x256xi32>
    %15 = arith.addi %4, %14 : vector<1x256xi32>
    %16 = arith.select %13, %15, %4 : vector<1x256xi1>, vector<1x256xi32>
    %c1_i32_3 = arith.constant 1 : i32
    %17 = vector.broadcast %c1_i32_3 : i32 to vector<1x256xi32>
    %18 = arith.cmpi sge, %16, %17 : vector<1x256xi32>
    %c14_i32 = arith.constant 14 : i32
    %19 = vector.broadcast %c14_i32 : i32 to vector<1x256xi32>
    %20 = arith.cmpi sle, %16, %19 : vector<1x256xi32>
    %c0 = arith.constant 0 : index
    %c0_4 = arith.constant 0 : index
    %c0_5 = arith.constant 0 : index
    %21 = vector.load %arg1[%c0, %c0_4, %c0_5] : memref<1x4x256xf32, #tpu.memory_space<vmem>>, vector<1x4x256xf32>
    %22 = vector.shape_cast %21 : vector<1x4x256xf32> to vector<4x256xf32>
    %c0_6 = arith.constant 0 : index
    %c0_7 = arith.constant 0 : index
    %c0_8 = arith.constant 0 : index
    %23 = vector.load %arg2[%c0_6, %c0_7, %c0_8] : memref<9x32x4xf32, #tpu.memory_space<vmem>>, vector<9x32x4xf32>
    %cst = arith.constant 0.000000e+00 : f32
    %24 = vector.broadcast %cst : f32 to vector<4x17xf32>
    %25 = tpu.concatenate %24, %22, %24 in 1 : vector<4x17xf32>, vector<4x256xf32>, vector<4x17xf32> -> vector<4x290xf32>
    %26 = vector.extract_strided_slice %25 {offsets = [0, 0], sizes = [4, 256], strides = [1, 1]} : vector<4x290xf32> to vector<4x256xf32>
    %cst_9 = arith.constant 0.000000e+00 : f32
    %27 = vector.broadcast %cst_9 : f32 to vector<4x256xf32>
    %28 = vector.shape_cast %18 : vector<1x256xi1> to vector<1x256xi1>
    %29 = vector.broadcast %28 : vector<1x256xi1> to vector<4x256xi1>
    %30 = arith.select %29, %26, %27 : vector<4x256xi1>, vector<4x256xf32>
    %31 = vector.extract_strided_slice %23 {offsets = [0, 0, 0], sizes = [1, 32, 4], strides = [1, 1, 1]} : vector<9x32x4xf32> to vector<1x32x4xf32>
    %32 = vector.shape_cast %31 : vector<1x32x4xf32> to vector<32x4xf32>
    %cst_10 = arith.constant dense<0.000000e+00> : vector<32x256xf32>
    %33 = tpu.matmul %32, %30, %cst_10 {dimension_numbers = #tpu.dot_dimension_numbers<[1], [0], [0], [1], [0, 0, 1, 1], [], []>} : vector<32x4xf32>, vector<4x256xf32>, vector<32x256xf32> -> vector<32x256xf32>
    %34 = vector.extract_strided_slice %25 {offsets = [0, 1], sizes = [4, 256], strides = [1, 1]} : vector<4x290xf32> to vector<4x256xf32>
    %35 = vector.extract_strided_slice %23 {offsets = [1, 0, 0], sizes = [1, 32, 4], strides = [1, 1, 1]} : vector<9x32x4xf32> to vector<1x32x4xf32>
    %36 = vector.shape_cast %35 : vector<1x32x4xf32> to vector<32x4xf32>
    %cst_11 = arith.constant dense<0.000000e+00> : vector<32x256xf32>
    %37 = tpu.matmul %36, %34, %cst_11 {dimension_numbers = #tpu.dot_dimension_numbers<[1], [0], [0], [1], [0, 0, 1, 1], [], []>} : vector<32x4xf32>, vector<4x256xf32>, vector<32x256xf32> -> vector<32x256xf32>
    %38 = arith.addf %33, %37 : vector<32x256xf32>
    %39 = vector.extract_strided_slice %25 {offsets = [0, 2], sizes = [4, 256], strides = [1, 1]} : vector<4x290xf32> to vector<4x256xf32>
    %cst_12 = arith.constant 0.000000e+00 : f32
    %40 = vector.broadcast %cst_12 : f32 to vector<4x256xf32>
    %41 = vector.shape_cast %20 : vector<1x256xi1> to vector<1x256xi1>
    %42 = vector.broadcast %41 : vector<1x256xi1> to vector<4x256xi1>
    %43 = arith.select %42, %39, %40 : vector<4x256xi1>, vector<4x256xf32>
    %44 = vector.extract_strided_slice %23 {offsets = [2, 0, 0], sizes = [1, 32, 4], strides = [1, 1, 1]} : vector<9x32x4xf32> to vector<1x32x4xf32>
    %45 = vector.shape_cast %44 : vector<1x32x4xf32> to vector<32x4xf32>
    %cst_13 = arith.constant dense<0.000000e+00> : vector<32x256xf32>
    %46 = tpu.matmul %45, %43, %cst_13 {dimension_numbers = #tpu.dot_dimension_numbers<[1], [0], [0], [1], [0, 0, 1, 1], [], []>} : vector<32x4xf32>, vector<4x256xf32>, vector<32x256xf32> -> vector<32x256xf32>
    %47 = arith.addf %38, %46 : vector<32x256xf32>
    %48 = vector.extract_strided_slice %25 {offsets = [0, 16], sizes = [4, 256], strides = [1, 1]} : vector<4x290xf32> to vector<4x256xf32>
    %cst_14 = arith.constant 0.000000e+00 : f32
    %49 = vector.broadcast %cst_14 : f32 to vector<4x256xf32>
    %50 = vector.shape_cast %18 : vector<1x256xi1> to vector<1x256xi1>
    %51 = vector.broadcast %50 : vector<1x256xi1> to vector<4x256xi1>
    %52 = arith.select %51, %48, %49 : vector<4x256xi1>, vector<4x256xf32>
    %53 = vector.extract_strided_slice %23 {offsets = [3, 0, 0], sizes = [1, 32, 4], strides = [1, 1, 1]} : vector<9x32x4xf32> to vector<1x32x4xf32>
    %54 = vector.shape_cast %53 : vector<1x32x4xf32> to vector<32x4xf32>
    %cst_15 = arith.constant dense<0.000000e+00> : vector<32x256xf32>
    %55 = tpu.matmul %54, %52, %cst_15 {dimension_numbers = #tpu.dot_dimension_numbers<[1], [0], [0], [1], [0, 0, 1, 1], [], []>} : vector<32x4xf32>, vector<4x256xf32>, vector<32x256xf32> -> vector<32x256xf32>
    %56 = arith.addf %47, %55 : vector<32x256xf32>
    %57 = vector.extract_strided_slice %25 {offsets = [0, 17], sizes = [4, 256], strides = [1, 1]} : vector<4x290xf32> to vector<4x256xf32>
    %58 = vector.extract_strided_slice %23 {offsets = [4, 0, 0], sizes = [1, 32, 4], strides = [1, 1, 1]} : vector<9x32x4xf32> to vector<1x32x4xf32>
    %59 = vector.shape_cast %58 : vector<1x32x4xf32> to vector<32x4xf32>
    %cst_16 = arith.constant dense<0.000000e+00> : vector<32x256xf32>
    %60 = tpu.matmul %59, %57, %cst_16 {dimension_numbers = #tpu.dot_dimension_numbers<[1], [0], [0], [1], [0, 0, 1, 1], [], []>} : vector<32x4xf32>, vector<4x256xf32>, vector<32x256xf32> -> vector<32x256xf32>
    %61 = arith.addf %56, %60 : vector<32x256xf32>
    %62 = vector.extract_strided_slice %25 {offsets = [0, 18], sizes = [4, 256], strides = [1, 1]} : vector<4x290xf32> to vector<4x256xf32>
    %cst_17 = arith.constant 0.000000e+00 : f32
    %63 = vector.broadcast %cst_17 : f32 to vector<4x256xf32>
    %64 = vector.shape_cast %20 : vector<1x256xi1> to vector<1x256xi1>
    %65 = vector.broadcast %64 : vector<1x256xi1> to vector<4x256xi1>
    %66 = arith.select %65, %62, %63 : vector<4x256xi1>, vector<4x256xf32>
    %67 = vector.extract_strided_slice %23 {offsets = [5, 0, 0], sizes = [1, 32, 4], strides = [1, 1, 1]} : vector<9x32x4xf32> to vector<1x32x4xf32>
    %68 = vector.shape_cast %67 : vector<1x32x4xf32> to vector<32x4xf32>
    %cst_18 = arith.constant dense<0.000000e+00> : vector<32x256xf32>
    %69 = tpu.matmul %68, %66, %cst_18 {dimension_numbers = #tpu.dot_dimension_numbers<[1], [0], [0], [1], [0, 0, 1, 1], [], []>} : vector<32x4xf32>, vector<4x256xf32>, vector<32x256xf32> -> vector<32x256xf32>
    %70 = arith.addf %61, %69 : vector<32x256xf32>
    %71 = vector.extract_strided_slice %25 {offsets = [0, 32], sizes = [4, 256], strides = [1, 1]} : vector<4x290xf32> to vector<4x256xf32>
    %cst_19 = arith.constant 0.000000e+00 : f32
    %72 = vector.broadcast %cst_19 : f32 to vector<4x256xf32>
    %73 = vector.shape_cast %18 : vector<1x256xi1> to vector<1x256xi1>
    %74 = vector.broadcast %73 : vector<1x256xi1> to vector<4x256xi1>
    %75 = arith.select %74, %71, %72 : vector<4x256xi1>, vector<4x256xf32>
    %76 = vector.extract_strided_slice %23 {offsets = [6, 0, 0], sizes = [1, 32, 4], strides = [1, 1, 1]} : vector<9x32x4xf32> to vector<1x32x4xf32>
    %77 = vector.shape_cast %76 : vector<1x32x4xf32> to vector<32x4xf32>
    %cst_20 = arith.constant dense<0.000000e+00> : vector<32x256xf32>
    %78 = tpu.matmul %77, %75, %cst_20 {dimension_numbers = #tpu.dot_dimension_numbers<[1], [0], [0], [1], [0, 0, 1, 1], [], []>} : vector<32x4xf32>, vector<4x256xf32>, vector<32x256xf32> -> vector<32x256xf32>
    %79 = arith.addf %70, %78 : vector<32x256xf32>
    %80 = vector.extract_strided_slice %25 {offsets = [0, 33], sizes = [4, 256], strides = [1, 1]} : vector<4x290xf32> to vector<4x256xf32>
    %81 = vector.extract_strided_slice %23 {offsets = [7, 0, 0], sizes = [1, 32, 4], strides = [1, 1, 1]} : vector<9x32x4xf32> to vector<1x32x4xf32>
    %82 = vector.shape_cast %81 : vector<1x32x4xf32> to vector<32x4xf32>
    %cst_21 = arith.constant dense<0.000000e+00> : vector<32x256xf32>
    %83 = tpu.matmul %82, %80, %cst_21 {dimension_numbers = #tpu.dot_dimension_numbers<[1], [0], [0], [1], [0, 0, 1, 1], [], []>} : vector<32x4xf32>, vector<4x256xf32>, vector<32x256xf32> -> vector<32x256xf32>
    %84 = arith.addf %79, %83 : vector<32x256xf32>
    %85 = vector.extract_strided_slice %25 {offsets = [0, 34], sizes = [4, 256], strides = [1, 1]} : vector<4x290xf32> to vector<4x256xf32>
    %cst_22 = arith.constant 0.000000e+00 : f32
    %86 = vector.broadcast %cst_22 : f32 to vector<4x256xf32>
    %87 = vector.shape_cast %20 : vector<1x256xi1> to vector<1x256xi1>
    %88 = vector.broadcast %87 : vector<1x256xi1> to vector<4x256xi1>
    %89 = arith.select %88, %85, %86 : vector<4x256xi1>, vector<4x256xf32>
    %90 = vector.extract_strided_slice %23 {offsets = [8, 0, 0], sizes = [1, 32, 4], strides = [1, 1, 1]} : vector<9x32x4xf32> to vector<1x32x4xf32>
    %91 = vector.shape_cast %90 : vector<1x32x4xf32> to vector<32x4xf32>
    %cst_23 = arith.constant dense<0.000000e+00> : vector<32x256xf32>
    %92 = tpu.matmul %91, %89, %cst_23 {dimension_numbers = #tpu.dot_dimension_numbers<[1], [0], [0], [1], [0, 0, 1, 1], [], []>} : vector<32x4xf32>, vector<4x256xf32>, vector<32x256xf32> -> vector<32x256xf32>
    %93 = arith.addf %84, %92 : vector<32x256xf32>
    %c0_i32_24 = arith.constant 0 : i32
    %c2_i32 = arith.constant 2 : i32
    %94 = arith.addi %c0_i32_24, %c2_i32 : i32
    %c1_i32_25 = arith.constant 1 : i32
    %95 = scf.for %arg7 = %c0_i32_24 to %94 step %c1_i32_25 iter_args(%arg8 = %93) -> (vector<32x256xf32>)  : i32 {
      %171 = arith.index_cast %arg7 : i32 to index
      %c0_49 = arith.constant 0 : index
      %c0_50 = arith.constant 0 : index
      %c0_51 = arith.constant 0 : index
      %172 = vector.load %arg3[%171, %c0_49, %c0_50, %c0_51] : memref<2x9x32x32xf32, #tpu.memory_space<vmem>>, vector<1x9x32x32xf32>
      %173 = vector.shape_cast %172 : vector<1x9x32x32xf32> to vector<9x32x32xf32>
      %174 = arith.index_cast %arg7 : i32 to index
      %c0_52 = arith.constant 0 : index
      %c0_53 = arith.constant 0 : index
      %c0_54 = arith.constant 0 : index
      %175 = vector.load %arg4[%174, %c0_52, %c0_53, %c0_54] : memref<2x9x32x32xf32, #tpu.memory_space<vmem>>, vector<1x9x32x32xf32>
      %176 = vector.shape_cast %175 : vector<1x9x32x32xf32> to vector<9x32x32xf32>
      %c0_i32_55 = arith.constant 0 : i32
      %c2_i32_56 = arith.constant 2 : i32
      %177 = arith.addi %c0_i32_55, %c2_i32_56 : i32
      %c1_i32_57 = arith.constant 1 : i32
      %178 = scf.for %arg9 = %c0_i32_55 to %177 step %c1_i32_57 iter_args(%arg10 = %arg8) -> (vector<32x256xf32>)  : i32 {
        %cst_58 = arith.constant 0.000000e+00 : f32
        %179 = vector.broadcast %cst_58 : f32 to vector<32x17xf32>
        %180 = tpu.concatenate %179, %arg10, %179 in 1 : vector<32x17xf32>, vector<32x256xf32>, vector<32x17xf32> -> vector<32x290xf32>
        %181 = vector.extract_strided_slice %180 {offsets = [0, 0], sizes = [32, 256], strides = [1, 1]} : vector<32x290xf32> to vector<32x256xf32>
        %cst_59 = arith.constant 0.000000e+00 : f32
        %182 = vector.broadcast %cst_59 : f32 to vector<32x256xf32>
        %183 = vector.shape_cast %18 : vector<1x256xi1> to vector<1x256xi1>
        %184 = vector.broadcast %183 : vector<1x256xi1> to vector<32x256xi1>
        %185 = arith.select %184, %181, %182 : vector<32x256xi1>, vector<32x256xf32>
        %186 = vector.extract_strided_slice %173 {offsets = [0, 0, 0], sizes = [1, 32, 32], strides = [1, 1, 1]} : vector<9x32x32xf32> to vector<1x32x32xf32>
        %187 = vector.shape_cast %186 : vector<1x32x32xf32> to vector<32x32xf32>
        %cst_60 = arith.constant dense<0.000000e+00> : vector<32x256xf32>
        %188 = tpu.matmul %187, %185, %cst_60 {dimension_numbers = #tpu.dot_dimension_numbers<[1], [0], [0], [1], [0, 0, 1, 1], [], []>} : vector<32x32xf32>, vector<32x256xf32>, vector<32x256xf32> -> vector<32x256xf32>
        %189 = vector.extract_strided_slice %180 {offsets = [0, 1], sizes = [32, 256], strides = [1, 1]} : vector<32x290xf32> to vector<32x256xf32>
        %190 = vector.extract_strided_slice %173 {offsets = [1, 0, 0], sizes = [1, 32, 32], strides = [1, 1, 1]} : vector<9x32x32xf32> to vector<1x32x32xf32>
        %191 = vector.shape_cast %190 : vector<1x32x32xf32> to vector<32x32xf32>
        %cst_61 = arith.constant dense<0.000000e+00> : vector<32x256xf32>
        %192 = tpu.matmul %191, %189, %cst_61 {dimension_numbers = #tpu.dot_dimension_numbers<[1], [0], [0], [1], [0, 0, 1, 1], [], []>} : vector<32x32xf32>, vector<32x256xf32>, vector<32x256xf32> -> vector<32x256xf32>
        %193 = arith.addf %188, %192 : vector<32x256xf32>
        %194 = vector.extract_strided_slice %180 {offsets = [0, 2], sizes = [32, 256], strides = [1, 1]} : vector<32x290xf32> to vector<32x256xf32>
        %cst_62 = arith.constant 0.000000e+00 : f32
        %195 = vector.broadcast %cst_62 : f32 to vector<32x256xf32>
        %196 = vector.shape_cast %20 : vector<1x256xi1> to vector<1x256xi1>
        %197 = vector.broadcast %196 : vector<1x256xi1> to vector<32x256xi1>
        %198 = arith.select %197, %194, %195 : vector<32x256xi1>, vector<32x256xf32>
        %199 = vector.extract_strided_slice %173 {offsets = [2, 0, 0], sizes = [1, 32, 32], strides = [1, 1, 1]} : vector<9x32x32xf32> to vector<1x32x32xf32>
        %200 = vector.shape_cast %199 : vector<1x32x32xf32> to vector<32x32xf32>
        %cst_63 = arith.constant dense<0.000000e+00> : vector<32x256xf32>
        %201 = tpu.matmul %200, %198, %cst_63 {dimension_numbers = #tpu.dot_dimension_numbers<[1], [0], [0], [1], [0, 0, 1, 1], [], []>} : vector<32x32xf32>, vector<32x256xf32>, vector<32x256xf32> -> vector<32x256xf32>
        %202 = arith.addf %193, %201 : vector<32x256xf32>
        %203 = vector.extract_strided_slice %180 {offsets = [0, 16], sizes = [32, 256], strides = [1, 1]} : vector<32x290xf32> to vector<32x256xf32>
        %cst_64 = arith.constant 0.000000e+00 : f32
        %204 = vector.broadcast %cst_64 : f32 to vector<32x256xf32>
        %205 = vector.shape_cast %18 : vector<1x256xi1> to vector<1x256xi1>
        %206 = vector.broadcast %205 : vector<1x256xi1> to vector<32x256xi1>
        %207 = arith.select %206, %203, %204 : vector<32x256xi1>, vector<32x256xf32>
        %208 = vector.extract_strided_slice %173 {offsets = [3, 0, 0], sizes = [1, 32, 32], strides = [1, 1, 1]} : vector<9x32x32xf32> to vector<1x32x32xf32>
        %209 = vector.shape_cast %208 : vector<1x32x32xf32> to vector<32x32xf32>
        %cst_65 = arith.constant dense<0.000000e+00> : vector<32x256xf32>
        %210 = tpu.matmul %209, %207, %cst_65 {dimension_numbers = #tpu.dot_dimension_numbers<[1], [0], [0], [1], [0, 0, 1, 1], [], []>} : vector<32x32xf32>, vector<32x256xf32>, vector<32x256xf32> -> vector<32x256xf32>
        %211 = arith.addf %202, %210 : vector<32x256xf32>
        %212 = vector.extract_strided_slice %180 {offsets = [0, 17], sizes = [32, 256], strides = [1, 1]} : vector<32x290xf32> to vector<32x256xf32>
        %213 = vector.extract_strided_slice %173 {offsets = [4, 0, 0], sizes = [1, 32, 32], strides = [1, 1, 1]} : vector<9x32x32xf32> to vector<1x32x32xf32>
        %214 = vector.shape_cast %213 : vector<1x32x32xf32> to vector<32x32xf32>
        %cst_66 = arith.constant dense<0.000000e+00> : vector<32x256xf32>
        %215 = tpu.matmul %214, %212, %cst_66 {dimension_numbers = #tpu.dot_dimension_numbers<[1], [0], [0], [1], [0, 0, 1, 1], [], []>} : vector<32x32xf32>, vector<32x256xf32>, vector<32x256xf32> -> vector<32x256xf32>
        %216 = arith.addf %211, %215 : vector<32x256xf32>
        %217 = vector.extract_strided_slice %180 {offsets = [0, 18], sizes = [32, 256], strides = [1, 1]} : vector<32x290xf32> to vector<32x256xf32>
        %cst_67 = arith.constant 0.000000e+00 : f32
        %218 = vector.broadcast %cst_67 : f32 to vector<32x256xf32>
        %219 = vector.shape_cast %20 : vector<1x256xi1> to vector<1x256xi1>
        %220 = vector.broadcast %219 : vector<1x256xi1> to vector<32x256xi1>
        %221 = arith.select %220, %217, %218 : vector<32x256xi1>, vector<32x256xf32>
        %222 = vector.extract_strided_slice %173 {offsets = [5, 0, 0], sizes = [1, 32, 32], strides = [1, 1, 1]} : vector<9x32x32xf32> to vector<1x32x32xf32>
        %223 = vector.shape_cast %222 : vector<1x32x32xf32> to vector<32x32xf32>
        %cst_68 = arith.constant dense<0.000000e+00> : vector<32x256xf32>
        %224 = tpu.matmul %223, %221, %cst_68 {dimension_numbers = #tpu.dot_dimension_numbers<[1], [0], [0], [1], [0, 0, 1, 1], [], []>} : vector<32x32xf32>, vector<32x256xf32>, vector<32x256xf32> -> vector<32x256xf32>
        %225 = arith.addf %216, %224 : vector<32x256xf32>
        %226 = vector.extract_strided_slice %180 {offsets = [0, 32], sizes = [32, 256], strides = [1, 1]} : vector<32x290xf32> to vector<32x256xf32>
        %cst_69 = arith.constant 0.000000e+00 : f32
        %227 = vector.broadcast %cst_69 : f32 to vector<32x256xf32>
        %228 = vector.shape_cast %18 : vector<1x256xi1> to vector<1x256xi1>
        %229 = vector.broadcast %228 : vector<1x256xi1> to vector<32x256xi1>
        %230 = arith.select %229, %226, %227 : vector<32x256xi1>, vector<32x256xf32>
        %231 = vector.extract_strided_slice %173 {offsets = [6, 0, 0], sizes = [1, 32, 32], strides = [1, 1, 1]} : vector<9x32x32xf32> to vector<1x32x32xf32>
        %232 = vector.shape_cast %231 : vector<1x32x32xf32> to vector<32x32xf32>
        %cst_70 = arith.constant dense<0.000000e+00> : vector<32x256xf32>
        %233 = tpu.matmul %232, %230, %cst_70 {dimension_numbers = #tpu.dot_dimension_numbers<[1], [0], [0], [1], [0, 0, 1, 1], [], []>} : vector<32x32xf32>, vector<32x256xf32>, vector<32x256xf32> -> vector<32x256xf32>
        %234 = arith.addf %225, %233 : vector<32x256xf32>
        %235 = vector.extract_strided_slice %180 {offsets = [0, 33], sizes = [32, 256], strides = [1, 1]} : vector<32x290xf32> to vector<32x256xf32>
        %236 = vector.extract_strided_slice %173 {offsets = [7, 0, 0], sizes = [1, 32, 32], strides = [1, 1, 1]} : vector<9x32x32xf32> to vector<1x32x32xf32>
        %237 = vector.shape_cast %236 : vector<1x32x32xf32> to vector<32x32xf32>
        %cst_71 = arith.constant dense<0.000000e+00> : vector<32x256xf32>
        %238 = tpu.matmul %237, %235, %cst_71 {dimension_numbers = #tpu.dot_dimension_numbers<[1], [0], [0], [1], [0, 0, 1, 1], [], []>} : vector<32x32xf32>, vector<32x256xf32>, vector<32x256xf32> -> vector<32x256xf32>
        %239 = arith.addf %234, %238 : vector<32x256xf32>
        %240 = vector.extract_strided_slice %180 {offsets = [0, 34], sizes = [32, 256], strides = [1, 1]} : vector<32x290xf32> to vector<32x256xf32>
        %cst_72 = arith.constant 0.000000e+00 : f32
        %241 = vector.broadcast %cst_72 : f32 to vector<32x256xf32>
        %242 = vector.shape_cast %20 : vector<1x256xi1> to vector<1x256xi1>
        %243 = vector.broadcast %242 : vector<1x256xi1> to vector<32x256xi1>
        %244 = arith.select %243, %240, %241 : vector<32x256xi1>, vector<32x256xf32>
        %245 = vector.extract_strided_slice %173 {offsets = [8, 0, 0], sizes = [1, 32, 32], strides = [1, 1, 1]} : vector<9x32x32xf32> to vector<1x32x32xf32>
        %246 = vector.shape_cast %245 : vector<1x32x32xf32> to vector<32x32xf32>
        %cst_73 = arith.constant dense<0.000000e+00> : vector<32x256xf32>
        %247 = tpu.matmul %246, %244, %cst_73 {dimension_numbers = #tpu.dot_dimension_numbers<[1], [0], [0], [1], [0, 0, 1, 1], [], []>} : vector<32x32xf32>, vector<32x256xf32>, vector<32x256xf32> -> vector<32x256xf32>
        %248 = arith.addf %239, %247 : vector<32x256xf32>
        %cst_74 = arith.constant 0.000000e+00 : f32
        %249 = vector.broadcast %cst_74 : f32 to vector<32x256xf32>
        %250 = arith.maximumf %248, %249 : vector<32x256xf32>
        %cst_75 = arith.constant 0.000000e+00 : f32
        %251 = vector.broadcast %cst_75 : f32 to vector<32x17xf32>
        %252 = tpu.concatenate %251, %250, %251 in 1 : vector<32x17xf32>, vector<32x256xf32>, vector<32x17xf32> -> vector<32x290xf32>
        %253 = vector.extract_strided_slice %252 {offsets = [0, 0], sizes = [32, 256], strides = [1, 1]} : vector<32x290xf32> to vector<32x256xf32>
        %cst_76 = arith.constant 0.000000e+00 : f32
        %254 = vector.broadcast %cst_76 : f32 to vector<32x256xf32>
        %255 = vector.shape_cast %18 : vector<1x256xi1> to vector<1x256xi1>
        %256 = vector.broadcast %255 : vector<1x256xi1> to vector<32x256xi1>
        %257 = arith.select %256, %253, %254 : vector<32x256xi1>, vector<32x256xf32>
        %258 = vector.extract_strided_slice %176 {offsets = [0, 0, 0], sizes = [1, 32, 32], strides = [1, 1, 1]} : vector<9x32x32xf32> to vector<1x32x32xf32>
        %259 = vector.shape_cast %258 : vector<1x32x32xf32> to vector<32x32xf32>
        %cst_77 = arith.constant dense<0.000000e+00> : vector<32x256xf32>
        %260 = tpu.matmul %259, %257, %cst_77 {dimension_numbers = #tpu.dot_dimension_numbers<[1], [0], [0], [1], [0, 0, 1, 1], [], []>} : vector<32x32xf32>, vector<32x256xf32>, vector<32x256xf32> -> vector<32x256xf32>
        %261 = vector.extract_strided_slice %252 {offsets = [0, 1], sizes = [32, 256], strides = [1, 1]} : vector<32x290xf32> to vector<32x256xf32>
        %262 = vector.extract_strided_slice %176 {offsets = [1, 0, 0], sizes = [1, 32, 32], strides = [1, 1, 1]} : vector<9x32x32xf32> to vector<1x32x32xf32>
        %263 = vector.shape_cast %262 : vector<1x32x32xf32> to vector<32x32xf32>
        %cst_78 = arith.constant dense<0.000000e+00> : vector<32x256xf32>
        %264 = tpu.matmul %263, %261, %cst_78 {dimension_numbers = #tpu.dot_dimension_numbers<[1], [0], [0], [1], [0, 0, 1, 1], [], []>} : vector<32x32xf32>, vector<32x256xf32>, vector<32x256xf32> -> vector<32x256xf32>
        %265 = arith.addf %260, %264 : vector<32x256xf32>
        %266 = vector.extract_strided_slice %252 {offsets = [0, 2], sizes = [32, 256], strides = [1, 1]} : vector<32x290xf32> to vector<32x256xf32>
        %cst_79 = arith.constant 0.000000e+00 : f32
        %267 = vector.broadcast %cst_79 : f32 to vector<32x256xf32>
        %268 = vector.shape_cast %20 : vector<1x256xi1> to vector<1x256xi1>
        %269 = vector.broadcast %268 : vector<1x256xi1> to vector<32x256xi1>
        %270 = arith.select %269, %266, %267 : vector<32x256xi1>, vector<32x256xf32>
        %271 = vector.extract_strided_slice %176 {offsets = [2, 0, 0], sizes = [1, 32, 32], strides = [1, 1, 1]} : vector<9x32x32xf32> to vector<1x32x32xf32>
        %272 = vector.shape_cast %271 : vector<1x32x32xf32> to vector<32x32xf32>
        %cst_80 = arith.constant dense<0.000000e+00> : vector<32x256xf32>
        %273 = tpu.matmul %272, %270, %cst_80 {dimension_numbers = #tpu.dot_dimension_numbers<[1], [0], [0], [1], [0, 0, 1, 1], [], []>} : vector<32x32xf32>, vector<32x256xf32>, vector<32x256xf32> -> vector<32x256xf32>
        %274 = arith.addf %265, %273 : vector<32x256xf32>
        %275 = vector.extract_strided_slice %252 {offsets = [0, 16], sizes = [32, 256], strides = [1, 1]} : vector<32x290xf32> to vector<32x256xf32>
        %cst_81 = arith.constant 0.000000e+00 : f32
        %276 = vector.broadcast %cst_81 : f32 to vector<32x256xf32>
        %277 = vector.shape_cast %18 : vector<1x256xi1> to vector<1x256xi1>
        %278 = vector.broadcast %277 : vector<1x256xi1> to vector<32x256xi1>
        %279 = arith.select %278, %275, %276 : vector<32x256xi1>, vector<32x256xf32>
        %280 = vector.extract_strided_slice %176 {offsets = [3, 0, 0], sizes = [1, 32, 32], strides = [1, 1, 1]} : vector<9x32x32xf32> to vector<1x32x32xf32>
        %281 = vector.shape_cast %280 : vector<1x32x32xf32> to vector<32x32xf32>
        %cst_82 = arith.constant dense<0.000000e+00> : vector<32x256xf32>
        %282 = tpu.matmul %281, %279, %cst_82 {dimension_numbers = #tpu.dot_dimension_numbers<[1], [0], [0], [1], [0, 0, 1, 1], [], []>} : vector<32x32xf32>, vector<32x256xf32>, vector<32x256xf32> -> vector<32x256xf32>
        %283 = arith.addf %274, %282 : vector<32x256xf32>
        %284 = vector.extract_strided_slice %252 {offsets = [0, 17], sizes = [32, 256], strides = [1, 1]} : vector<32x290xf32> to vector<32x256xf32>
        %285 = vector.extract_strided_slice %176 {offsets = [4, 0, 0], sizes = [1, 32, 32], strides = [1, 1, 1]} : vector<9x32x32xf32> to vector<1x32x32xf32>
        %286 = vector.shape_cast %285 : vector<1x32x32xf32> to vector<32x32xf32>
        %cst_83 = arith.constant dense<0.000000e+00> : vector<32x256xf32>
        %287 = tpu.matmul %286, %284, %cst_83 {dimension_numbers = #tpu.dot_dimension_numbers<[1], [0], [0], [1], [0, 0, 1, 1], [], []>} : vector<32x32xf32>, vector<32x256xf32>, vector<32x256xf32> -> vector<32x256xf32>
        %288 = arith.addf %283, %287 : vector<32x256xf32>
        %289 = vector.extract_strided_slice %252 {offsets = [0, 18], sizes = [32, 256], strides = [1, 1]} : vector<32x290xf32> to vector<32x256xf32>
        %cst_84 = arith.constant 0.000000e+00 : f32
        %290 = vector.broadcast %cst_84 : f32 to vector<32x256xf32>
        %291 = vector.shape_cast %20 : vector<1x256xi1> to vector<1x256xi1>
        %292 = vector.broadcast %291 : vector<1x256xi1> to vector<32x256xi1>
        %293 = arith.select %292, %289, %290 : vector<32x256xi1>, vector<32x256xf32>
        %294 = vector.extract_strided_slice %176 {offsets = [5, 0, 0], sizes = [1, 32, 32], strides = [1, 1, 1]} : vector<9x32x32xf32> to vector<1x32x32xf32>
        %295 = vector.shape_cast %294 : vector<1x32x32xf32> to vector<32x32xf32>
        %cst_85 = arith.constant dense<0.000000e+00> : vector<32x256xf32>
        %296 = tpu.matmul %295, %293, %cst_85 {dimension_numbers = #tpu.dot_dimension_numbers<[1], [0], [0], [1], [0, 0, 1, 1], [], []>} : vector<32x32xf32>, vector<32x256xf32>, vector<32x256xf32> -> vector<32x256xf32>
        %297 = arith.addf %288, %296 : vector<32x256xf32>
        %298 = vector.extract_strided_slice %252 {offsets = [0, 32], sizes = [32, 256], strides = [1, 1]} : vector<32x290xf32> to vector<32x256xf32>
        %cst_86 = arith.constant 0.000000e+00 : f32
        %299 = vector.broadcast %cst_86 : f32 to vector<32x256xf32>
        %300 = vector.shape_cast %18 : vector<1x256xi1> to vector<1x256xi1>
        %301 = vector.broadcast %300 : vector<1x256xi1> to vector<32x256xi1>
        %302 = arith.select %301, %298, %299 : vector<32x256xi1>, vector<32x256xf32>
        %303 = vector.extract_strided_slice %176 {offsets = [6, 0, 0], sizes = [1, 32, 32], strides = [1, 1, 1]} : vector<9x32x32xf32> to vector<1x32x32xf32>
        %304 = vector.shape_cast %303 : vector<1x32x32xf32> to vector<32x32xf32>
        %cst_87 = arith.constant dense<0.000000e+00> : vector<32x256xf32>
        %305 = tpu.matmul %304, %302, %cst_87 {dimension_numbers = #tpu.dot_dimension_numbers<[1], [0], [0], [1], [0, 0, 1, 1], [], []>} : vector<32x32xf32>, vector<32x256xf32>, vector<32x256xf32> -> vector<32x256xf32>
        %306 = arith.addf %297, %305 : vector<32x256xf32>
        %307 = vector.extract_strided_slice %252 {offsets = [0, 33], sizes = [32, 256], strides = [1, 1]} : vector<32x290xf32> to vector<32x256xf32>
        %308 = vector.extract_strided_slice %176 {offsets = [7, 0, 0], sizes = [1, 32, 32], strides = [1, 1, 1]} : vector<9x32x32xf32> to vector<1x32x32xf32>
        %309 = vector.shape_cast %308 : vector<1x32x32xf32> to vector<32x32xf32>
        %cst_88 = arith.constant dense<0.000000e+00> : vector<32x256xf32>
        %310 = tpu.matmul %309, %307, %cst_88 {dimension_numbers = #tpu.dot_dimension_numbers<[1], [0], [0], [1], [0, 0, 1, 1], [], []>} : vector<32x32xf32>, vector<32x256xf32>, vector<32x256xf32> -> vector<32x256xf32>
        %311 = arith.addf %306, %310 : vector<32x256xf32>
        %312 = vector.extract_strided_slice %252 {offsets = [0, 34], sizes = [32, 256], strides = [1, 1]} : vector<32x290xf32> to vector<32x256xf32>
        %cst_89 = arith.constant 0.000000e+00 : f32
        %313 = vector.broadcast %cst_89 : f32 to vector<32x256xf32>
        %314 = vector.shape_cast %20 : vector<1x256xi1> to vector<1x256xi1>
        %315 = vector.broadcast %314 : vector<1x256xi1> to vector<32x256xi1>
        %316 = arith.select %315, %312, %313 : vector<32x256xi1>, vector<32x256xf32>
        %317 = vector.extract_strided_slice %176 {offsets = [8, 0, 0], sizes = [1, 32, 32], strides = [1, 1, 1]} : vector<9x32x32xf32> to vector<1x32x32xf32>
        %318 = vector.shape_cast %317 : vector<1x32x32xf32> to vector<32x32xf32>
        %cst_90 = arith.constant dense<0.000000e+00> : vector<32x256xf32>
        %319 = tpu.matmul %318, %316, %cst_90 {dimension_numbers = #tpu.dot_dimension_numbers<[1], [0], [0], [1], [0, 0, 1, 1], [], []>} : vector<32x32xf32>, vector<32x256xf32>, vector<32x256xf32> -> vector<32x256xf32>
        %320 = arith.addf %311, %319 : vector<32x256xf32>
        %cst_91 = arith.constant 0.000000e+00 : f32
        %321 = vector.broadcast %cst_91 : f32 to vector<32x256xf32>
        %322 = arith.maximumf %320, %321 : vector<32x256xf32>
        %323 = arith.addf %322, %arg8 : vector<32x256xf32>
        scf.yield %323 : vector<32x256xf32>
      }
      scf.yield %178 : vector<32x256xf32>
    }
    %c2_i32_26 = arith.constant 2 : i32
    %c0_27 = arith.constant 0 : index
    %c0_28 = arith.constant 0 : index
    %c0_29 = arith.constant 0 : index
    %96 = vector.load %arg5[%c0_27, %c0_28, %c0_29] : memref<9x4x32xf32, #tpu.memory_space<vmem>>, vector<9x4x32xf32>
    %cst_30 = arith.constant 0.000000e+00 : f32
    %97 = vector.broadcast %cst_30 : f32 to vector<32x17xf32>
    %98 = tpu.concatenate %97, %95, %97 in 1 : vector<32x17xf32>, vector<32x256xf32>, vector<32x17xf32> -> vector<32x290xf32>
    %99 = vector.extract_strided_slice %98 {offsets = [0, 0], sizes = [32, 256], strides = [1, 1]} : vector<32x290xf32> to vector<32x256xf32>
    %cst_31 = arith.constant 0.000000e+00 : f32
    %100 = vector.broadcast %cst_31 : f32 to vector<32x256xf32>
    %101 = vector.shape_cast %18 : vector<1x256xi1> to vector<1x256xi1>
    %102 = vector.broadcast %101 : vector<1x256xi1> to vector<32x256xi1>
    %103 = arith.select %102, %99, %100 : vector<32x256xi1>, vector<32x256xf32>
    %104 = vector.extract_strided_slice %96 {offsets = [0, 0, 0], sizes = [1, 4, 32], strides = [1, 1, 1]} : vector<9x4x32xf32> to vector<1x4x32xf32>
    %105 = vector.shape_cast %104 : vector<1x4x32xf32> to vector<4x32xf32>
    %cst_32 = arith.constant dense<0.000000e+00> : vector<4x256xf32>
    %106 = tpu.matmul %105, %103, %cst_32 {dimension_numbers = #tpu.dot_dimension_numbers<[1], [0], [0], [1], [0, 0, 1, 1], [], []>} : vector<4x32xf32>, vector<32x256xf32>, vector<4x256xf32> -> vector<4x256xf32>
    %107 = vector.extract_strided_slice %98 {offsets = [0, 1], sizes = [32, 256], strides = [1, 1]} : vector<32x290xf32> to vector<32x256xf32>
    %108 = vector.extract_strided_slice %96 {offsets = [1, 0, 0], sizes = [1, 4, 32], strides = [1, 1, 1]} : vector<9x4x32xf32> to vector<1x4x32xf32>
    %109 = vector.shape_cast %108 : vector<1x4x32xf32> to vector<4x32xf32>
    %cst_33 = arith.constant dense<0.000000e+00> : vector<4x256xf32>
    %110 = tpu.matmul %109, %107, %cst_33 {dimension_numbers = #tpu.dot_dimension_numbers<[1], [0], [0], [1], [0, 0, 1, 1], [], []>} : vector<4x32xf32>, vector<32x256xf32>, vector<4x256xf32> -> vector<4x256xf32>
    %111 = arith.addf %106, %110 : vector<4x256xf32>
    %112 = vector.extract_strided_slice %98 {offsets = [0, 2], sizes = [32, 256], strides = [1, 1]} : vector<32x290xf32> to vector<32x256xf32>
    %cst_34 = arith.constant 0.000000e+00 : f32
    %113 = vector.broadcast %cst_34 : f32 to vector<32x256xf32>
    %114 = vector.shape_cast %20 : vector<1x256xi1> to vector<1x256xi1>
    %115 = vector.broadcast %114 : vector<1x256xi1> to vector<32x256xi1>
    %116 = arith.select %115, %112, %113 : vector<32x256xi1>, vector<32x256xf32>
    %117 = vector.extract_strided_slice %96 {offsets = [2, 0, 0], sizes = [1, 4, 32], strides = [1, 1, 1]} : vector<9x4x32xf32> to vector<1x4x32xf32>
    %118 = vector.shape_cast %117 : vector<1x4x32xf32> to vector<4x32xf32>
    %cst_35 = arith.constant dense<0.000000e+00> : vector<4x256xf32>
    %119 = tpu.matmul %118, %116, %cst_35 {dimension_numbers = #tpu.dot_dimension_numbers<[1], [0], [0], [1], [0, 0, 1, 1], [], []>} : vector<4x32xf32>, vector<32x256xf32>, vector<4x256xf32> -> vector<4x256xf32>
    %120 = arith.addf %111, %119 : vector<4x256xf32>
    %121 = vector.extract_strided_slice %98 {offsets = [0, 16], sizes = [32, 256], strides = [1, 1]} : vector<32x290xf32> to vector<32x256xf32>
    %cst_36 = arith.constant 0.000000e+00 : f32
    %122 = vector.broadcast %cst_36 : f32 to vector<32x256xf32>
    %123 = vector.shape_cast %18 : vector<1x256xi1> to vector<1x256xi1>
    %124 = vector.broadcast %123 : vector<1x256xi1> to vector<32x256xi1>
    %125 = arith.select %124, %121, %122 : vector<32x256xi1>, vector<32x256xf32>
    %126 = vector.extract_strided_slice %96 {offsets = [3, 0, 0], sizes = [1, 4, 32], strides = [1, 1, 1]} : vector<9x4x32xf32> to vector<1x4x32xf32>
    %127 = vector.shape_cast %126 : vector<1x4x32xf32> to vector<4x32xf32>
    %cst_37 = arith.constant dense<0.000000e+00> : vector<4x256xf32>
    %128 = tpu.matmul %127, %125, %cst_37 {dimension_numbers = #tpu.dot_dimension_numbers<[1], [0], [0], [1], [0, 0, 1, 1], [], []>} : vector<4x32xf32>, vector<32x256xf32>, vector<4x256xf32> -> vector<4x256xf32>
    %129 = arith.addf %120, %128 : vector<4x256xf32>
    %130 = vector.extract_strided_slice %98 {offsets = [0, 17], sizes = [32, 256], strides = [1, 1]} : vector<32x290xf32> to vector<32x256xf32>
    %131 = vector.extract_strided_slice %96 {offsets = [4, 0, 0], sizes = [1, 4, 32], strides = [1, 1, 1]} : vector<9x4x32xf32> to vector<1x4x32xf32>
    %132 = vector.shape_cast %131 : vector<1x4x32xf32> to vector<4x32xf32>
    %cst_38 = arith.constant dense<0.000000e+00> : vector<4x256xf32>
    %133 = tpu.matmul %132, %130, %cst_38 {dimension_numbers = #tpu.dot_dimension_numbers<[1], [0], [0], [1], [0, 0, 1, 1], [], []>} : vector<4x32xf32>, vector<32x256xf32>, vector<4x256xf32> -> vector<4x256xf32>
    %134 = arith.addf %129, %133 : vector<4x256xf32>
    %135 = vector.extract_strided_slice %98 {offsets = [0, 18], sizes = [32, 256], strides = [1, 1]} : vector<32x290xf32> to vector<32x256xf32>
    %cst_39 = arith.constant 0.000000e+00 : f32
    %136 = vector.broadcast %cst_39 : f32 to vector<32x256xf32>
    %137 = vector.shape_cast %20 : vector<1x256xi1> to vector<1x256xi1>
    %138 = vector.broadcast %137 : vector<1x256xi1> to vector<32x256xi1>
    %139 = arith.select %138, %135, %136 : vector<32x256xi1>, vector<32x256xf32>
    %140 = vector.extract_strided_slice %96 {offsets = [5, 0, 0], sizes = [1, 4, 32], strides = [1, 1, 1]} : vector<9x4x32xf32> to vector<1x4x32xf32>
    %141 = vector.shape_cast %140 : vector<1x4x32xf32> to vector<4x32xf32>
    %cst_40 = arith.constant dense<0.000000e+00> : vector<4x256xf32>
    %142 = tpu.matmul %141, %139, %cst_40 {dimension_numbers = #tpu.dot_dimension_numbers<[1], [0], [0], [1], [0, 0, 1, 1], [], []>} : vector<4x32xf32>, vector<32x256xf32>, vector<4x256xf32> -> vector<4x256xf32>
    %143 = arith.addf %134, %142 : vector<4x256xf32>
    %144 = vector.extract_strided_slice %98 {offsets = [0, 32], sizes = [32, 256], strides = [1, 1]} : vector<32x290xf32> to vector<32x256xf32>
    %cst_41 = arith.constant 0.000000e+00 : f32
    %145 = vector.broadcast %cst_41 : f32 to vector<32x256xf32>
    %146 = vector.shape_cast %18 : vector<1x256xi1> to vector<1x256xi1>
    %147 = vector.broadcast %146 : vector<1x256xi1> to vector<32x256xi1>
    %148 = arith.select %147, %144, %145 : vector<32x256xi1>, vector<32x256xf32>
    %149 = vector.extract_strided_slice %96 {offsets = [6, 0, 0], sizes = [1, 4, 32], strides = [1, 1, 1]} : vector<9x4x32xf32> to vector<1x4x32xf32>
    %150 = vector.shape_cast %149 : vector<1x4x32xf32> to vector<4x32xf32>
    %cst_42 = arith.constant dense<0.000000e+00> : vector<4x256xf32>
    %151 = tpu.matmul %150, %148, %cst_42 {dimension_numbers = #tpu.dot_dimension_numbers<[1], [0], [0], [1], [0, 0, 1, 1], [], []>} : vector<4x32xf32>, vector<32x256xf32>, vector<4x256xf32> -> vector<4x256xf32>
    %152 = arith.addf %143, %151 : vector<4x256xf32>
    %153 = vector.extract_strided_slice %98 {offsets = [0, 33], sizes = [32, 256], strides = [1, 1]} : vector<32x290xf32> to vector<32x256xf32>
    %154 = vector.extract_strided_slice %96 {offsets = [7, 0, 0], sizes = [1, 4, 32], strides = [1, 1, 1]} : vector<9x4x32xf32> to vector<1x4x32xf32>
    %155 = vector.shape_cast %154 : vector<1x4x32xf32> to vector<4x32xf32>
    %cst_43 = arith.constant dense<0.000000e+00> : vector<4x256xf32>
    %156 = tpu.matmul %155, %153, %cst_43 {dimension_numbers = #tpu.dot_dimension_numbers<[1], [0], [0], [1], [0, 0, 1, 1], [], []>} : vector<4x32xf32>, vector<32x256xf32>, vector<4x256xf32> -> vector<4x256xf32>
    %157 = arith.addf %152, %156 : vector<4x256xf32>
    %158 = vector.extract_strided_slice %98 {offsets = [0, 34], sizes = [32, 256], strides = [1, 1]} : vector<32x290xf32> to vector<32x256xf32>
    %cst_44 = arith.constant 0.000000e+00 : f32
    %159 = vector.broadcast %cst_44 : f32 to vector<32x256xf32>
    %160 = vector.shape_cast %20 : vector<1x256xi1> to vector<1x256xi1>
    %161 = vector.broadcast %160 : vector<1x256xi1> to vector<32x256xi1>
    %162 = arith.select %161, %158, %159 : vector<32x256xi1>, vector<32x256xf32>
    %163 = vector.extract_strided_slice %96 {offsets = [8, 0, 0], sizes = [1, 4, 32], strides = [1, 1, 1]} : vector<9x4x32xf32> to vector<1x4x32xf32>
    %164 = vector.shape_cast %163 : vector<1x4x32xf32> to vector<4x32xf32>
    %cst_45 = arith.constant dense<0.000000e+00> : vector<4x256xf32>
    %165 = tpu.matmul %164, %162, %cst_45 {dimension_numbers = #tpu.dot_dimension_numbers<[1], [0], [0], [1], [0, 0, 1, 1], [], []>} : vector<4x32xf32>, vector<32x256xf32>, vector<4x256xf32> -> vector<4x256xf32>
    %166 = arith.addf %157, %165 : vector<4x256xf32>
    %167 = arith.addf %166, %22 : vector<4x256xf32>
    %c0_46 = arith.constant 0 : index
    %c0_47 = arith.constant 0 : index
    %c0_48 = arith.constant 0 : index
    %168 = vector.load %arg6[%c0_46, %c0_47, %c0_48] : memref<1x4x256xf32, #tpu.memory_space<vmem>>, vector<1x4x256xf32>
    %169 = vector.shape_cast %168 : vector<1x4x256xf32> to vector<4x256xf32>
    %170 = vector.shape_cast %167 : vector<4x256xf32> to vector<1x4x256xf32>
    tpu.vector_store %arg6[%c0_46, %c0_47, %c0_48], %170 {strides = array<i32>} : memref<1x4x256xf32, #tpu.memory_space<vmem>>, vector<1x4x256xf32>,
    return
  }
  func.func @transform_0(%arg0: i32) -> (i32, i32, i32) {
    %c0_i32 = arith.constant 0 : i32
    %c0_i32_0 = arith.constant 0 : i32
    %c0_i32_1 = arith.constant 0 : i32
    return %arg0, %c0_i32, %c0_i32_0 : i32, i32, i32
  }
  func.func @transform_1(%arg0: i32) -> (i32, i32, i32) {
    %c0_i32 = arith.constant 0 : i32
    %c0_i32_0 = arith.constant 0 : i32
    %c0_i32_1 = arith.constant 0 : i32
    %c0_i32_2 = arith.constant 0 : i32
    return %c0_i32, %c0_i32_0, %c0_i32_1 : i32, i32, i32
  }
  func.func @transform_2(%arg0: i32) -> (i32, i32, i32, i32) {
    %c0_i32 = arith.constant 0 : i32
    %c0_i32_0 = arith.constant 0 : i32
    %c0_i32_1 = arith.constant 0 : i32
    %c0_i32_2 = arith.constant 0 : i32
    %c0_i32_3 = arith.constant 0 : i32
    return %c0_i32, %c0_i32_0, %c0_i32_1, %c0_i32_2 : i32, i32, i32, i32
  }
  func.func @transform_3(%arg0: i32) -> (i32, i32, i32, i32) {
    %c0_i32 = arith.constant 0 : i32
    %c0_i32_0 = arith.constant 0 : i32
    %c0_i32_1 = arith.constant 0 : i32
    %c0_i32_2 = arith.constant 0 : i32
    %c0_i32_3 = arith.constant 0 : i32
    return %c0_i32, %c0_i32_0, %c0_i32_1, %c0_i32_2 : i32, i32, i32, i32
  }
  func.func @transform_4(%arg0: i32) -> (i32, i32, i32) {
    %c0_i32 = arith.constant 0 : i32
    %c0_i32_0 = arith.constant 0 : i32
    %c0_i32_1 = arith.constant 0 : i32
    %c0_i32_2 = arith.constant 0 : i32
    return %c0_i32, %c0_i32_0, %c0_i32_1 : i32, i32, i32
  }
  func.func @transform_5(%arg0: i32) -> (i32, i32, i32) {
    %c0_i32 = arith.constant 0 : i32
    %c0_i32_0 = arith.constant 0 : i32
    %c0_i32_1 = arith.constant 0 : i32
    return %arg0, %c0_i32, %c0_i32_0 : i32, i32, i32
  }
}

</mosaic_0001>

<bundles_post_ra>
// kernel: drrn_forward.1
= control target key start
LH: loop header
LB: loop body
LE: loop exit
PB: predicated region body
PF: predicated region fallthrough
CT: control target
= control target key end

     0   :  { %s7515_s18 = smov 0   ;;  %s9217_s0 = inlined_call_operand.vmem [shape: f32[2,4,256], index: 0, kind: input, shape index: {}]   ;;  %s9218_s1 = inlined_call_operand.vmem [shape: f32[9,32,4], index: 1, kind: input, shape index: {}]   ;;  %s9219_s2 = inlined_call_operand.vmem [shape: f32[2,9,32,32], index: 2, kind: input, shape index: {}]   ;;  %s9220_s3 = inlined_call_operand.vmem [shape: f32[2,9,32,32], index: 3, kind: input, shape index: {}]   ;;  %s9221_s4 = inlined_call_operand.vmem [shape: f32[9,4,32], index: 4, kind: input, shape index: {}]   ;;  %s9222_s5 = inlined_call_operand.vmem [shape: f32[2,4,256], index: 5, kind: output, shape index: {}]  }
   0x1 LB: > { %s5570_s19 = sadd.s32 4294967295, %s7391_s18   ;;  %p5574_p0 = scmp.ge.s32.totalorder %s7391_s18, 1  ;;  %s7391_s18 = sphi %s7515_s18, %s15_s18  }
   0x2   : > { %p187_p1 = scmp.lt.s32.totalorder %s7391_s18, 3 }
   0x4   : > { %p188_p2 = pnand %p5574_p0, %p187_p1 }
   0x6   : > { %191 = sbr.rel (%p188_p2) target bundleno = 2363 (0x93b), region = 40 }
   0xd   : > { %p215_p3 = scmp.lt.s32.totalorder %s5570_s19, 1  ;;  %s7465_s27 = smov 17   ;;  %vm9238_vm0 = vcmask 138240   ;;  %v9223_v2 = vmov 0.0   ;;  %v225_v8 = vlaneseq  ;;  %vm9237_vm1 = vcmask 1039360   ;;  %v261_v20 = vld [vmem:[%s9218_s1 + $0x20] sm:$0xff] }
   0xe   : > { %405 = vmatprep.mubr.f32.mxu1 %v9223_v2  ;;  %886 = vmatprep.mubr.f32.mxu0 %v9223_v2  ;;  %s7467_s28 = smov 127   ;;  %s7468_s29 = smov 111   ;;  %vm336_vm2 = vcmask 1043456   ;;  %vm323_vm4 = vcmask 31744   ;;  %vm9243_vm6 = vcmask 908288   ;;  %v262_v28 = vld [vmem:[%s9218_s1 + $0x28] sm:$0xff] }
   0xf   : > { %s9549_s19 = smov (!%p215_p3, %s5570_s19), 1  ;;  %s7469_s30 = smov 110   ;;  %v226_v9 = vand.u32 127, %v225_v8  ;;  %v273_v31 = vld [vmem:[%s9218_s1 + $0x80] sm:$0xff]  ;;  %vm9242_vm7 = vcmask 900096   ;;  %v263_v33 = vld [vmem:[%s9218_s1 + $0x30] sm:$0xff] }
  0x10   : > { %s5860_s20 = sshll.u32 %s9549_s19, 3  ;;  %s7470_s6 = smov 96   ;;  %v274_v39 = vld [vmem:[%s9218_s1 + $0x88] sm:$0xff]  ;;  %v264_v41 = vld [vmem:[%s9218_s1 + $0x38] sm:$0xff]  ;;  %vm9241_vm10 = vcmask 785408   ;;  %v277_v46 = vld [vmem:[%s9218_s1 + $0xa0] sm:$0xff] }
  0x11   : > { %s219_s23 = scalar_lea.vmem %s9217_s0, %s5860_s20  ;;  %s7529_s26 = scalar_lea.vmem %s9222_s5, %s5860_s20  ;;  %v227_v11 = vadd.s32 128, %v226_v9  ;;  %v232_v15 = vand.u32 15, %v226_v9  ;;  %v257_v48 = vld [vmem:[%s9218_s1] sm:$0xff]  ;;  %v278_v51 = vld [vmem:[%s9218_s1 + $0xa8] sm:$0xff]  ;;  %vm547_vm11 = vcmask 1031168   ;;  %v279_v57 = vld [vmem:[%s9218_s1 + $0xb0] sm:$0xff] }
  0x12   : > { %v7531_v0 = vld [vmem:[%s219_s23] sm:$0xff]  ;;  %s7471_s7 = smov 126   ;;  %s7472_s8 = smov 95   ;;  %v258_v53 = vld [vmem:[%s9218_s1 + $0x8] sm:$0xff]  ;;  %v259_v60 = vld [vmem:[%s9218_s1 + $0x10] sm:$0xff]  ;;  %vm9240_vm12 = vcmask 777216  }
  0x13   : > { %9245 = vst [vmem:[#allocation2_spill] sm:$0xff] %v7531_v0  ;;  %295 = vrot.lane.b32.xlu0 %v7531_v0, %s7465_s27  ;;  %v7537_v1 = vcombine.high %v7531_v0, %v7531_v0  ;;  %s7473_s9 = smov 112   ;;  %s7474_s10 = smov 94   ;;  %v239_v14 = vand.u32 15, %v227_v11  ;;  %vm7588_vm5 = vcmp.ge.s32.totalorder %v232_v15, 1  ;;  %vm7630_vm9 = vcmp.le.s32.totalorder %v232_v15, 14 }
  0x14   : > { %v281_v8 = vld [vmem:[%s9218_s1 + $0xc0] sm:$0xff]  ;;  %vm9244_vm13 = vcmask 916480   ;;  %vm9239_vm14 = vcmask 769024   ;;  %s7859_s13 = smov 0  }
  0x15   : > { %9246 = vst [vmem:[#allocation3_spill] sm:$0xff] %v7537_v1  ;;  %vm7580_vm3 = vcmp.ge.s32.totalorder %v239_v14, 1  ;;  %vm7626_vm8 = vcmp.le.s32.totalorder %v239_v14, 14 }
  0x17   : > { %297 = vrot.lane.b32.xlu0 %v7537_v1, %s7465_s27 }
  0x85   : > { %v296_v3 = vpop.permute.xlu0 %295 }
  0x86   : > { %v7544_v4 = vsel %vm9238_vm0, 0.0, %v296_v3 }
  0x87   : > { %314 = vrot.lane.b32.xlu0 %v7544_v4, %s7467_s28  ;;  %v310_v26 = vsel %vm7588_vm5, %v7544_v4, 0.0 }
  0x89   : > { %v298_v5 = vpop.permute.xlu0 %297 }
  0x8a   : > { %v300_v6 = vsel %vm9238_vm0, %v296_v3, %v298_v5  ;;  %v305_v7 = vsel %vm9238_vm0, %v298_v5, 0.0 }
  0x8b   : > { %799 = vrot.lane.b32.xlu0 %v300_v6, %s7468_s29  ;;  %316 = vrot.lane.b32.xlu1 %v300_v6, %s7467_s28  ;;  %v311_v23 = vsel %vm7580_vm3, %v300_v6, 0.0 }
  0x8f   : > { %921 = vrot.lane.b32.xlu0 %v300_v6, %s7469_s30  ;;  %318 = vrot.lane.b32.xlu1 %v305_v7, %s7467_s28 }
  0x93   : > { %919 = vrot.lane.b32.xlu0 %v7544_v4, %s7469_s30  ;;  %801 = vrot.lane.b32.xlu1 %v305_v7, %s7468_s29 }
  0x97   : > { %1051 = vrot.lane.b32.xlu0 %v305_v7, %s7470_s6  ;;  %797 = vrot.lane.b32.xlu1 %v7544_v4, %s7468_s29 }
  0x9b   : > { %543 = vrot.lane.b32.xlu0 %v300_v6, %s7471_s7  ;;  %923 = vrot.lane.b32.xlu1 %v305_v7, %s7469_s30 }
  0x9f   : > { %541 = vrot.lane.b32.xlu0 %v7544_v4, %s7471_s7  ;;  %1049 = vrot.lane.b32.xlu1 %v300_v6, %s7470_s6 }
  0xa3   : > { %1179 = vrot.lane.b32.xlu0 %v305_v7, %s7472_s8  ;;  %1047 = vrot.lane.b32.xlu1 %v7544_v4, %s7470_s6 }
  0xa7   : > { %671 = vrot.lane.b32.xlu0 %v300_v6, %s7473_s9  ;;  %545 = vrot.lane.b32.xlu1 %v305_v7, %s7471_s7 }
  0xab   : > { %669 = vrot.lane.b32.xlu0 %v7544_v4, %s7473_s9  ;;  %1177 = vrot.lane.b32.xlu1 %v300_v6, %s7472_s8 }
  0xaf   : > { %1301 = vrot.lane.b32.xlu0 %v305_v7, %s7474_s10  ;;  %1175 = vrot.lane.b32.xlu1 %v7544_v4, %s7472_s8 }
  0xb3   : > { %673 = vrot.lane.b32.xlu1 %v305_v7, %s7473_s9 }
  0xb7   : > { %1299 = vrot.lane.b32.xlu1 %v300_v6, %s7474_s10  ;;  %v260_v6 = vld [vmem:[%s9218_s1 + $0x18] sm:$0xff] }
  0xbb   : > { %1297 = vrot.lane.b32.xlu1 %v7544_v4, %s7474_s10  ;;  %v280_v4 = vld [vmem:[%s9218_s1 + $0xb8] sm:$0xff] }
  0xf9   : > { %v315_v10 = vpop.permute.xlu0 %314 }
  0xfd   : > { %v317_v12 = vpop.permute.xlu1 %316  ;;  %v800_v13 = vpop.permute.xlu0 %799 }
  0xfe   : > { %v321_v22 = vsel %vm9237_vm1, %v315_v10, %v317_v12  ;;  %v265_v10 = vld [vmem:[%s9218_s1 + $0x40] sm:$0xff] }
 0x101   : > { %v319_v16 = vpop.permute.xlu1 %318  ;;  %v922_v17 = vpop.permute.xlu0 %921 }
 0x102   : > { %v322_v19 = vsel %vm9237_vm1, %v317_v12, %v319_v16  ;;  %v266_v16 = vld [vmem:[%s9218_s1 + $0x48] sm:$0xff] }
 0x103   : > { %5579 = vmatprep.subr.msk.mxu1 %vm336_vm2, %v322_v19 }
 0x104   : > { %5580 = vmatpush1.msk.msra.mxu1 %vm336_vm2, %v321_v22 }
 0x105   : > { %v802_v24 = vpop.permute.xlu1 %801  ;;  %5581 = vmatmul.mubr.msk.f32.vlgmr.msra.gmra.mrb[0].mxu1 %vm323_vm4, %v261_v20  ;;  %5585 = vmatprep.subr.msk.mxu1 %vm336_vm2, %v311_v23  ;;  %v920_v25 = vpop.permute.xlu0 %919  ;;  %v283_v23 = vld [vmem:[%s9218_s1 + $0xd0] sm:$0xff] }
 0x106   : > { %5586 = vmatpush1.msk.msra.mxu1 %vm336_vm2, %v310_v26  ;;  %v7604_v27 = vsel %vm9243_vm6, %v800_v13, %v802_v24  ;;  %411 = vmatprep.mubr.f32.mxu1 %v9223_v2  ;;  %v926_v36 = vsel %vm9242_vm7, %v920_v25, %v922_v17  ;;  %v267_v25 = vld [vmem:[%s9218_s1 + $0x50] sm:$0xff] }
 0x107   : > { %5603 = vmatprep.subr.msk.mxu0 %vm336_vm2, %v7604_v27  ;;  %v930_v43 = vsel %vm7630_vm9, %v926_v36, 0.0 }
 0x109   : > { %v798_v29 = vpop.permute.xlu1 %797  ;;  %5582 = vmatmul.mubr.msk.f32.gmra.mrb[2].mxu1 %vm323_vm4, %v262_v28  ;;  %v1052_v30 = vpop.permute.xlu0 %1051  ;;  %v284_v28 = vld [vmem:[%s9218_s1 + $0xd8] sm:$0xff] }
 0x10a   : > { %v7617_v32 = vsel %vm9243_vm6, %v798_v29, %v800_v13  ;;  %417 = vmatprep.mubr.f32.mxu1 %v9223_v2  ;;  %v282_v13 = vld [vmem:[%s9218_s1 + $0xc8] sm:$0xff] }
 0x10b   : > { %5604 = vmatpush1.msk.msra.mxu0 %vm336_vm2, %v7617_v32 }
 0x10c   : > { %5605 = vmatmul.mubr.msk.f32.vlgmr.msra.gmra.mrb[0].mxu0 %vm323_vm4, %v273_v31  ;;  %v285_v31 = vld [vmem:[%s9218_s1 + $0xe0] sm:$0xff] }
 0x10d   : > { %v924_v37 = vpop.permute.xlu1 %923  ;;  %5583 = vmatmul.mubr.msk.f32.gmra.mrb[4].mxu1 %vm323_vm4, %v263_v33  ;;  %v544_v38 = vpop.permute.xlu0 %543  ;;  %892 = vmatprep.mubr.f32.mxu0 %v9223_v2  ;;  %v269_v33 = vld [vmem:[%s9218_s1 + $0x60] sm:$0xff] }
 0x10e   : > { %v927_v40 = vsel %vm9242_vm7, %v922_v17, %v924_v37  ;;  %423 = vmatprep.mubr.f32.mxu1 %v9223_v2  ;;  %v286_v37 = vld [vmem:[%s9218_s1 + $0xe8] sm:$0xff] }
 0x10f   : > { %v931_v42 = vsel %vm7626_vm8, %v927_v40, 0.0  ;;  %v288_v40 = vld [vmem:[%s9218_s1 + $0xf8] sm:$0xff] }
 0x110   : > { %5606 = vmatmul.mubr.msk.f32.gmra.mrb[2].mxu0 %vm323_vm4, %v274_v39  ;;  %5609 = vmatprep.subr.msk.mxu0 %vm336_vm2, %v931_v42  ;;  %v287_v39 = vld [vmem:[%s9218_s1 + $0xf0] sm:$0xff]  ;;  %v289_v42 = vld [vmem:[%s9218_s1 + $0x100] sm:$0xff] }
 0x111   : > { %v1050_v44 = vpop.permute.xlu1 %1049  ;;  %5584 = vmatmul.mubr.msk.f32.gmra.mrb[6].mxu1 %vm323_vm4, %v264_v41  ;;  %5610 = vmatpush1.msk.msra.mxu0 %vm336_vm2, %v930_v43  ;;  %v542_v45 = vpop.permute.xlu0 %541  ;;  %v272_v41 = vld [vmem:[%s9218_s1 + $0x78] sm:$0xff]  ;;  %v275_v43 = vld [vmem:[%s9218_s1 + $0x90] sm:$0xff] }
 0x112   : > { %v1055_v47 = vsel %vm9241_vm10, %v1050_v44, %v1052_v30  ;;  %1014 = vmatprep.mubr.f32.mxu0 %v9223_v2  ;;  %512 = vmatprep.mubr.f32.mxu1 %v9223_v2  ;;  %v548_v58 = vsel %vm547_vm11, %v542_v45, %v544_v38  ;;  %v268_v30 = vld [vmem:[%s9218_s1 + $0x58] sm:$0xff] }
 0x113   : > { %v1059_v49 = vsel %vm7580_vm3, %v1055_v47, 0.0  ;;  %v552_v62 = vsel %vm7630_vm9, %v548_v58, 0.0  ;;  %v276_v45 = vld [vmem:[%s9218_s1 + $0x98] sm:$0xff] }
 0x114   : > { %5611 = vmatmul.mubr.msk.f32.vlgmr.msra.gmra.mrb[0].mxu0 %vm323_vm4, %v277_v46  ;;  %5615 = vmatprep.subr.msk.mxu0 %vm336_vm2, %v1059_v49  ;;  %v291_v46 = vld [vmem:[%s9218_s1 + $0x110] sm:$0xff]  ;;  %v292_v47 = vld [vmem:[%s9218_s1 + $0x118] sm:$0xff] }
 0x115   : > { %v1048_v50 = vpop.permute.xlu1 %1047  ;;  %5587 = vmatmul.mubr.msk.f32.vlgmr.msra.gmra.mrb[0].mxu1 %vm323_vm4, %v257_v48  ;;  %1020 = vmatprep.mubr.f32.mxu0 %v9223_v2  ;;  %v1180_v55 = vpop.permute.xlu0 %1179 }
 0x116   : > { %v1054_v52 = vsel %vm9241_vm10, %v1048_v50, %v1050_v44  ;;  %518 = vmatprep.mubr.f32.mxu1 %v9223_v2  ;;  %v290_v44 = vld [vmem:[%s9218_s1 + $0x108] sm:$0xff] }
 0x117   : > { %v1058_v54 = vsel %vm7588_vm5, %v1054_v52, 0.0 }
 0x118   : > { %5612 = vmatmul.mubr.msk.f32.gmra.mrb[2].mxu0 %vm323_vm4, %v278_v51 }
 0x119   : > { %5616 = vmatpush1.msk.msra.mxu0 %vm336_vm2, %v1058_v54  ;;  %v546_v56 = vpop.permute.xlu1 %545  ;;  %5588 = vmatmul.mubr.msk.f32.gmra.mrb[2].mxu1 %vm323_vm4, %v258_v53  ;;  %v672_v63 = vpop.permute.xlu0 %671 }
 0x11a   : > { %v549_v59 = vsel %vm547_vm11, %v544_v38, %v546_v56  ;;  %1026 = vmatprep.mubr.f32.mxu0 %v9223_v2  ;;  %524 = vmatprep.mubr.f32.mxu1 %v9223_v2  ;;  %v270_v38 = vld [vmem:[%s9218_s1 + $0x68] sm:$0xff] }
 0x11b   : > { %v553_v61 = vsel %vm7626_vm8, %v549_v59, 0.0 }
 0x11c   : > { %5591 = vmatprep.subr.msk.mxu1 %vm336_vm2, %v553_v61  ;;  %5613 = vmatmul.mubr.msk.f32.gmra.mrb[4].mxu0 %vm323_vm4, %v279_v57 }
 0x11d   : > { %v1178_v3 = vpop.permute.xlu1 %1177  ;;  %5589 = vmatmul.mubr.msk.f32.gmra.mrb[4].mxu1 %vm323_vm4, %v259_v60  ;;  %1032 = vmatprep.mubr.f32.mxu0 %v9223_v2  ;;  %v670_v11 = vpop.permute.xlu0 %669 }
 0x11e   : > { %v1183_v5 = vsel %vm9240_vm12, %v1178_v3, %v1180_v55  ;;  %5592 = vmatpush1.msk.msra.mxu1 %vm336_vm2, %v552_v62  ;;  %530 = vmatprep.mubr.f32.mxu1 %v9223_v2  ;;  %v676_v14 = vsel %vm9244_vm13, %v670_v11, %v672_v63 }
 0x11f   : > { %5621 = vmatprep.subr.msk.mxu0 %vm336_vm2, %v1183_v5  ;;  %v680_v19 = vsel %vm7588_vm5, %v676_v14, 0.0 }
 0x120   : > { %5614 = vmatmul.mubr.msk.f32.gmra.mrb[6].mxu0 %vm323_vm4, %v280_v4 }
 0x121   : > { %v1176_v7 = vpop.permute.xlu1 %1175  ;;  %5590 = vmatmul.mubr.msk.f32.gmra.mrb[6].mxu1 %vm323_vm4, %v260_v6  ;;  %1142 = vmatprep.mubr.f32.mxu0 %v9223_v2  ;;  %v1302_v20 = vpop.permute.xlu0 %1301 }
 0x122   : > { %v1182_v9 = vsel %vm9240_vm12, %v1176_v7, %v1178_v3  ;;  %636 = vmatprep.mubr.f32.mxu1 %v9223_v2 }
 0x124   : > { %5617 = vmatmul.mubr.msk.f32.vlgmr.msra.gmra.mrb[0].mxu0 %vm323_vm4, %v281_v8 }
 0x125   : > { %5622 = vmatpush1.msk.msra.mxu0 %vm336_vm2, %v1182_v9  ;;  %v674_v12 = vpop.permute.xlu1 %673  ;;  %5593 = vmatmul.mubr.msk.f32.vlgmr.msra.gmra.mrb[0].mxu1 %vm323_vm4, %v265_v10 }
 0x126   : > { %v677_v15 = vsel %vm9244_vm13, %v672_v63, %v674_v12  ;;  %1148 = vmatprep.mubr.f32.mxu0 %v9223_v2  ;;  %642 = vmatprep.mubr.f32.mxu1 %v9223_v2 }
 0x127   : > { %v681_v17 = vsel %vm7580_vm3, %v677_v15, 0.0 }
 0x128   : > { %5597 = vmatprep.subr.msk.mxu1 %vm336_vm2, %v681_v17  ;;  %5618 = vmatmul.mubr.msk.f32.gmra.mrb[2].mxu0 %vm323_vm4, %v282_v13 }
 0x129   : > { %v1300_v22 = vpop.permute.xlu1 %1299  ;;  %5594 = vmatmul.mubr.msk.f32.gmra.mrb[2].mxu1 %vm323_vm4, %v266_v16  ;;  %1154 = vmatprep.mubr.f32.mxu0 %v9223_v2 }
 0x12a   : > { %v1305_v24 = vsel %vm9239_vm14, %v1300_v22, %v1302_v20  ;;  %5598 = vmatpush1.msk.msra.mxu1 %vm336_vm2, %v680_v19  ;;  %648 = vmatprep.mubr.f32.mxu1 %v9223_v2 }
 0x12b   : > { %v1309_v26 = vsel %vm7626_vm8, %v1305_v24, 0.0  ;;  %6150 = vmatprep.subr.msk.mxu1 %vm336_vm2, %v7604_v27 }
 0x12c   : > { %5619 = vmatmul.mubr.msk.f32.gmra.mrb[4].mxu0 %vm323_vm4, %v283_v23  ;;  %5627 = vmatprep.subr.msk.mxu0 %vm336_vm2, %v1309_v26 }
 0x12d   : > { %5595 = vmatmul.mubr.msk.f32.gmra.mrb[4].mxu1 %vm323_vm4, %v267_v25  ;;  %1160 = vmatprep.mubr.f32.mxu0 %v9223_v2  ;;  %v1298_v29 = vpop.permute.xlu1 %1297 }
 0x12e   : > { %654 = vmatprep.mubr.f32.mxu1 %v9223_v2  ;;  %v1304_v27 = vsel %vm9239_vm14, %v1298_v29, %v1300_v22 }
 0x12f   : > { %v1308_v36 = vsel %vm7630_vm9, %v1304_v27, 0.0 }
 0x130   : > { %5620 = vmatmul.mubr.msk.f32.gmra.mrb[6].mxu0 %vm323_vm4, %v284_v28 }
 0x131   : > { %5596 = vmatmul.mubr.msk.f32.gmra.mrb[6].mxu1 %vm323_vm4, %v268_v30  ;;  %1264 = vmatprep.mubr.f32.mxu0 %v9223_v2 }
 0x132   : > { %764 = vmatprep.mubr.f32.mxu1 %v9223_v2 }
 0x134   : > { %5623 = vmatmul.mubr.msk.f32.vlgmr.msra.gmra.mrb[0].mxu0 %vm323_vm4, %v285_v31 }
 0x135   : > { %5628 = vmatpush1.msk.msra.mxu0 %vm336_vm2, %v1308_v36  ;;  %5599 = vmatmul.mubr.msk.f32.vlgmr.msra.gmra.mrb[0].mxu1 %vm323_vm4, %v269_v33 }
 0x136   : > { %6151 = vmatpush1.msk.msra.mxu1 %vm336_vm2, %v7617_v32  ;;  %1270 = vmatprep.mubr.f32.mxu0 %v9223_v2  ;;  %v271_v32 = vld [vmem:[%s9218_s1 + $0x70] sm:$0xff] }
 0x137   : > { %770 = vmatprep.mubr.f32.mxu1 %v9223_v2 }
 0x138   : > { %5624 = vmatmul.mubr.msk.f32.gmra.mrb[2].mxu0 %vm323_vm4, %v286_v37 }
 0x139   : > { %5600 = vmatmul.mubr.msk.f32.gmra.mrb[2].mxu1 %vm323_vm4, %v270_v38  ;;  %1276 = vmatprep.mubr.f32.mxu0 %v9223_v2 }
 0x13a   : > { %776 = vmatprep.mubr.f32.mxu1 %v9223_v2 }
 0x13c   : > { %5625 = vmatmul.mubr.msk.f32.gmra.mrb[4].mxu0 %vm323_vm4, %v287_v39 }
 0x13d   : > { %5601 = vmatmul.mubr.msk.f32.gmra.mrb[4].mxu1 %vm323_vm4, %v271_v32  ;;  %1282 = vmatprep.mubr.f32.mxu0 %v9223_v2 }
 0x13e   : > { %782 = vmatprep.mubr.f32.mxu1 %v9223_v2 }
 0x140   : > { %5626 = vmatmul.mubr.msk.f32.gmra.mrb[6].mxu0 %vm323_vm4, %v288_v40 }
 0x141   : > { %5602 = vmatmul.mubr.msk.f32.gmra.mrb[6].mxu1 %vm323_vm4, %v272_v41  ;;  %1392 = vmatprep.mubr.f32.mxu0 %v9223_v2 }
 0x142   : > { %898 = vmatprep.mubr.f32.mxu1 %v9223_v2 }
 0x144   : > { %5629 = vmatmul.mubr.msk.f32.vlgmr.msra.gmra.mrb[0].mxu0 %vm323_vm4, %v289_v42 }
 0x145   : > { %5607 = vmatmul.mubr.msk.f32.vlgmr.msra.gmra.mrb[4].mxu1 %vm323_vm4, %v275_v43  ;;  %1398 = vmatprep.mubr.f32.mxu0 %v9223_v2 }
 0x146   : > { %904 = vmatprep.mubr.f32.mxu1 %v9223_v2 }
 0x148   : > { %5630 = vmatmul.mubr.msk.f32.gmra.mrb[2].mxu0 %vm323_vm4, %v290_v44 }
 0x149   : > { %5608 = vmatmul.mubr.msk.f32.gmra.mrb[6].mxu1 %vm323_vm4, %v276_v45  ;;  %1404 = vmatprep.mubr.f32.mxu0 %v9223_v2 }
 0x14c   : > { %5631 = vmatmul.mubr.msk.f32.gmra.mrb[4].mxu0 %vm323_vm4, %v291_v46 }
 0x14d   : > { %1410 = vmatprep.mubr.f32.mxu0 %v9223_v2 }
 0x150   : > { %5632 = vmatmul.mubr.msk.f32.gmra.mrb[6].mxu0 %vm323_vm4, %v292_v47 }
 0x208   : > { %v766_v48 = vpop.f32.mrb[0].mxu1 }
 0x209   : > { %v768_v49 = vpop.f32.mrb[1].mxu1 }
 0x20c   : > { %v772_v50 = vpop.f32.mrb[2].mxu1 }
 0x20d   : > { %v774_v51 = vpop.f32.mrb[3].mxu1 }
 0x217   : > { %v1394_v52 = vpop.f32.mrb[0].mxu0 }
 0x218   : > { %v6152_v53 = vadd.f32 %v1394_v52, %v766_v48   ;;  %v900_v54 = vpop.f32.mrb[4].mxu1  ;;  %v1396_v55 = vpop.f32.mrb[1].mxu0 }
 0x219   : > { %v6153_v56 = vadd.f32 %v1396_v55, %v768_v49   ;;  %v902_v57 = vpop.f32.mrb[5].mxu1 }
 0x21b   : > { %v1400_v58 = vpop.f32.mrb[2].mxu0 }
 0x21c   : > { %v6154_v59 = vadd.f32 %v1400_v58, %v772_v50   ;;  %v906_v60 = vpop.f32.mrb[6].mxu1  ;;  %v1402_v61 = vpop.f32.mrb[3].mxu0 }
 0x21d   : > { %v6155_v62 = vadd.f32 %v1402_v61, %v774_v51   ;;  %v908_v63 = vpop.f32.mrb[7].mxu1 }
 0x21f   : > { %v1406_v3 = vpop.f32.mrb[4].mxu0 }
 0x220   : > { %v6156_v4 = vadd.f32 %v1406_v3, %v900_v54   ;;  %v1408_v5 = vpop.f32.mrb[5].mxu0 }
 0x221   : > { %v6157_v6 = vadd.f32 %v1408_v5, %v902_v57  }
 0x223   : > { %v1412_v7 = vpop.f32.mrb[6].mxu0 }
 0x224   : > { %v6158_v8 = vadd.f32 %v1412_v7, %v906_v60   ;;  %v1414_v9 = vpop.f32.mrb[7].mxu0 }
 0x225   : > { %v6159_v10 = vadd.f32 %v1414_v9, %v908_v63  }
 0x226 LB: >> { %9255 = vst [vmem:[#allocation4_spill] sm:$0xff] %v7395_v10  ;;  %9256 = vst [vmem:[#allocation5_spill] sm:$0xff] %v7399_v8  ;;  %s1439_s14 = smul.u32 288, %s7427_s13  ;;  %s8143_s22 = smov 0   ;;  %s7427_s13 = sphi %s7859_s13, %s1430_s13   ;;  %v7423_v53 = vphi %v6152_v53, %v9477_v53   ;;  %v7419_v56 = vphi %v6153_v56, %v9476_v56   ;;  %v7415_v59 = vphi %v6154_v59, %v9475_v59   ;;  %v7411_v62 = vphi %v6155_v62, %v9474_v62   ;;  %v7407_v4 = vphi %v6156_v4, %v9473_v4   ;;  %v7403_v6 = vphi %v6157_v6, %v9472_v6   ;;  %v7399_v8 = vphi %v6158_v8, %v9471_v8   ;;  %v7395_v10 = vphi %v6159_v10, %v9470_v10  }
 0x227   : >> { %9257 = vst [vmem:[#allocation6_spill] sm:$0xff] %v7403_v6  ;;  %9258 = vst [vmem:[#allocation7_spill] sm:$0xff] %v7407_v4 }
 0x228   : >> { %9259 = vst [vmem:[#allocation8_spill] sm:$0xff] %v7411_v62  ;;  %9260 = vst [vmem:[#allocation9_spill] sm:$0xff] %v7415_v59  ;;  %s7894_s17 = scalar_lea.vmem %s9219_s2, %s1439_s14  ;;  %s7991_s21 = scalar_lea.vmem %s9220_s3, %s1439_s14 }
 0x229   : >> { %9261 = vst [vmem:[#allocation10_spill] sm:$0xff] %v7419_v56  ;;  %9262 = vst [vmem:[#allocation11_spill] sm:$0xff] %v7423_v53  ;;  %v7897_v11 = vld [vmem:[%s7894_s17] sm:$0xff]  ;;  %v7900_v12 = vld [vmem:[%s7894_s17 + $0x8] sm:$0xff] }
 0x22a   : >> { %9263 = vst [vmem:[#allocation12_spill] sm:$0xff] %v7897_v11  ;;  %9264 = vst [vmem:[#allocation13_spill] sm:$0xff] %v7900_v12  ;;  %v7903_v13 = vld [vmem:[%s7894_s17 + $0x10] sm:$0xff]  ;;  %v7906_v14 = vld [vmem:[%s7894_s17 + $0x18] sm:$0xff] }
 0x22b   : >> { %9265 = vst [vmem:[#allocation14_spill] sm:$0xff] %v7903_v13  ;;  %9266 = vst [vmem:[#allocation15_spill] sm:$0xff] %v7906_v14  ;;  %v7909_v15 = vld [vmem:[%s7894_s17 + $0x20] sm:$0xff]  ;;  %v7912_v16 = vld [vmem:[%s7894_s17 + $0x28] sm:$0xff] }
 0x22c   : >> { %9267 = vst [vmem:[#allocation16_spill] sm:$0xff] %v7909_v15  ;;  %v7915_v17 = vld [vmem:[%s7894_s17 + $0x30] sm:$0xff]  ;;  %v7918_v19 = vld [vmem:[%s7894_s17 + $0x38] sm:$0xff]  ;;  %v7921_v20 = vld [vmem:[%s7894_s17 + $0x40] sm:$0xff] }
 0x22d   : >> { %v7924_v22 = vld [vmem:[%s7894_s17 + $0x48] sm:$0xff]  ;;  %v7927_v23 = vld [vmem:[%s7894_s17 + $0x50] sm:$0xff]  ;;  %v7930_v24 = vld [vmem:[%s7894_s17 + $0x58] sm:$0xff] }
 0x22e   : >> { %v7933_v25 = vld [vmem:[%s7894_s17 + $0x60] sm:$0xff]  ;;  %v7936_v26 = vld [vmem:[%s7894_s17 + $0x68] sm:$0xff]  ;;  %v7939_v28 = vld [vmem:[%s7894_s17 + $0x70] sm:$0xff] }
 0x22f   : >> { %v7942_v29 = vld [vmem:[%s7894_s17 + $0x78] sm:$0xff]  ;;  %v7945_v30 = vld [vmem:[%s7894_s17 + $0x80] sm:$0xff]  ;;  %v7948_v27 = vld [vmem:[%s7894_s17 + $0x88] sm:$0xff] }
 0x230   : >> { %v7951_v31 = vld [vmem:[%s7894_s17 + $0x90] sm:$0xff]  ;;  %v7954_v33 = vld [vmem:[%s7894_s17 + $0x98] sm:$0xff]  ;;  %v7957_v36 = vld [vmem:[%s7894_s17 + $0xa0] sm:$0xff] }
 0x231   : >> { %v7960_v37 = vld [vmem:[%s7894_s17 + $0xa8] sm:$0xff]  ;;  %v7963_v38 = vld [vmem:[%s7894_s17 + $0xb0] sm:$0xff]  ;;  %v7966_v39 = vld [vmem:[%s7894_s17 + $0xb8] sm:$0xff] }
 0x232   : >> { %v7969_v32 = vld [vmem:[%s7894_s17 + $0xc0] sm:$0xff]  ;;  %v7972_v40 = vld [vmem:[%s7894_s17 + $0xc8] sm:$0xff]  ;;  %v7975_v41 = vld [vmem:[%s7894_s17 + $0xd0] sm:$0xff] }
 0x233   : >> { %v7978_v42 = vld [vmem:[%s7894_s17 + $0xd8] sm:$0xff]  ;;  %v7981_v43 = vld [vmem:[%s7894_s17 + $0xe0] sm:$0xff]  ;;  %v7984_v44 = vld [vmem:[%s7894_s17 + $0xe8] sm:$0xff] }
 0x234   : >> { %v7994_v45 = vld [vmem:[%s7894_s17 + $0xf0] sm:$0xff]  ;;  %v7997_v46 = vld [vmem:[%s7894_s17 + $0xf8] sm:$0xff]  ;;  %v8000_v47 = vld [vmem:[%s7894_s17 + $0x100] sm:$0xff] }
 0x235   : >> { %9268 = vst [vmem:[#allocation17_spill] sm:$0xff] %v7997_v46  ;;  %9269 = vst [vmem:[#allocation18_spill] sm:$0xff] %v8000_v47  ;;  %v8003_v48 = vld [vmem:[%s7894_s17 + $0x108] sm:$0xff]  ;;  %v8006_v49 = vld [vmem:[%s7894_s17 + $0x110] sm:$0xff] }
 0x236   : >> { %9270 = vst [vmem:[#allocation19_spill] sm:$0xff] %v8003_v48  ;;  %9271 = vst [vmem:[#allocation20_spill] sm:$0xff] %v8006_v49  ;;  %v8009_v50 = vld [vmem:[%s7894_s17 + $0x118] sm:$0xff]  ;;  %v8012_v51 = vld [vmem:[%s7991_s21] sm:$0xff] }
 0x237   : >> { %9272 = vst [vmem:[#allocation21_spill] sm:$0xff] %v8009_v50  ;;  %9273 = vst [vmem:[#allocation22_spill] sm:$0xff] %v8012_v51  ;;  %v8015_v52 = vld [vmem:[%s7991_s21 + $0x8] sm:$0xff]  ;;  %v8018_v54 = vld [vmem:[%s7991_s21 + $0x10] sm:$0xff] }
 0x238   : >> { %9274 = vst [vmem:[#allocation23_spill] sm:$0xff] %v8015_v52  ;;  %9275 = vst [vmem:[#allocation24_spill] sm:$0xff] %v8018_v54  ;;  %v8021_v55 = vld [vmem:[%s7991_s21 + $0x18] sm:$0xff]  ;;  %v8024_v57 = vld [vmem:[%s7991_s21 + $0x20] sm:$0xff] }
 0x239   : >> { %9276 = vst [vmem:[#allocation25_spill] sm:$0xff] %v8021_v55  ;;  %9277 = vst [vmem:[#allocation26_spill] sm:$0xff] %v8024_v57  ;;  %v8027_v58 = vld [vmem:[%s7991_s21 + $0x28] sm:$0xff]  ;;  %v8030_v60 = vld [vmem:[%s7991_s21 + $0x30] sm:$0xff] }
 0x23a   : >> { %9278 = vst [vmem:[#allocation27_spill] sm:$0xff] %v8027_v58  ;;  %9279 = vst [vmem:[#allocation28_spill] sm:$0xff] %v8030_v60  ;;  %v8033_v61 = vld [vmem:[%s7991_s21 + $0x38] sm:$0xff]  ;;  %v8036_v63 = vld [vmem:[%s7991_s21 + $0x40] sm:$0xff] }
 0x23b   : >> { %9280 = vst [vmem:[#allocation29_spill] sm:$0xff] %v8033_v61  ;;  %9281 = vst [vmem:[#allocation30_spill] sm:$0xff] %v8036_v63  ;;  %v8039_v3 = vld [vmem:[%s7991_s21 + $0x48] sm:$0xff]  ;;  %v8042_v5 = vld [vmem:[%s7991_s21 + $0x50] sm:$0xff] }
 0x23c   : >> { %9282 = vst [vmem:[#allocation31_spill] sm:$0xff] %v8039_v3  ;;  %9283 = vst [vmem:[#allocation32_spill] sm:$0xff] %v8042_v5  ;;  %v8045_v7 = vld [vmem:[%s7991_s21 + $0x58] sm:$0xff]  ;;  %v8048_v9 = vld [vmem:[%s7991_s21 + $0x60] sm:$0xff] }
 0x23d   : >> { %9284 = vst [vmem:[#allocation33_spill] sm:$0xff] %v8045_v7  ;;  %9285 = vst [vmem:[#allocation34_spill] sm:$0xff] %v8048_v9  ;;  %v8051_v2 = vld [vmem:[%s7991_s21 + $0x68] sm:$0xff]  ;;  %v8054_v1 = vld [vmem:[%s7991_s21 + $0x70] sm:$0xff] }
 0x23e   : >> { %9286 = vst [vmem:[#allocation35_spill] sm:$0xff] %v8051_v2  ;;  %9287 = vst [vmem:[#allocation36_spill] sm:$0xff] %v8054_v1  ;;  %v8057_v0 = vld [vmem:[%s7991_s21 + $0x78] sm:$0xff]  ;;  %v8060_v3 = vld [vmem:[%s7991_s21 + $0x80] sm:$0xff] }
 0x23f   : >> { %9288 = vst [vmem:[#allocation37_spill] sm:$0xff] %v8057_v0  ;;  %9289 = vst [vmem:[#allocation38_spill] sm:$0xff] %v8060_v3  ;;  %v8063_v5 = vld [vmem:[%s7991_s21 + $0x88] sm:$0xff]  ;;  %v8066_v7 = vld [vmem:[%s7991_s21 + $0x90] sm:$0xff] }
 0x240   : >> { %9290 = vst [vmem:[#allocation39_spill] sm:$0xff] %v8063_v5  ;;  %9291 = vst [vmem:[#allocation40_spill] sm:$0xff] %v8066_v7  ;;  %v8069_v9 = vld [vmem:[%s7991_s21 + $0x98] sm:$0xff]  ;;  %v8072_v2 = vld [vmem:[%s7991_s21 + $0xa0] sm:$0xff] }
 0x241   : >> { %9292 = vst [vmem:[#allocation41_spill] sm:$0xff] %v8069_v9  ;;  %9293 = vst [vmem:[#allocation42_spill] sm:$0xff] %v8072_v2  ;;  %v8075_v63 = vld [vmem:[%s7991_s21 + $0xa8] sm:$0xff]  ;;  %v8078_v1 = vld [vmem:[%s7991_s21 + $0xb0] sm:$0xff] }
 0x242   : >> { %9294 = vst [vmem:[#allocation43_spill] sm:$0xff] %v8075_v63  ;;  %9295 = vst [vmem:[#allocation44_spill] sm:$0xff] %v8078_v1  ;;  %v8081_v0 = vld [vmem:[%s7991_s21 + $0xb8] sm:$0xff]  ;;  %v8084_v55 = vld [vmem:[%s7991_s21 + $0xc0] sm:$0xff] }
 0x243   : >> { %9296 = vst [vmem:[#allocation45_spill] sm:$0xff] %v8081_v0  ;;  %9297 = vst [vmem:[#allocation46_spill] sm:$0xff] %v8084_v55  ;;  %v8087_v3 = vld [vmem:[%s7991_s21 + $0xc8] sm:$0xff]  ;;  %v8090_v5 = vld [vmem:[%s7991_s21 + $0xd0] sm:$0xff] }
 0x244   : >> { %9298 = vst [vmem:[#allocation47_spill] sm:$0xff] %v8087_v3  ;;  %9299 = vst [vmem:[#allocation48_spill] sm:$0xff] %v8090_v5  ;;  %v8093_v54 = vld [vmem:[%s7991_s21 + $0xd8] sm:$0xff]  ;;  %v8096_v7 = vld [vmem:[%s7991_s21 + $0xe0] sm:$0xff]  ;;  %v9309_v5 = vmov %v7395_v10  ;;  %v9316_v10 = vmov %v7423_v53 }
 0x245   : >> { %9300 = vst [vmem:[#allocation49_spill] sm:$0xff] %v8093_v54  ;;  %9301 = vst [vmem:[#allocation50_spill] sm:$0xff] %v8096_v7  ;;  %v8099_v9 = vld [vmem:[%s7991_s21 + $0xe8] sm:$0xff]  ;;  %v8102_v52 = vld [vmem:[%s7991_s21 + $0xf0] sm:$0xff]  ;;  %v9310_v7 = vmov %v7399_v8 }
 0x246   : >> { %9302 = vst [vmem:[#allocation51_spill] sm:$0xff] %v8099_v9  ;;  %9303 = vst [vmem:[#allocation52_spill] sm:$0xff] %v8102_v52  ;;  %v8105_v2 = vld [vmem:[%s7991_s21 + $0xf8] sm:$0xff]  ;;  %v8108_v63 = vld [vmem:[%s7991_s21 + $0x100] sm:$0xff]  ;;  %v9311_v9 = vmov %v7403_v6 }
 0x247   : >> { %9304 = vst [vmem:[#allocation53_spill] sm:$0xff] %v8105_v2  ;;  %9305 = vst [vmem:[#allocation54_spill] sm:$0xff] %v8108_v63  ;;  %v8111_v1 = vld [vmem:[%s7991_s21 + $0x108] sm:$0xff]  ;;  %v8114_v0 = vld [vmem:[%s7991_s21 + $0x110] sm:$0xff]  ;;  %v9312_v2 = vmov %v7407_v4  ;;  %v9313_v63 = vmov %v7411_v62 }
 0x248   : >> { %9306 = vst [vmem:[#allocation55_spill] sm:$0xff] %v8111_v1  ;;  %9307 = vst [vmem:[#allocation56_spill] sm:$0xff] %v8114_v0  ;;  %v8117_v55 = vld [vmem:[%s7991_s21 + $0x118] sm:$0xff]  ;;  %v9314_v0 = vmov %v7415_v59 }
 0x249   : >> { %9308 = vst [vmem:[#allocation57_spill] sm:$0xff] %v8117_v55  ;;  %v9315_v55 = vmov %v7419_v56 }
 0x24a LB: >>> { %v6533_v8 = vpack.i.bf16 %v7455_v55, %v7459_v10  ;;  %v6543_v6 = vpack.i.bf16 %v7439_v9, %v7443_v2  ;;  %s7475_s23 = smov 17   ;;  %v6538_v4 = vpack.i.bf16 %v7447_v63, %v7451_v0  ;;  %v6548_v62 = vpack.i.bf16 %v7431_v5, %v7435_v7  ;;  %s7476_s24 = smov 127   ;;  %vm8285_vm15 = vmpackc.low %vm7580_vm3, %vm7580_vm3  ;;  %v9324_v15 = vld [vmem:[#allocation16_spill] sm:$0xff]  ;;  %v9336_v12 = vld [vmem:[#allocation13_spill] sm:$0xff]  ;;  %s7463_s22 = sphi %s8143_s22, %s1519_s22   ;;  %v7459_v10 = vphi %v9316_v10, %v9469_v10   ;;  %v7455_v55 = vphi %v9315_v55, %v9468_v55   ;;  %v7451_v0 = vphi %v9314_v0, %v9467_v0   ;;  %v7447_v63 = vphi %v9313_v63, %v9466_v63   ;;  %v7443_v2 = vphi %v9312_v2, %v9465_v2   ;;  %v7439_v9 = vphi %v9311_v9, %v9464_v9   ;;  %v7435_v7 = vphi %v9310_v7, %v9463_v7   ;;  %v7431_v5 = vphi %v9309_v5, %v9462_v5  }
 0x24b   : >>> { %vm9317_vm0 = vcmask 138240   ;;  %s7478_s25 = smov 126   ;;  %s7479_s11 = smov 112   ;;  %vm9318_vm1 = vcmask 1039360   ;;  %vm1632_vm2 = vcmask 261120   ;;  %vm8297_vm4 = vmpackc.low %vm7588_vm5, %vm7588_vm5  ;;  %v9334_v11 = vld [vmem:[#allocation12_spill] sm:$0xff] }
 0x24c   : >>> { %6534 = vrot.lane.b32.xlu0 %v6533_v8, %s7475_s23  ;;  %6544 = vrot.lane.b32.xlu1 %v6543_v6, %s7475_s23  ;;  %s7480_s12 = smov 111   ;;  %s7481_s14 = smov 110   ;;  %vm9335_vm13 = vcmask 916480   ;;  %v9337_v13 = vld [vmem:[#allocation14_spill] sm:$0xff]  ;;  %v9338_v14 = vld [vmem:[#allocation15_spill] sm:$0xff]  ;;  %vm9339_vm6 = vcmask 908288  }
 0x24d   : >>> { %s7482_s15 = smov 96   ;;  %s7483_s16 = smov 95   ;;  %vm9340_vm7 = vcmask 900096   ;;  %vm9341_vm10 = vcmask 785408   ;;  %vm9342_vm12 = vcmask 777216   ;;  %vm9343_vm14 = vcmask 769024  }
 0x24e   : >>> { %s7484_s17 = smov 94   ;;  %s1519_s22 = sadd.s32 1, %s7463_s22  }
 0x24f   : >>> { %p1516_p4 = scmp.ge.s32.totalorder %s1519_s22, 2  }
 0x250   : >>> { %6539 = vrot.lane.b32.xlu0 %v6538_v4, %s7475_s23  ;;  %6549 = vrot.lane.b32.xlu1 %v6548_v62, %s7475_s23  ;;  %s1430_s13 = sadd.s32 (%p1516_p4), 1, %s7427_s13  }
 0x251   : >> { %p1427_p5 = scmp.ge.s32.totalorder (%p1516_p4), %s1430_s13, 2  }
 0x2be   : >>> { %v6535_v59 = vpop.permute.xlu0 %6534  ;;  %v6545_v56 = vpop.permute.xlu1 %6544 }
 0x2bf   : >>> { %v6537_v53 = vunpack.i.h.bf16 %v6535_v59  ;;  %v6536_v1 = vunpack.i.l.bf16 %v6535_v59  ;;  %v6547_v52 = vunpack.i.h.bf16 %v6545_v56  ;;  %v6546_v54 = vunpack.i.l.bf16 %v6545_v56 }
 0x2c1   : >>> { %v1572_v10 = vsel %vm9317_vm0, %v6537_v53, 0.0  ;;  %v8162_v2 = vsel %vm9317_vm0, %v6536_v1, %v6537_v53  ;;  %v8168_v5 = vsel %vm9317_vm0, 0.0, %v6536_v1  ;;  %v1574_v59 = vsel %vm9317_vm0, %v6547_v52, 0.0 }
 0x2c2   : >>> { %v6540_v8 = vpop.permute.xlu0 %6539  ;;  %v8165_v6 = vpack.i.bf16 %v1572_v10, %v8162_v2  ;;  %v6550_v0 = vpop.permute.xlu1 %6549  ;;  %v8172_v56 = vsel %vm9317_vm0, %v6546_v54, %v6547_v52 }
 0x2c3   : >>> { %v6542_v55 = vunpack.i.h.bf16 %v6540_v8  ;;  %v6541_v4 = vunpack.i.l.bf16 %v6540_v8  ;;  %v6552_v63 = vunpack.i.h.bf16 %v6550_v0  ;;  %v6551_v62 = vunpack.i.l.bf16 %v6550_v0 }
 0x2c4   : >>> { %6554 = vrot.lane.b32.xlu0 %v8165_v6, %s7476_s24  ;;  %v6568_v0 = vpack.i.bf16 %v1574_v59, %v8172_v56 }
 0x2c5   : >>> { %v1573_v53 = vsel %vm9317_vm0, %v6542_v55, 0.0  ;;  %v8178_v7 = vsel %vm9317_vm0, %v6541_v4, %v6542_v55  ;;  %v8181_v9 = vsel %vm9317_vm0, 0.0, %v6541_v4  ;;  %v1575_v1 = vsel %vm9317_vm0, %v6552_v63, 0.0 }
 0x2c6   : >>> { %v8185_v10 = vsel %vm9317_vm0, %v6551_v62, %v6552_v63  ;;  %v8189_v52 = vpack.i.bf16 %v8181_v9, %v8168_v5  ;;  %v6558_v8 = vpack.i.bf16 %v1573_v53, %v8178_v7  ;;  %v8198_v4 = vsel %vm9317_vm0, 0.0, %v6546_v54 }
 0x2c7   : >>> { %v6573_v55 = vpack.i.bf16 %v1575_v1, %v8185_v10  ;;  %v8201_v63 = vsel %vm9317_vm0, 0.0, %v6551_v62  ;;  %v9235_v53 = vmov 0.0   ;;  %vm8348_vm0 = vmpackc.low %vm7630_vm9, %vm7630_vm9 }
 0x2c8   : >>> { %6564 = vrot.lane.b32.xlu0 %v8189_v52, %s7476_s24  ;;  %6559 = vrot.lane.b32.xlu1 %v6558_v8, %s7476_s24  ;;  %v6578_v3 = vpack.i.bf16 %v8201_v63, %v8198_v4 }
 0x2c9   : >>> { %1709 = vmatprep.mubr.f32.mxu0 %v9235_v53  ;;  %3106 = vmatprep.mubr.f32.mxu1 %v9235_v53 }
 0x2cc   : >>> { %6569 = vrot.lane.b32.xlu1 %v6568_v0, %s7476_s24  ;;  %6574 = vrot.lane.b32.xlu0 %v6573_v55, %s7476_s24 }
 0x2d0   : >>> { %6579 = vrot.lane.b32.xlu1 %v6578_v3, %s7476_s24  ;;  %6584 = vrot.lane.b32.xlu0 %v8165_v6, %s7478_s25 }
 0x2d4   : >>> { %6589 = vrot.lane.b32.xlu1 %v6558_v8, %s7478_s25  ;;  %6594 = vrot.lane.b32.xlu0 %v8189_v52, %s7478_s25 }
 0x2d8   : >>> { %6599 = vrot.lane.b32.xlu1 %v6568_v0, %s7478_s25  ;;  %6604 = vrot.lane.b32.xlu0 %v6573_v55, %s7478_s25 }
 0x2dc   : >>> { %6609 = vrot.lane.b32.xlu1 %v6578_v3, %s7478_s25  ;;  %6614 = vrot.lane.b32.xlu0 %v8165_v6, %s7479_s11 }
 0x2e0   : >>> { %6619 = vrot.lane.b32.xlu1 %v6558_v8, %s7479_s11  ;;  %6624 = vrot.lane.b32.xlu0 %v8189_v52, %s7479_s11 }
 0x2e4   : >>> { %6629 = vrot.lane.b32.xlu1 %v6568_v0, %s7479_s11  ;;  %6634 = vrot.lane.b32.xlu0 %v6573_v55, %s7479_s11 }
 0x2e8   : >>> { %6639 = vrot.lane.b32.xlu1 %v6578_v3, %s7479_s11  ;;  %6644 = vrot.lane.b32.xlu0 %v8165_v6, %s7480_s12 }
 0x2ec   : >>> { %6649 = vrot.lane.b32.xlu1 %v6558_v8, %s7480_s12  ;;  %6654 = vrot.lane.b32.xlu0 %v8189_v52, %s7480_s12 }
 0x2f0   : >>> { %6659 = vrot.lane.b32.xlu1 %v6568_v0, %s7480_s12  ;;  %6664 = vrot.lane.b32.xlu0 %v6573_v55, %s7480_s12 }
 0x2f4   : >>> { %6669 = vrot.lane.b32.xlu1 %v6578_v3, %s7480_s12  ;;  %6674 = vrot.lane.b32.xlu0 %v8165_v6, %s7481_s14 }
 0x2f8   : >>> { %6679 = vrot.lane.b32.xlu1 %v6558_v8, %s7481_s14  ;;  %6684 = vrot.lane.b32.xlu0 %v8189_v52, %s7481_s14 }
 0x2fc   : >>> { %6689 = vrot.lane.b32.xlu1 %v6568_v0, %s7481_s14  ;;  %6694 = vrot.lane.b32.xlu0 %v6573_v55, %s7481_s14 }
 0x300   : >>> { %6699 = vrot.lane.b32.xlu1 %v6578_v3, %s7481_s14  ;;  %6704 = vrot.lane.b32.xlu0 %v8165_v6, %s7482_s15 }
 0x304   : >>> { %6709 = vrot.lane.b32.xlu1 %v6558_v8, %s7482_s15  ;;  %6714 = vrot.lane.b32.xlu0 %v8189_v52, %s7482_s15 }
 0x308   : >>> { %6719 = vrot.lane.b32.xlu1 %v6568_v0, %s7482_s15  ;;  %6724 = vrot.lane.b32.xlu0 %v6573_v55, %s7482_s15 }
 0x30c   : >>> { %6729 = vrot.lane.b32.xlu1 %v6578_v3, %s7482_s15  ;;  %6734 = vrot.lane.b32.xlu0 %v8165_v6, %s7483_s16 }
 0x310   : >>> { %6739 = vrot.lane.b32.xlu1 %v6558_v8, %s7483_s16  ;;  %6744 = vrot.lane.b32.xlu0 %v8189_v52, %s7483_s16 }
 0x314   : >>> { %6749 = vrot.lane.b32.xlu1 %v6568_v0, %s7483_s16  ;;  %6754 = vrot.lane.b32.xlu0 %v6573_v55, %s7483_s16 }
 0x318   : >>> { %6759 = vrot.lane.b32.xlu1 %v6578_v3, %s7483_s16  ;;  %6764 = vrot.lane.b32.xlu0 %v8165_v6, %s7484_s17 }
 0x31c   : >>> { %6769 = vrot.lane.b32.xlu1 %v6558_v8, %s7484_s17  ;;  %6774 = vrot.lane.b32.xlu0 %v8189_v52, %s7484_s17 }
 0x320   : >>> { %6779 = vrot.lane.b32.xlu1 %v6568_v0, %s7484_s17  ;;  %6784 = vrot.lane.b32.xlu0 %v6573_v55, %s7484_s17 }
 0x324   : >>> { %6789 = vrot.lane.b32.xlu1 %v6578_v3, %s7484_s17 }
 0x336   : >>> { %v6555_v1 = vpop.permute.xlu0 %6554 }
 0x337   : >>> { %v6557_v59 = vunpack.i.h.bf16 %v6555_v1  ;;  %v6556_v53 = vunpack.i.l.bf16 %v6555_v1 }
 0x339   : >>> { %v1617_v8 = vsel %vm9318_vm1, %v6556_v53, %v6557_v59 }
 0x33a   : >>> { %v6565_v62 = vpop.permute.xlu0 %6564  ;;  %v6560_v54 = vpop.permute.xlu1 %6559 }
 0x33b   : >>> { %v6567_v51 = vunpack.i.h.bf16 %v6565_v62  ;;  %v6566_v61 = vunpack.i.l.bf16 %v6565_v62  ;;  %v6562_v60 = vunpack.i.h.bf16 %v6560_v54  ;;  %v6561_v6 = vunpack.i.l.bf16 %v6560_v54 }
 0x33d   : >>> { %v1619_v58 = vsel %vm9318_vm1, %v6561_v6, %v6562_v60  ;;  %v1616_v52 = vsel %vm9318_vm1, %v6566_v61, %v6556_v53  ;;  %v1618_v0 = vsel %vm9318_vm1, %v6567_v51, %v6561_v6 }
 0x33e   : >>> { %v6570_v55 = vpop.permute.xlu1 %6569  ;;  %v6575_v57 = vpop.permute.xlu0 %6574  ;;  %v5862_v3 = vpack.c.bf16 %v1619_v58, %v1617_v8  ;;  %v5864_v50 = vpack.c.bf16 %v1618_v0, %v1616_v52 }
 0x33f   : >>> { %v6572_v49 = vunpack.i.h.bf16 %v6570_v55  ;;  %v6571_v1 = vunpack.i.l.bf16 %v6570_v55  ;;  %v6577_v48 = vunpack.i.h.bf16 %v6575_v57  ;;  %v6576_v47 = vunpack.i.l.bf16 %v6575_v57 }
 0x340   : >>> { %5863 = vmatprep.subr.bf16.mxu0 %v5862_v3 }
 0x341   : >>> { %v1621_v62 = vsel %vm9318_vm1, %v6571_v1, %v6572_v49  ;;  %v1623_v54 = vsel %vm9318_vm1, %v6576_v47, %v6577_v48  ;;  %5865 = vmatpush1.bf16.msra.mxu0 %v5864_v50 }
 0x342   : >>> { %v6580_v59 = vpop.permute.xlu1 %6579  ;;  %v6585_v60 = vpop.permute.xlu0 %6584  ;;  %v5866_v46 = vpack.c.bf16 %v1623_v54, %v1621_v62  ;;  %v9327_v62 = vpack.c.bf16 %v8185_v10, %v8172_v56  ;;  %v9331_v56 = vpack.c.bf16 %v8201_v63, %v8198_v4 }
 0x343   : >>> { %v6582_v61 = vunpack.i.h.bf16 %v6580_v59  ;;  %v6581_v53 = vunpack.i.l.bf16 %v6580_v59  ;;  %v6587_v57 = vunpack.i.h.bf16 %v6585_v60  ;;  %v6586_v0 = vunpack.i.l.bf16 %v6585_v60 }
 0x344   : >>> { %5867 = vmatprep.subr.bf16.mxu0 %v5866_v46  ;;  %v9321_v46 = vpack.c.bf16 %v8178_v7, %v8162_v2  ;;  %v9325_v2 = vpack.c.bf16 %v8181_v9, %v8168_v5  ;;  %v9326_v7 = vmov 0.0  }
 0x345   : >>> { %v1620_v51 = vsel %vm9318_vm1, %v6581_v53, %v6571_v1  ;;  %v1622_v58 = vsel %vm9318_vm1, %v6582_v61, %v6576_v47  ;;  %v1860_v54 = vsel %vm547_vm11, %v6586_v0, %v6587_v57  ;;  %vm8321_vm1 = vmpackc.low %vm7626_vm8, %vm7626_vm8 }
 0x346   : >>> { %v6590_v6 = vpop.permute.xlu1 %6589  ;;  %v6595_v8 = vpop.permute.xlu0 %6594  ;;  %v5868_v52 = vpack.c.bf16 %v1622_v58, %v1620_v51 }
 0x347   : >>> { %v6592_v48 = vunpack.i.h.bf16 %v6590_v6  ;;  %v6591_v50 = vunpack.i.l.bf16 %v6590_v6  ;;  %v6597_v51 = vunpack.i.h.bf16 %v6595_v8  ;;  %v6596_v58 = vunpack.i.l.bf16 %v6595_v8 }
 0x348   : >>> { %5869 = vmatpush1.bf16.msra.mxu0 %v5868_v52 }
 0x349   : >>> { %5872 = vmatprep.subr.msk.bf16.mxu0 %vm8285_vm15, %v9321_v46  ;;  %v1862_v1 = vsel %vm547_vm11, %v6591_v50, %v6592_v48  ;;  %v1861_v63 = vsel %vm547_vm11, %v6597_v51, %v6591_v50  ;;  %v1859_v57 = vsel %vm547_vm11, %v6596_v58, %v6586_v0 }
 0x34a   : >>> { %v6600_v55 = vpop.permute.xlu1 %6599  ;;  %v6605_v3 = vpop.permute.xlu0 %6604  ;;  %v5882_v9 = vpack.c.bf16 %v1862_v1, %v1860_v54  ;;  %v5885_v0 = vpack.c.bf16 %v1861_v63, %v1859_v57 }
 0x34b   : >>> { %5633 = vmatmul.mubr.msk.f32.vlgmr.msra.gmra.mrb[0].mxu0 %vm1632_vm2, %v9324_v15  ;;  %v6602_v6 = vunpack.i.h.bf16 %v6600_v55  ;;  %v6601_v52 = vunpack.i.l.bf16 %v6600_v55  ;;  %v6607_v48 = vunpack.i.h.bf16 %v6605_v3  ;;  %v6606_v46 = vunpack.i.l.bf16 %v6605_v3 }
 0x34c   : >>> { %5875 = vmatpush1.bf16.msk.msra.mxu0 %vm8297_vm4, %v9325_v2  ;;  %1715 = vmatprep.mubr.f32.mxu0 %v9326_v7 }
 0x34d   : >>> { %5878 = vmatprep.subr.msk.bf16.mxu0 %vm8285_vm15, %v9327_v62  ;;  %v1864_v8 = vsel %vm547_vm11, %v6601_v52, %v6602_v6  ;;  %v1866_v54 = vsel %vm547_vm11, %v6606_v46, %v6607_v48 }
 0x34e   : >>> { %v6610_v59 = vpop.permute.xlu1 %6609  ;;  %v8316_v60 = vpop.permute.xlu0 %6614 }
 0x34f   : >>> { %5634 = vmatmul.mubr.msk.f32.gmra.mrb[2].mxu0 %vm1632_vm2, %v7912_v16  ;;  %v6612_v1 = vunpack.i.h.bf16 %v6610_v59  ;;  %v6611_v2 = vunpack.i.l.bf16 %v6610_v59  ;;  %v6617_v3 = vunpack.i.h.bf16 %v8316_v60  ;;  %v6616_v59 = vunpack.i.l.bf16 %v8316_v60 }
 0x350   : >>> { %5881 = vmatpush1.bf16.msk.msra.mxu0 %vm8297_vm4, %v9331_v56  ;;  %1721 = vmatprep.mubr.f32.mxu0 %v9326_v7  ;;  %v5888_v56 = vpack.c.bf16 %v1866_v54, %v1864_v8 }
 0x351   : >>> { %5884 = vmatprep.subr.msk.bf16.mxu0 %vm8321_vm1, %v5882_v9  ;;  %v1863_v51 = vsel %vm547_vm11, %v6611_v2, %v6601_v52  ;;  %v2017_v52 = vsel %vm9335_vm13, %v6616_v59, %v6617_v3 }
 0x352   : >>> { %v6620_v10 = vpop.permute.xlu1 %6619  ;;  %v6625_v53 = vpop.permute.xlu0 %6624 }
 0x353   : >>> { %5635 = vmatmul.mubr.msk.f32.gmra.mrb[4].mxu0 %vm1632_vm2, %v7915_v17  ;;  %v6622_v55 = vunpack.i.h.bf16 %v6620_v10  ;;  %v6621_v5 = vunpack.i.l.bf16 %v6620_v10  ;;  %v1865_v10 = vsel %vm547_vm11, %v6612_v1, %v6606_v46  ;;  %v6627_v63 = vunpack.i.h.bf16 %v6625_v53 }
 0x354   : >>> { %1727 = vmatprep.mubr.f32.mxu0 %v9326_v7  ;;  %v5891_v60 = vpack.c.bf16 %v1865_v10, %v1863_v51  ;;  %v6626_v57 = vunpack.i.l.bf16 %v6625_v53 }
 0x355   : >>> { %v2019_v58 = vsel %vm9335_vm13, %v6621_v5, %v6622_v55  ;;  %v2018_v3 = vsel %vm9335_vm13, %v6627_v63, %v6621_v5 }
 0x356   : >>> { %v6630_v4 = vpop.permute.xlu1 %6629  ;;  %v6635_v62 = vpop.permute.xlu0 %6634  ;;  %v5894_v46 = vpack.c.bf16 %v2019_v58, %v2017_v52 }
 0x357   : >>> { %5636 = vmatmul.mubr.msk.f32.gmra.mrb[6].mxu0 %vm1632_vm2, %v7918_v19  ;;  %v6632_v8 = vunpack.i.h.bf16 %v6630_v4  ;;  %v6631_v54 = vunpack.i.l.bf16 %v6630_v4  ;;  %v6637_v55 = vunpack.i.h.bf16 %v6635_v62 }
 0x358   : >>> { %1810 = vmatprep.mubr.f32.mxu0 %v9326_v7 }
 0x359   : >>> { %v2021_v53 = vsel %vm9335_vm13, %v6631_v54, %v6632_v8 }
 0x35a   : >>> { %v6640_v9 = vpop.permute.xlu1 %6639  ;;  %v8362_v6 = vpop.permute.xlu0 %6644 }
 0x35b   : >>> { %5645 = vmatmul.mubr.msk.f32.vlgmr.msra.gmra.mrb[0].mxu0 %vm1632_vm2, %v9334_v11  ;;  %v6642_v51 = vunpack.i.h.bf16 %v6640_v9  ;;  %v6641_v10 = vunpack.i.l.bf16 %v6640_v9  ;;  %v6647_v5 = vunpack.i.h.bf16 %v8362_v6 }
 0x35c   : >>> { %5887 = vmatpush1.bf16.msk.msra.mxu0 %vm8348_vm0, %v5885_v0  ;;  %1816 = vmatprep.mubr.f32.mxu0 %v9326_v7  ;;  %v6636_v0 = vunpack.i.l.bf16 %v6635_v62 }
 0x35d   : >>> { %5890 = vmatprep.subr.msk.bf16.mxu0 %vm8321_vm1, %v5888_v56  ;;  %v2016_v56 = vsel %vm9335_vm13, %v6626_v57, %v6616_v59  ;;  %v6646_v59 = vunpack.i.l.bf16 %v8362_v6  ;;  %v2020_v9 = vsel %vm9335_vm13, %v6641_v10, %v6631_v54 }
 0x35e   : >>> { %v6650_v48 = vpop.permute.xlu1 %6649  ;;  %v6655_v1 = vpop.permute.xlu0 %6654  ;;  %v2023_v58 = vsel %vm9335_vm13, %v6636_v0, %v6637_v55  ;;  %v2022_v57 = vsel %vm9335_vm13, %v6642_v51, %v6636_v0 }
 0x35f   : >>> { %5646 = vmatmul.mubr.msk.f32.gmra.mrb[2].mxu0 %vm1632_vm2, %v9336_v12  ;;  %v6651_v52 = vunpack.i.l.bf16 %v6650_v48  ;;  %v5900_v63 = vpack.c.bf16 %v2023_v58, %v2021_v53  ;;  %v2174_v6 = vsel %vm9339_vm6, %v6646_v59, %v6647_v5 }
 0x360   : >>> { %5893 = vmatpush1.bf16.msk.msra.mxu0 %vm8348_vm0, %v5891_v60  ;;  %1822 = vmatprep.mubr.f32.mxu0 %v9326_v7  ;;  %v6652_v60 = vunpack.i.h.bf16 %v6650_v48  ;;  %v5903_v48 = vpack.c.bf16 %v2022_v57, %v2020_v9 }
 0x361   : >>> { %5896 = vmatprep.subr.msk.bf16.mxu0 %vm8285_vm15, %v5894_v46  ;;  %v5897_v46 = vpack.c.bf16 %v2018_v3, %v2016_v56  ;;  %v6657_v3 = vunpack.i.h.bf16 %v6655_v1  ;;  %v6656_v56 = vunpack.i.l.bf16 %v6655_v1 }
 0x362   : >>> { %v8374_v2 = vpop.permute.xlu1 %6659  ;;  %v6665_v4 = vpop.permute.xlu0 %6664  ;;  %v2176_v8 = vsel %vm9339_vm6, %v6651_v52, %v6652_v60 }
 0x363   : >>> { %5647 = vmatmul.mubr.msk.f32.gmra.mrb[4].mxu0 %vm1632_vm2, %v9337_v13  ;;  %v5906_v0 = vpack.c.bf16 %v2176_v8, %v2174_v6  ;;  %v6662_v51 = vunpack.i.h.bf16 %v8374_v2  ;;  %v6661_v10 = vunpack.i.l.bf16 %v8374_v2  ;;  %v6667_v53 = vunpack.i.h.bf16 %v6665_v4 }
 0x364   : >>> { %1828 = vmatprep.mubr.f32.mxu0 %v9326_v7  ;;  %v6666_v58 = vunpack.i.l.bf16 %v6665_v4  ;;  %v2175_v5 = vsel %vm9339_vm6, %v6657_v3, %v6651_v52 }
 0x365   : >>> { %v2178_v1 = vsel %vm9339_vm6, %v6661_v10, %v6662_v51 }
 0x366   : >>> { %v6670_v62 = vpop.permute.xlu1 %6669  ;;  %v6675_v55 = vpop.permute.xlu0 %6674  ;;  %v2180_v8 = vsel %vm9339_vm6, %v6666_v58, %v6667_v53 }
 0x367   : >>> { %5648 = vmatmul.mubr.msk.f32.gmra.mrb[6].mxu0 %vm1632_vm2, %v9338_v14  ;;  %v6672_v9 = vunpack.i.h.bf16 %v6670_v62  ;;  %v6671_v57 = vunpack.i.l.bf16 %v6670_v62  ;;  %v6677_v6 = vunpack.i.h.bf16 %v6675_v55 }
 0x368   : >>> { %1959 = vmatprep.mubr.f32.mxu0 %v9326_v7 }
 0x369   : >>> { %v2177_v52 = vsel %vm9339_vm6, %v6671_v57, %v6661_v10 }
 0x36a   : >>> { %v6680_v54 = vpop.permute.xlu1 %6679  ;;  %v6685_v60 = vpop.permute.xlu0 %6684 }
 0x36b   : >>> { %5657 = vmatmul.mubr.msk.f32.vlgmr.msra.gmra.mrb[0].mxu0 %vm1632_vm2, %v7921_v20  ;;  %v6682_v2 = vunpack.i.h.bf16 %v6680_v54 }
 0x36c   : >>> { %5899 = vmatpush1.bf16.msk.msra.mxu0 %vm8297_vm4, %v5897_v46  ;;  %1965 = vmatprep.mubr.f32.mxu0 %v9326_v7 }
 0x36d   : >>> { %5902 = vmatprep.subr.msk.bf16.mxu0 %vm8285_vm15, %v5900_v63  ;;  %v2173_v63 = vsel %vm9339_vm6, %v6656_v56, %v6646_v59  ;;  %v2179_v59 = vsel %vm9339_vm6, %v6672_v9, %v6666_v58  ;;  %v5910_v56 = vpack.c.bf16 %v2180_v8, %v2178_v1 }
 0x36e   : >>> { %v6690_v46 = vpop.permute.xlu1 %6689  ;;  %v5908_v4 = vpack.c.bf16 %v2175_v5, %v2173_v63  ;;  %v6695_v3 = vpop.permute.xlu0 %6694  ;;  %v6687_v5 = vunpack.i.h.bf16 %v6685_v60  ;;  %v6686_v63 = vunpack.i.l.bf16 %v6685_v60 }
 0x36f   : >>> { %5658 = vmatmul.mubr.msk.f32.gmra.mrb[2].mxu0 %vm1632_vm2, %v7924_v22  ;;  %v6692_v9 = vunpack.i.h.bf16 %v6690_v46  ;;  %v6691_v57 = vunpack.i.l.bf16 %v6690_v46  ;;  %v6697_v1 = vunpack.i.h.bf16 %v6695_v3  ;;  %v6696_v8 = vunpack.i.l.bf16 %v6695_v3 }
 0x370   : >>> { %5905 = vmatpush1.bf16.msk.msra.mxu0 %vm8297_vm4, %v5903_v48  ;;  %1971 = vmatprep.mubr.f32.mxu0 %v9326_v7  ;;  %v6681_v48 = vunpack.i.l.bf16 %v6680_v54  ;;  %v5912_v54 = vpack.c.bf16 %v2179_v59, %v2177_v52 }
 0x371   : >>> { %5907 = vmatprep.subr.bf16.mxu0 %v5906_v0  ;;  %v6676_v0 = vunpack.i.l.bf16 %v6675_v55  ;;  %v2327_v60 = vsel %vm9340_vm7, %v6691_v57, %v6692_v9 }
 0x372   : >>> { %v6700_v62 = vpop.permute.xlu1 %6699  ;;  %v2325_v51 = vsel %vm9340_vm7, %v6681_v48, %v6682_v2  ;;  %v6705_v10 = vpop.permute.xlu0 %6704  ;;  %v2324_v2 = vsel %vm9340_vm7, %v6687_v5, %v6681_v48 }
 0x373   : >>> { %5659 = vmatmul.mubr.msk.f32.gmra.mrb[4].mxu0 %vm1632_vm2, %v7927_v23  ;;  %v2323_v53 = vsel %vm9340_vm7, %v6676_v0, %v6677_v6  ;;  %v6702_v6 = vunpack.i.h.bf16 %v6700_v62  ;;  %v6701_v52 = vunpack.i.l.bf16 %v6700_v62  ;;  %v6706_v48 = vunpack.i.l.bf16 %v6705_v10 }
 0x374   : >>> { %1977 = vmatprep.mubr.f32.mxu0 %v9326_v7  ;;  %v5914_v55 = vpack.c.bf16 %v2325_v51, %v2323_v53  ;;  %v2329_v51 = vsel %vm9340_vm7, %v6696_v8, %v6697_v1  ;;  %v6707_v53 = vunpack.i.h.bf16 %v6705_v10 }
 0x375   : >>> { %v2328_v62 = vsel %vm9340_vm7, %v6702_v6, %v6696_v8 }
 0x376   : >>> { %v6710_v58 = vpop.permute.xlu1 %6709  ;;  %v6715_v59 = vpop.permute.xlu0 %6714  ;;  %v2480_v9 = vsel %vm9341_vm10, %v6706_v48, %v6707_v53 }
 0x377   : >>> { %5660 = vmatmul.mubr.msk.f32.gmra.mrb[6].mxu0 %vm1632_vm2, %v7930_v24  ;;  %v6712_v46 = vunpack.i.h.bf16 %v6710_v58  ;;  %v6717_v1 = vunpack.i.h.bf16 %v6715_v59  ;;  %v6716_v8 = vunpack.i.l.bf16 %v6715_v59 }
 0x378   : >>> { %2116 = vmatprep.mubr.f32.mxu0 %v9326_v7 }
 0x37b   : >>> { %5669 = vmatmul.mubr.msk.f32.vlgmr.msra.gmra.mrb[0].mxu0 %vm1632_vm2, %v7933_v25 }
 0x37c   : >>> { %5909 = vmatpush1.bf16.msra.mxu0 %v5908_v4  ;;  %2122 = vmatprep.mubr.f32.mxu0 %v9326_v7  ;;  %v2322_v4 = vsel %vm9340_vm7, %v6686_v63, %v6676_v0  ;;  %v2326_v0 = vsel %vm9340_vm7, %v6701_v52, %v6691_v57 }
 0x37d   : >>> { %5911 = vmatprep.subr.bf16.mxu0 %v5910_v56  ;;  %v6720_v56 = vpop.permute.xlu1 %6719  ;;  %v5917_v3 = vpack.c.bf16 %v2324_v2, %v2322_v4  ;;  %v5923_v10 = vpack.c.bf16 %v2328_v62, %v2326_v0 }
 0x37e   : >>> { %v6722_v6 = vunpack.i.h.bf16 %v6720_v56  ;;  %v6721_v52 = vunpack.i.l.bf16 %v6720_v56 }
 0x37f   : >>> { %5670 = vmatmul.mubr.msk.f32.gmra.mrb[2].mxu0 %vm1632_vm2, %v7936_v26 }
 0x380   : >>> { %5913 = vmatpush1.bf16.msra.mxu0 %v5912_v54  ;;  %2128 = vmatprep.mubr.f32.mxu0 %v9326_v7  ;;  %v6711_v54 = vunpack.i.l.bf16 %v6710_v58  ;;  %v6725_v58 = vpop.permute.xlu0 %6724  ;;  %v2484_v59 = vsel %vm9341_vm10, %v6721_v52, %v6722_v6 }
 0x381   : >>> { %5916 = vmatprep.subr.msk.bf16.mxu0 %vm8321_vm1, %v5914_v55  ;;  %v5920_v55 = vpack.c.bf16 %v2329_v51, %v2327_v60  ;;  %v6730_v63 = vpop.permute.xlu1 %6729  ;;  %v6727_v60 = vunpack.i.h.bf16 %v6725_v58  ;;  %v6726_v51 = vunpack.i.l.bf16 %v6725_v58 }
 0x382   : >>> { %v2482_v5 = vsel %vm9341_vm10, %v6711_v54, %v6712_v46  ;;  %v2481_v46 = vsel %vm9341_vm10, %v6717_v1, %v6711_v54  ;;  %v6732_v53 = vunpack.i.h.bf16 %v6730_v63 }
 0x383   : >>> { %5671 = vmatmul.mubr.msk.f32.gmra.mrb[4].mxu0 %vm1632_vm2, %v7939_v28  ;;  %v5926_v57 = vpack.c.bf16 %v2482_v5, %v2480_v9  ;;  %v2486_v0 = vsel %vm9341_vm10, %v6726_v51, %v6727_v60 }
 0x384   : >>> { %2134 = vmatprep.mubr.f32.mxu0 %v9326_v7  ;;  %v6735_v2 = vpop.permute.xlu0 %6734 }
 0x385   : >>> { %v6740_v4 = vpop.permute.xlu1 %6739  ;;  %v6737_v9 = vunpack.i.h.bf16 %v6735_v2  ;;  %v6736_v54 = vunpack.i.l.bf16 %v6735_v2 }
 0x386   : >>> { %v6742_v62 = vunpack.i.h.bf16 %v6740_v4  ;;  %v6741_v5 = vunpack.i.l.bf16 %v6740_v4 }
 0x387   : >>> { %5672 = vmatmul.mubr.msk.f32.gmra.mrb[6].mxu0 %vm1632_vm2, %v7942_v29  ;;  %v2637_v2 = vsel %vm9342_vm12, %v6736_v54, %v6737_v9 }
 0x388   : >>> { %2265 = vmatprep.mubr.f32.mxu0 %v9326_v7  ;;  %v6745_v56 = vpop.permute.xlu0 %6744  ;;  %v2639_v1 = vsel %vm9342_vm12, %v6741_v5, %v6742_v62 }
 0x389   : >>> { %v6750_v58 = vpop.permute.xlu1 %6749  ;;  %v6747_v60 = vunpack.i.h.bf16 %v6745_v56 }
 0x38b   : >>> { %5673 = vmatmul.mubr.msk.f32.vlgmr.msra.gmra.mrb[0].mxu0 %vm1632_vm2, %v7945_v30  ;;  %v2638_v62 = vsel %vm9342_vm12, %v6747_v60, %v6741_v5 }
 0x38c   : >>> { %5919 = vmatpush1.bf16.msk.msra.mxu0 %vm8348_vm0, %v5917_v3  ;;  %2271 = vmatprep.mubr.f32.mxu0 %v9326_v7  ;;  %v2479_v3 = vsel %vm9341_vm10, %v6716_v8, %v6706_v48  ;;  %v6755_v4 = vpop.permute.xlu0 %6754 }
 0x38d   : >>> { %5922 = vmatprep.subr.msk.bf16.mxu0 %vm8321_vm1, %v5920_v55  ;;  %v6731_v55 = vunpack.i.l.bf16 %v6730_v63  ;;  %v2485_v63 = vsel %vm9341_vm10, %v6732_v53, %v6726_v51  ;;  %v6760_v6 = vpop.permute.xlu1 %6759  ;;  %v6746_v51 = vunpack.i.l.bf16 %v6745_v56  ;;  %v6757_v53 = vunpack.i.h.bf16 %v6755_v4 }
 0x38e   : >>> { %v6762_v9 = vunpack.i.h.bf16 %v6760_v6 }
 0x38f   : >>> { %5674 = vmatmul.mubr.msk.f32.gmra.mrb[2].mxu0 %vm1632_vm2, %v7948_v27  ;;  %v2483_v48 = vsel %vm9341_vm10, %v6731_v55, %v6721_v52  ;;  %v5938_v52 = vpack.c.bf16 %v2639_v1, %v2637_v2  ;;  %v6756_v55 = vunpack.i.l.bf16 %v6755_v4 }
 0x390   : >>> { %5925 = vmatpush1.bf16.msk.msra.mxu0 %vm8348_vm0, %v5923_v10  ;;  %2277 = vmatprep.mubr.f32.mxu0 %v9326_v7  ;;  %v5929_v10 = vpack.c.bf16 %v2481_v46, %v2479_v3  ;;  %v5935_v8 = vpack.c.bf16 %v2485_v63, %v2483_v48  ;;  %v6752_v46 = vunpack.i.h.bf16 %v6750_v58  ;;  %v6751_v3 = vunpack.i.l.bf16 %v6750_v58 }
 0x391   : >>> { %5928 = vmatprep.subr.msk.bf16.mxu0 %vm8285_vm15, %v5926_v57  ;;  %v5932_v57 = vpack.c.bf16 %v2486_v0, %v2484_v59  ;;  %v6765_v59 = vpop.permute.xlu0 %6764  ;;  %v6770_v0 = vpop.permute.xlu1 %6769  ;;  %v2643_v48 = vsel %vm9342_vm12, %v6756_v55, %v6757_v53 }
 0x392   : >>> { %v2641_v56 = vsel %vm9342_vm12, %v6751_v3, %v6752_v46  ;;  %v6772_v58 = vunpack.i.h.bf16 %v6770_v0  ;;  %v6771_v63 = vunpack.i.l.bf16 %v6770_v0  ;;  %v6766_v2 = vunpack.i.l.bf16 %v6765_v59 }
 0x393   : >>> { %5675 = vmatmul.mubr.msk.f32.gmra.mrb[4].mxu0 %vm1632_vm2, %v7951_v31 }
 0x394   : >>> { %2283 = vmatprep.mubr.f32.mxu0 %v9326_v7 }
 0x395   : >>> { %v6775_v4 = vpop.permute.xlu0 %6774  ;;  %v6780_v46 = vpop.permute.xlu1 %6779 }
 0x396   : >>> { %v6782_v0 = vunpack.i.h.bf16 %v6780_v46 }
 0x397   : >>> { %5676 = vmatmul.mubr.msk.f32.gmra.mrb[6].mxu0 %vm1632_vm2, %v7954_v33 }
 0x398   : >>> { %2422 = vmatprep.mubr.f32.mxu0 %v9326_v7 }
 0x39b   : >>> { %5685 = vmatmul.mubr.msk.f32.vlgmr.msra.gmra.mrb[0].mxu0 %vm1632_vm2, %v7957_v36 }
 0x39c   : >>> { %5931 = vmatpush1.bf16.msk.msra.mxu0 %vm8297_vm4, %v5929_v10  ;;  %2428 = vmatprep.mubr.f32.mxu0 %v9326_v7  ;;  %v2636_v10 = vsel %vm9342_vm12, %v6746_v51, %v6736_v54  ;;  %v2642_v54 = vsel %vm9342_vm12, %v6762_v9, %v6756_v55  ;;  %v6777_v55 = vunpack.i.h.bf16 %v6775_v4 }
 0x39d   : >>> { %5934 = vmatprep.subr.msk.bf16.mxu0 %vm8285_vm15, %v5932_v57  ;;  %v6761_v57 = vunpack.i.l.bf16 %v6760_v6  ;;  %v5940_v1 = vpack.c.bf16 %v2638_v62, %v2636_v10  ;;  %v5942_v6 = vpack.c.bf16 %v2643_v48, %v2641_v56  ;;  %v6781_v62 = vunpack.i.l.bf16 %v6780_v46  ;;  %v9347_v46 = vld [vmem:[#allocation20_spill] sm:$0xff] }
 0x39e   : >>> { %v2787_v56 = vsel %vm9343_vm14, %v6777_v55, %v6771_v63 }
 0x39f   : >>> { %5686 = vmatmul.mubr.msk.f32.gmra.mrb[2].mxu0 %vm1632_vm2, %v7960_v37  ;;  %v2640_v5 = vsel %vm9342_vm12, %v6761_v57, %v6751_v3  ;;  %v6785_v3 = vpop.permute.xlu0 %6784  ;;  %v6790_v57 = vpop.permute.xlu1 %6789 }
 0x3a0   : >>> { %5937 = vmatpush1.bf16.msk.msra.mxu0 %vm8297_vm4, %v5935_v8  ;;  %2434 = vmatprep.mubr.f32.mxu0 %v9326_v7  ;;  %v6767_v8 = vunpack.i.h.bf16 %v6765_v59  ;;  %v5944_v60 = vpack.c.bf16 %v2642_v54, %v2640_v5  ;;  %v6776_v59 = vunpack.i.l.bf16 %v6775_v4  ;;  %v6787_v10 = vunpack.i.h.bf16 %v6785_v3 }
 0x3a1   : >>> { %5939 = vmatprep.subr.bf16.mxu0 %v5938_v52  ;;  %v2788_v52 = vsel %vm9343_vm14, %v6771_v63, %v6772_v58  ;;  %v6786_v9 = vunpack.i.l.bf16 %v6785_v3  ;;  %v6792_v58 = vunpack.i.h.bf16 %v6790_v57 }
 0x3a2   : >>> { %v2786_v51 = vsel %vm9343_vm14, %v6766_v2, %v6767_v8  ;;  %v2785_v48 = vsel %vm9343_vm14, %v6776_v59, %v6766_v2  ;;  %v2790_v8 = vsel %vm9343_vm14, %v6781_v62, %v6782_v0  ;;  %v9344_v2 = vld [vmem:[#allocation17_spill] sm:$0xff] }
 0x3a3   : >>> { %5687 = vmatmul.mubr.msk.f32.gmra.mrb[4].mxu0 %vm1632_vm2, %v7963_v38  ;;  %v5946_v53 = vpack.c.bf16 %v2788_v52, %v2786_v51  ;;  %v2792_v5 = vsel %vm9343_vm14, %v6786_v9, %v6787_v10  ;;  %v5949_v54 = vpack.c.bf16 %v2787_v56, %v2785_v48  ;;  %v2791_v52 = vsel %vm9343_vm14, %v6792_v58, %v6786_v9  ;;  %v9346_v51 = vld [vmem:[#allocation19_spill] sm:$0xff] }
 0x3a4   : >>> { %2440 = vmatprep.mubr.f32.mxu0 %v9326_v7  ;;  %v5952_v4 = vpack.c.bf16 %v2792_v5, %v2790_v8 }
 0x3a7   : >>> { %5688 = vmatmul.mubr.msk.f32.gmra.mrb[6].mxu0 %vm1632_vm2, %v7966_v39 }
 0x3a8   : >>> { %2579 = vmatprep.mubr.f32.mxu0 %v9326_v7 }
 0x3ab   : >>> { %5697 = vmatmul.mubr.msk.f32.vlgmr.msra.gmra.mrb[0].mxu0 %vm1632_vm2, %v7969_v32 }
 0x3ac   : >>> { %5941 = vmatpush1.bf16.msra.mxu0 %v5940_v1  ;;  %2585 = vmatprep.mubr.f32.mxu0 %v9326_v7  ;;  %v6791_v1 = vunpack.i.l.bf16 %v6790_v57 }
 0x3ad   : >>> { %5943 = vmatprep.subr.bf16.mxu0 %v5942_v6 }
 0x3ae   : >>> { %v2789_v6 = vsel %vm9343_vm14, %v6791_v1, %v6781_v62  ;;  %vm9349_vm14 = vcmask 138240  }
 0x3af   : >>> { %5698 = vmatmul.mubr.msk.f32.gmra.mrb[2].mxu0 %vm1632_vm2, %v7972_v40  ;;  %v5955_v63 = vpack.c.bf16 %v2791_v52, %v2789_v6  ;;  %vm9350_vm12 = vmmov %vm9349_vm14 }
 0x3b0   : >>> { %5945 = vmatpush1.bf16.msra.mxu0 %v5944_v60  ;;  %2591 = vmatprep.mubr.f32.mxu0 %v9326_v7  ;;  %v9345_v60 = vld [vmem:[#allocation18_spill] sm:$0xff]  ;;  %vm9351_vm10 = vmmov %vm9350_vm12 }
 0x3b1   : >>> { %5948 = vmatprep.subr.msk.bf16.mxu0 %vm8321_vm1, %v5946_v53  ;;  %v9348_v53 = vld [vmem:[#allocation21_spill] sm:$0xff]  ;;  %vm9352_vm7 = vmmov %vm9351_vm10 }
 0x3b2   : >>> { %vm9353_vm6 = vmmov %vm9352_vm7 }
 0x3b3   : >>> { %5699 = vmatmul.mubr.msk.f32.gmra.mrb[4].mxu0 %vm1632_vm2, %v7975_v41  ;;  %vm9359_vm13 = vmmov %vm9353_vm6 }
 0x3b4   : >>> { %2597 = vmatprep.mubr.f32.mxu0 %v9326_v7 }
 0x3b7   : >>> { %5700 = vmatmul.mubr.msk.f32.gmra.mrb[6].mxu0 %vm1632_vm2, %v7978_v42 }
 0x3b8   : >>> { %2728 = vmatprep.mubr.f32.mxu0 %v9326_v7 }
 0x3bb   : >>> { %5701 = vmatmul.mubr.msk.f32.vlgmr.msra.gmra.mrb[0].mxu0 %vm1632_vm2, %v7981_v43 }
 0x3bc   : >>> { %5951 = vmatpush1.bf16.msk.msra.mxu0 %vm8348_vm0, %v5949_v54  ;;  %2734 = vmatprep.mubr.f32.mxu0 %v9326_v7 }
 0x3bd   : >>> { %5954 = vmatprep.subr.msk.bf16.mxu0 %vm8321_vm1, %v5952_v4 }
 0x3bf   : >>> { %5702 = vmatmul.mubr.msk.f32.gmra.mrb[2].mxu0 %vm1632_vm2, %v7984_v44 }
 0x3c0   : >>> { %5957 = vmatpush1.bf16.msk.msra.mxu0 %vm8348_vm0, %v5955_v63  ;;  %2740 = vmatprep.mubr.f32.mxu0 %v9326_v7 }
 0x3c3   : >>> { %5703 = vmatmul.mubr.msk.f32.gmra.mrb[4].mxu0 %vm1632_vm2, %v7994_v45 }
 0x3c4   : >>> { %2746 = vmatprep.mubr.f32.mxu0 %v9326_v7 }
 0x3c7   : >>> { %5704 = vmatmul.mubr.msk.f32.gmra.mrb[6].mxu0 %vm1632_vm2, %v9344_v2 }
 0x3c8   : >>> { %2885 = vmatprep.mubr.f32.mxu0 %v9326_v7 }
 0x3cb   : >>> { %5713 = vmatmul.mubr.msk.f32.vlgmr.msra.gmra.mrb[0].mxu0 %vm1632_vm2, %v9345_v60 }
 0x3cc   : >>> { %2891 = vmatprep.mubr.f32.mxu0 %v9326_v7 }
 0x3cf   : >>> { %5714 = vmatmul.mubr.msk.f32.gmra.mrb[2].mxu0 %vm1632_vm2, %v9346_v51 }
 0x3d0   : >>> { %2897 = vmatprep.mubr.f32.mxu0 %v9326_v7 }
 0x3d3   : >>> { %5715 = vmatmul.mubr.msk.f32.gmra.mrb[4].mxu0 %vm1632_vm2, %v9347_v46 }
 0x3d4   : >>> { %2903 = vmatprep.mubr.f32.mxu0 %v9326_v7 }
 0x3d7   : >>> { %5716 = vmatmul.mubr.msk.f32.gmra.mrb[6].mxu0 %vm1632_vm2, %v9348_v53 }
 0x49e   : >>> { %v2887_v3 = vpop.f32.mrb[0].mxu0 }
 0x49f   : >>> { %v2918_v55 = vmax.f32 %v2887_v3, 0.0  ;;  %v2889_v59 = vpop.f32.mrb[1].mxu0 }
 0x4a0   : >>> { %v2919_v0 = vmax.f32 %v2889_v59, 0.0 }
 0x4a2   : >>> { %v6793_v62 = vpack.i.bf16 %v2919_v0, %v2918_v55  ;;  %v2893_v10 = vpop.f32.mrb[2].mxu0 }
 0x4a3   : >>> { %v2920_v9 = vmax.f32 %v2893_v10, 0.0  ;;  %v2895_v57 = vpop.f32.mrb[3].mxu0 }
 0x4a4   : >>> { %v2921_v56 = vmax.f32 %v2895_v57, 0.0  ;;  %6794 = vrot.lane.b32.xlu0 %v6793_v62, %s7475_s23 }
 0x4a6   : >>> { %v6798_v48 = vpack.i.bf16 %v2921_v56, %v2920_v9  ;;  %v2899_v58 = vpop.f32.mrb[4].mxu0 }
 0x4a7   : >>> { %v2922_v1 = vmax.f32 %v2899_v58, 0.0  ;;  %v2901_v8 = vpop.f32.mrb[5].mxu0 }
 0x4a8   : >>> { %v2923_v5 = vmax.f32 %v2901_v8, 0.0  ;;  %6799 = vrot.lane.b32.xlu1 %v6798_v48, %s7475_s23 }
 0x4aa   : >>> { %v6803_v54 = vpack.i.bf16 %v2923_v5, %v2922_v1  ;;  %v2905_v4 = vpop.f32.mrb[6].mxu0 }
 0x4ab   : >>> { %v2924_v6 = vmax.f32 %v2905_v4, 0.0  ;;  %v2907_v52 = vpop.f32.mrb[7].mxu0 }
 0x4ac   : >>> { %v2925_v63 = vmax.f32 %v2907_v52, 0.0  ;;  %6804 = vrot.lane.b32.xlu0 %v6803_v54, %s7475_s23 }
 0x4ae   : >>> { %v6808_v2 = vpack.i.bf16 %v2925_v63, %v2924_v6 }
 0x4b0   : >>> { %6809 = vrot.lane.b32.xlu1 %v6808_v2, %s7475_s23 }
 0x516   : >>> { %v6795_v60 = vpop.permute.xlu0 %6794 }
 0x517   : >>> { %v6797_v51 = vunpack.i.h.bf16 %v6795_v60  ;;  %v6796_v46 = vunpack.i.l.bf16 %v6795_v60 }
 0x519   : >>> { %v2970_v53 = vsel %vm9349_vm14, %v6797_v51, 0.0  ;;  %v8551_v3 = vsel %vm9350_vm12, %v6796_v46, %v6797_v51  ;;  %v8559_v10 = vsel %vm9351_vm10, 0.0, %v6796_v46  ;;  %vm9354_vm14 = vmmov %vm9353_vm6 }
 0x51a   : >>> { %v6800_v55 = vpop.permute.xlu1 %6799  ;;  %v8554_v59 = vpack.i.bf16 %v2970_v53, %v8551_v3  ;;  %vm9356_vm10 = vmmov %vm9353_vm6 }
 0x51b   : >>> { %v6802_v0 = vunpack.i.h.bf16 %v6800_v55  ;;  %v6801_v62 = vunpack.i.l.bf16 %v6800_v55  ;;  %vm9357_vm12 = vmmov %vm9353_vm6 }
 0x51c   : >>> { %6814 = vrot.lane.b32.xlu0 %v8554_v59, %s7476_s24 }
 0x51d   : >>> { %v2971_v9 = vsel %vm9352_vm7, %v6802_v0, 0.0  ;;  %v8563_v57 = vsel %vm9353_vm6, %v6801_v62, %v6802_v0  ;;  %v8566_v56 = vsel %vm9354_vm14, 0.0, %v6801_v62  ;;  %vm9355_vm7 = vmmov %vm9353_vm6 }
 0x51e   : >>> { %v6805_v48 = vpop.permute.xlu0 %6804  ;;  %v8570_v58 = vpack.i.bf16 %v8566_v56, %v8559_v10  ;;  %v6823_v1 = vpack.i.bf16 %v2971_v9, %v8563_v57  ;;  %vm9358_vm14 = vmmov %vm9353_vm6 }
 0x51f   : >>> { %v6807_v8 = vunpack.i.h.bf16 %v6805_v48  ;;  %v6806_v5 = vunpack.i.l.bf16 %v6805_v48 }
 0x520   : >>> { %6819 = vrot.lane.b32.xlu0 %v8570_v58, %s7476_s24  ;;  %6824 = vrot.lane.b32.xlu1 %v6823_v1, %s7476_s24 }
 0x521   : >>> { %v2972_v54 = vsel %vm9355_vm7, %v6807_v8, 0.0  ;;  %v8578_v4 = vsel %vm9353_vm6, %v6806_v5, %v6807_v8  ;;  %v8582_v60 = vsel %vm9356_vm10, 0.0, %v6806_v5 }
 0x522   : >>> { %v6810_v6 = vpop.permute.xlu1 %6809  ;;  %v6828_v52 = vpack.i.bf16 %v2972_v54, %v8578_v4 }
 0x523   : >>> { %v6812_v63 = vunpack.i.h.bf16 %v6810_v6  ;;  %v6811_v2 = vunpack.i.l.bf16 %v6810_v6 }
 0x524   : >>> { %6829 = vrot.lane.b32.xlu1 %v6828_v52, %s7476_s24 }
 0x525   : >>> { %v2973_v51 = vsel %vm9357_vm12, %v6812_v63, 0.0  ;;  %v8587_v46 = vsel %vm9358_vm14, %v6811_v2, %v6812_v63  ;;  %v8590_v53 = vsel %vm9359_vm13, 0.0, %v6811_v2  ;;  %vm9360_vm13 = vcmask 1039360  }
 0x526   : >>> { %v6838_v55 = vpack.i.bf16 %v8590_v53, %v8582_v60  ;;  %v6833_v0 = vpack.i.bf16 %v2973_v51, %v8587_v46  ;;  %vm9361_vm7 = vmmov %vm9360_vm13 }
 0x527   : >>> { %vm9362_vm6 = vmmov %vm9361_vm7 }
 0x528   : >>> { %6839 = vrot.lane.b32.xlu1 %v6838_v55, %s7476_s24  ;;  %6834 = vrot.lane.b32.xlu0 %v6833_v0, %s7476_s24  ;;  %vm9363_vm10 = vmmov %vm9362_vm6 }
 0x529   : >>> { %vm9364_vm12 = vmmov %vm9362_vm6 }
 0x52a   : >>> { %vm9365_vm14 = vmmov %vm9362_vm6 }
 0x52c   : >>> { %6849 = vrot.lane.b32.xlu1 %v6823_v1, %s7478_s25  ;;  %6844 = vrot.lane.b32.xlu0 %v8554_v59, %s7478_s25 }
 0x530   : >>> { %6859 = vrot.lane.b32.xlu1 %v6828_v52, %s7478_s25  ;;  %6854 = vrot.lane.b32.xlu0 %v8570_v58, %s7478_s25 }
 0x534   : >>> { %6869 = vrot.lane.b32.xlu1 %v6838_v55, %s7478_s25  ;;  %6864 = vrot.lane.b32.xlu0 %v6833_v0, %s7478_s25 }
 0x538   : >>> { %6879 = vrot.lane.b32.xlu1 %v6823_v1, %s7479_s11  ;;  %6874 = vrot.lane.b32.xlu0 %v8554_v59, %s7479_s11 }
 0x53c   : >>> { %6889 = vrot.lane.b32.xlu1 %v6828_v52, %s7479_s11  ;;  %6884 = vrot.lane.b32.xlu0 %v8570_v58, %s7479_s11 }
 0x540   : >>> { %6899 = vrot.lane.b32.xlu1 %v6838_v55, %s7479_s11  ;;  %6894 = vrot.lane.b32.xlu0 %v6833_v0, %s7479_s11 }
 0x544   : >>> { %6909 = vrot.lane.b32.xlu1 %v6823_v1, %s7480_s12  ;;  %6904 = vrot.lane.b32.xlu0 %v8554_v59, %s7480_s12 }
 0x548   : >>> { %6919 = vrot.lane.b32.xlu1 %v6828_v52, %s7480_s12  ;;  %6914 = vrot.lane.b32.xlu0 %v8570_v58, %s7480_s12 }
 0x54c   : >>> { %6929 = vrot.lane.b32.xlu1 %v6838_v55, %s7480_s12  ;;  %6924 = vrot.lane.b32.xlu0 %v6833_v0, %s7480_s12 }
 0x550   : >>> { %6939 = vrot.lane.b32.xlu1 %v6823_v1, %s7481_s14  ;;  %6934 = vrot.lane.b32.xlu0 %v8554_v59, %s7481_s14 }
 0x554   : >>> { %6949 = vrot.lane.b32.xlu1 %v6828_v52, %s7481_s14  ;;  %6944 = vrot.lane.b32.xlu0 %v8570_v58, %s7481_s14 }
 0x558   : >>> { %6959 = vrot.lane.b32.xlu1 %v6838_v55, %s7481_s14  ;;  %6954 = vrot.lane.b32.xlu0 %v6833_v0, %s7481_s14 }
 0x55c   : >>> { %6969 = vrot.lane.b32.xlu1 %v6823_v1, %s7482_s15  ;;  %6964 = vrot.lane.b32.xlu0 %v8554_v59, %s7482_s15 }
 0x560   : >>> { %6979 = vrot.lane.b32.xlu1 %v6828_v52, %s7482_s15  ;;  %6974 = vrot.lane.b32.xlu0 %v8570_v58, %s7482_s15 }
 0x564   : >>> { %6989 = vrot.lane.b32.xlu1 %v6838_v55, %s7482_s15  ;;  %6984 = vrot.lane.b32.xlu0 %v6833_v0, %s7482_s15 }
 0x568   : >>> { %6999 = vrot.lane.b32.xlu1 %v6823_v1, %s7483_s16  ;;  %6994 = vrot.lane.b32.xlu0 %v8554_v59, %s7483_s16 }
 0x56c   : >>> { %7009 = vrot.lane.b32.xlu1 %v6828_v52, %s7483_s16  ;;  %7004 = vrot.lane.b32.xlu0 %v8570_v58, %s7483_s16 }
 0x570   : >>> { %7019 = vrot.lane.b32.xlu1 %v6838_v55, %s7483_s16  ;;  %7014 = vrot.lane.b32.xlu0 %v6833_v0, %s7483_s16 }
 0x574   : >>> { %7029 = vrot.lane.b32.xlu1 %v6823_v1, %s7484_s17  ;;  %7024 = vrot.lane.b32.xlu0 %v8554_v59, %s7484_s17 }
 0x578   : >>> { %7039 = vrot.lane.b32.xlu1 %v6828_v52, %s7484_s17  ;;  %7034 = vrot.lane.b32.xlu0 %v8570_v58, %s7484_s17 }
 0x57c   : >>> { %7049 = vrot.lane.b32.xlu1 %v6838_v55, %s7484_s17  ;;  %7044 = vrot.lane.b32.xlu0 %v6833_v0, %s7484_s17 }
 0x58e   : >>> { %v6815_v5 = vpop.permute.xlu0 %6814 }
 0x58f   : >>> { %v6817_v54 = vunpack.i.h.bf16 %v6815_v5  ;;  %v6816_v6 = vunpack.i.l.bf16 %v6815_v5 }
 0x591   : >>> { %v3015_v59 = vsel %vm9360_vm13, %v6816_v6, %v6817_v54  ;;  %vm9366_vm13 = vmmov %vm9362_vm6 }
 0x592   : >>> { %v6820_v63 = vpop.permute.xlu0 %6819  ;;  %v6825_v2 = vpop.permute.xlu1 %6824 }
 0x593   : >>> { %v6822_v51 = vunpack.i.h.bf16 %v6820_v63  ;;  %v6821_v8 = vunpack.i.l.bf16 %v6820_v63  ;;  %v6827_v1 = vunpack.i.h.bf16 %v6825_v2  ;;  %v6826_v48 = vunpack.i.l.bf16 %v6825_v2 }
 0x595   : >>> { %v3017_v52 = vsel %vm9361_vm7, %v6826_v48, %v6827_v1  ;;  %v3014_v9 = vsel %vm9362_vm6, %v6821_v8, %v6816_v6  ;;  %v3016_v58 = vsel %vm9363_vm10, %v6822_v51, %v6826_v48  ;;  %vm9367_vm7 = vmmov %vm9362_vm6  ;;  %vm9377_vm6 = vcmask 916480  }
 0x596   : >>> { %v6830_v55 = vpop.permute.xlu1 %6829  ;;  %v5958_v62 = vpack.c.bf16 %v3017_v52, %v3015_v59  ;;  %v5960_v0 = vpack.c.bf16 %v3016_v58, %v3014_v9  ;;  %vm9378_vm10 = vmmov %vm9377_vm6 }
 0x597   : >>> { %v6832_v11 = vunpack.i.h.bf16 %v6830_v55  ;;  %v6831_v5 = vunpack.i.l.bf16 %v6830_v55 }
 0x598   : >>> { %5959 = vmatprep.subr.bf16.mxu1 %v5958_v62 }
 0x599   : >>> { %5961 = vmatpush1.bf16.msra.mxu1 %v5960_v0  ;;  %v3019_v54 = vsel %vm9364_vm12, %v6831_v5, %v6832_v11  ;;  %v9368_v11 = vpack.c.bf16 %v8563_v57, %v8551_v3  ;;  %v9371_v57 = vpack.c.bf16 %v8587_v46, %v8578_v4  ;;  %vm9381_vm12 = vmmov %vm9377_vm6 }
 0x59a   : >>> { %v6840_v12 = vpop.permute.xlu1 %6839  ;;  %v6835_v13 = vpop.permute.xlu0 %6834 }
 0x59b   : >>> { %v6842_v63 = vunpack.i.h.bf16 %v6840_v12  ;;  %v6841_v14 = vunpack.i.l.bf16 %v6840_v12  ;;  %v6837_v2 = vunpack.i.h.bf16 %v6835_v13  ;;  %v6836_v15 = vunpack.i.l.bf16 %v6835_v13 }
 0x59d   : >>> { %v3018_v1 = vsel %vm9365_vm14, %v6841_v14, %v6831_v5  ;;  %v3020_v8 = vsel %vm9366_vm13, %v6842_v63, %v6836_v15  ;;  %v3021_v48 = vsel %vm9367_vm7, %v6836_v15, %v6837_v2  ;;  %v9369_v14 = vld [vmem:[#allocation26_spill] sm:$0xff]  ;;  %v9370_v5 = vpack.c.bf16 %v8566_v56, %v8559_v10  ;;  %vm9382_vm14 = vmmov %vm9377_vm6 }
 0x59e   : >>> { %v6850_v6 = vpop.permute.xlu1 %6849  ;;  %v6845_v9 = vpop.permute.xlu0 %6844  ;;  %v5962_v62 = vpack.c.bf16 %v3021_v48, %v3019_v54  ;;  %v5964_v51 = vpack.c.bf16 %v3020_v8, %v3018_v1  ;;  %v9372_v54 = vld [vmem:[#allocation27_spill] sm:$0xff]  ;;  %v9373_v10 = vpack.c.bf16 %v8590_v53, %v8582_v60  ;;  %vm9383_vm13 = vmmov %vm9377_vm6 }
 0x59f   : >>> { %v6852_v59 = vunpack.i.h.bf16 %v6850_v6  ;;  %v6851_v52 = vunpack.i.l.bf16 %v6850_v6  ;;  %v6847_v58 = vunpack.i.h.bf16 %v6845_v9  ;;  %v6846_v55 = vunpack.i.l.bf16 %v6845_v9  ;;  %v9374_v6 = vld [vmem:[#allocation28_spill] sm:$0xff]  ;;  %vm9385_vm7 = vmmov %vm9377_vm6 }
 0x5a0   : >>> { %5963 = vmatprep.subr.bf16.mxu1 %v5962_v62 }
 0x5a1   : >>> { %5965 = vmatpush1.bf16.msra.mxu1 %v5964_v51  ;;  %v3259_v15 = vsel %vm547_vm11, %v6851_v52, %v6852_v59  ;;  %v3257_v0 = vsel %vm547_vm11, %v6846_v55, %v6847_v58 }
 0x5a2   : >>> { %v6860_v12 = vpop.permute.xlu1 %6859  ;;  %v6855_v13 = vpop.permute.xlu0 %6854  ;;  %5968 = vmatprep.subr.msk.bf16.mxu1 %vm8285_vm15, %v9368_v11  ;;  %v5978_v2 = vpack.c.bf16 %v3259_v15, %v3257_v0 }
 0x5a3   : >>> { %v6857_v4 = vunpack.i.h.bf16 %v6855_v13  ;;  %v6856_v46 = vunpack.i.l.bf16 %v6855_v13  ;;  %v6862_v9 = vunpack.i.h.bf16 %v6860_v12  ;;  %v6861_v62 = vunpack.i.l.bf16 %v6860_v12 }
 0x5a4   : >>> { %5717 = vmatmul.mubr.msk.f32.vlgmr.msra.gmra.mrb[0].mxu1 %vm1632_vm2, %v9369_v14  ;;  %v9375_v14 = vld [vmem:[#allocation29_spill] sm:$0xff] }
 0x5a5   : >>> { %5971 = vmatpush1.bf16.msk.msra.mxu1 %vm8297_vm4, %v9370_v5  ;;  %3112 = vmatprep.mubr.f32.mxu1 %v9326_v7  ;;  %v3258_v51 = vsel %vm547_vm11, %v6857_v4, %v6851_v52  ;;  %v3256_v59 = vsel %vm547_vm11, %v6856_v46, %v6846_v55  ;;  %v3261_v12 = vsel %vm547_vm11, %v6861_v62, %v6862_v9 }
 0x5a6   : >>> { %v6870_v63 = vpop.permute.xlu1 %6869  ;;  %v6865_v3 = vpop.permute.xlu0 %6864  ;;  %5974 = vmatprep.subr.msk.bf16.mxu1 %vm8285_vm15, %v9371_v57  ;;  %v5981_v52 = vpack.c.bf16 %v3258_v51, %v3256_v59 }
 0x5a7   : >>> { %v6867_v8 = vunpack.i.h.bf16 %v6865_v3  ;;  %v6866_v48 = vunpack.i.l.bf16 %v6865_v3  ;;  %v6872_v58 = vunpack.i.h.bf16 %v6870_v63  ;;  %v6871_v11 = vunpack.i.l.bf16 %v6870_v63 }
 0x5a8   : >>> { %5718 = vmatmul.mubr.msk.f32.gmra.mrb[2].mxu1 %vm1632_vm2, %v9372_v54 }
 0x5a9   : >>> { %5977 = vmatpush1.bf16.msk.msra.mxu1 %vm8297_vm4, %v9373_v10  ;;  %3118 = vmatprep.mubr.f32.mxu1 %v9326_v7  ;;  %v3263_v13 = vsel %vm547_vm11, %v6866_v48, %v6867_v8  ;;  %v3260_v55 = vsel %vm547_vm11, %v6871_v11, %v6861_v62  ;;  %v3262_v63 = vsel %vm547_vm11, %v6872_v58, %v6866_v48  ;;  %v9376_v10 = vld [vmem:[#allocation22_spill] sm:$0xff] }
 0x5aa   : >>> { %v6880_v56 = vpop.permute.xlu1 %6879  ;;  %v6875_v1 = vpop.permute.xlu0 %6874  ;;  %5980 = vmatprep.subr.msk.bf16.mxu1 %vm8321_vm1, %v5978_v2  ;;  %v5984_v54 = vpack.c.bf16 %v3263_v13, %v3261_v12  ;;  %v5987_v8 = vpack.c.bf16 %v3262_v63, %v3260_v55  ;;  %v9380_v13 = vld [vmem:[#allocation24_spill] sm:$0xff]  ;;  %v9384_v55 = vld [vmem:[#allocation25_spill] sm:$0xff] }
 0x5ab   : >>> { %v6882_v15 = vunpack.i.h.bf16 %v6880_v56  ;;  %v6881_v0 = vunpack.i.l.bf16 %v6880_v56  ;;  %v6877_v5 = vunpack.i.h.bf16 %v6875_v1  ;;  %v6876_v3 = vunpack.i.l.bf16 %v6875_v1 }
 0x5ac   : >>> { %5719 = vmatmul.mubr.msk.f32.gmra.mrb[4].mxu1 %vm1632_vm2, %v9374_v6  ;;  %v9379_v6 = vld [vmem:[#allocation23_spill] sm:$0xff] }
 0x5ad   : >>> { %3124 = vmatprep.mubr.f32.mxu1 %v9326_v7  ;;  %v3416_v4 = vsel %vm9377_vm6, %v6881_v0, %v6882_v15  ;;  %v3414_v56 = vsel %vm9378_vm10, %v6876_v3, %v6877_v5  ;;  %vm9386_vm10 = vmmov %vm9377_vm6 }
 0x5ae   : >>> { %v8702_v60 = vpop.permute.xlu1 %6889  ;;  %v6885_v53 = vpop.permute.xlu0 %6884  ;;  %v5990_v48 = vpack.c.bf16 %v3416_v4, %v3414_v56 }
 0x5af   : >>> { %v6887_v9 = vunpack.i.h.bf16 %v6885_v53  ;;  %v6886_v62 = vunpack.i.l.bf16 %v6885_v53  ;;  %v6891_v15 = vunpack.i.l.bf16 %v8702_v60 }
 0x5b0   : >>> { %5720 = vmatmul.mubr.msk.f32.gmra.mrb[6].mxu1 %vm1632_vm2, %v9375_v14  ;;  %v6892_v14 = vunpack.i.h.bf16 %v8702_v60 }
 0x5b1   : >>> { %3207 = vmatprep.mubr.f32.mxu1 %v9326_v7  ;;  %v3415_v5 = vsel %vm9381_vm12, %v6887_v9, %v6881_v0  ;;  %v3413_v12 = vsel %vm9382_vm14, %v6886_v62, %v6876_v3  ;;  %vm9388_vm12 = vcmask 908288  }
 0x5b2   : >>> { %v6900_v57 = vpop.permute.xlu1 %6899  ;;  %v6895_v2 = vpop.permute.xlu0 %6894  ;;  %v3418_v60 = vsel %vm9385_vm7, %v6891_v15, %v6892_v14  ;;  %v5993_v0 = vpack.c.bf16 %v3415_v5, %v3413_v12  ;;  %vm9389_vm14 = vmmov %vm9388_vm12 }
 0x5b3   : >>> { %v6897_v51 = vunpack.i.h.bf16 %v6895_v2  ;;  %v6896_v59 = vunpack.i.l.bf16 %v6895_v2  ;;  %v6901_v53 = vunpack.i.l.bf16 %v6900_v57  ;;  %vm9393_vm7 = vmmov %vm9388_vm12 }
 0x5b4   : >>> { %5729 = vmatmul.mubr.msk.f32.vlgmr.msra.gmra.mrb[0].mxu1 %vm1632_vm2, %v9376_v10 }
 0x5b5   : >>> { %5983 = vmatpush1.bf16.msk.msra.mxu1 %vm8348_vm0, %v5981_v52  ;;  %3213 = vmatprep.mubr.f32.mxu1 %v9326_v7  ;;  %v6902_v52 = vunpack.i.h.bf16 %v6900_v57  ;;  %v3420_v2 = vsel %vm9383_vm13, %v6896_v59, %v6897_v51  ;;  %v3417_v3 = vsel %vm9377_vm6, %v6901_v53, %v6891_v15  ;;  %vm9392_vm13 = vmmov %vm9388_vm12 }
 0x5b6   : >>> { %5986 = vmatprep.subr.msk.bf16.mxu1 %vm8321_vm1, %v5984_v54  ;;  %v6910_v1 = vpop.permute.xlu1 %6909  ;;  %v6905_v46 = vpop.permute.xlu0 %6904  ;;  %vm9394_vm6 = vmmov %vm9393_vm7 }
 0x5b7   : >>> { %v6912_v63 = vunpack.i.h.bf16 %v6910_v1  ;;  %v6911_v54 = vunpack.i.l.bf16 %v6910_v1  ;;  %v6907_v10 = vunpack.i.h.bf16 %v6905_v46  ;;  %v6906_v4 = vunpack.i.l.bf16 %v6905_v46 }
 0x5b8   : >>> { %5730 = vmatmul.mubr.msk.f32.gmra.mrb[2].mxu1 %vm1632_vm2, %v9379_v6  ;;  %v3419_v57 = vsel %vm9386_vm10, %v6902_v52, %v6896_v59  ;;  %v9387_v6 = vld [vmem:[#allocation30_spill] sm:$0xff]  ;;  %v9390_v59 = vld [vmem:[#allocation31_spill] sm:$0xff]  ;;  %v9391_v52 = vld [vmem:[#allocation32_spill] sm:$0xff] }
 0x5b9   : >>> { %5989 = vmatpush1.bf16.msk.msra.mxu1 %vm8348_vm0, %v5987_v8  ;;  %3219 = vmatprep.mubr.f32.mxu1 %v9326_v7  ;;  %v3573_v9 = vsel %vm9388_vm12, %v6911_v54, %v6912_v63  ;;  %v3571_v1 = vsel %vm9389_vm14, %v6906_v4, %v6907_v10  ;;  %v5999_v46 = vpack.c.bf16 %v3419_v57, %v3417_v3  ;;  %vm9396_vm10 = vmmov %vm9394_vm6 }
 0x5ba   : >>> { %5992 = vmatprep.subr.msk.bf16.mxu1 %vm8285_vm15, %v5990_v48  ;;  %v8729_v58 = vpop.permute.xlu1 %6919  ;;  %v6915_v11 = vpop.permute.xlu0 %6914  ;;  %v5996_v48 = vpack.c.bf16 %v3420_v2, %v3418_v60  ;;  %vm9397_vm12 = vmmov %vm9394_vm6 }
 0x5bb   : >>> { %v6917_v14 = vunpack.i.h.bf16 %v6915_v11  ;;  %v6916_v15 = vunpack.i.l.bf16 %v6915_v11  ;;  %v6921_v63 = vunpack.i.l.bf16 %v8729_v58  ;;  %vm9398_vm14 = vmmov %vm9394_vm6 }
 0x5bc   : >>> { %5731 = vmatmul.mubr.msk.f32.gmra.mrb[4].mxu1 %vm1632_vm2, %v9380_v13  ;;  %v6002_v13 = vpack.c.bf16 %v3573_v9, %v3571_v1 }
 0x5bd   : >>> { %3225 = vmatprep.mubr.f32.mxu1 %v9326_v7  ;;  %v3572_v10 = vsel %vm9392_vm13, %v6917_v14, %v6911_v54  ;;  %v3570_v60 = vsel %vm9393_vm7, %v6916_v15, %v6906_v4  ;;  %vm9400_vm13 = vcmask 900096  }
 0x5be   : >>> { %v6930_v56 = vpop.permute.xlu1 %6929  ;;  %v6925_v8 = vpop.permute.xlu0 %6924  ;;  %vm9401_vm7 = vmmov %vm9400_vm13 }
 0x5bf   : >>> { %v6927_v5 = vunpack.i.h.bf16 %v6925_v8  ;;  %v6926_v12 = vunpack.i.l.bf16 %v6925_v8  ;;  %v6931_v3 = vunpack.i.l.bf16 %v6930_v56  ;;  %v9395_v8 = vld [vmem:[#allocation33_spill] sm:$0xff] }
 0x5c0   : >>> { %5732 = vmatmul.mubr.msk.f32.gmra.mrb[6].mxu1 %vm1632_vm2, %v9384_v55  ;;  %v6922_v55 = vunpack.i.h.bf16 %v8729_v58  ;;  %v6004_v58 = vpack.c.bf16 %v3572_v10, %v3570_v60 }
 0x5c1   : >>> { %3356 = vmatprep.mubr.f32.mxu1 %v9326_v7  ;;  %v3577_v11 = vsel %vm9394_vm6, %v6926_v12, %v6927_v5  ;;  %v3574_v54 = vsel %vm9397_vm12, %v6931_v3, %v6921_v63  ;;  %v9402_v5 = vld [vmem:[#allocation35_spill] sm:$0xff]  ;;  %vm9404_vm6 = vmmov %vm9401_vm7 }
 0x5c2   : >>> { %v6940_v62 = vpop.permute.xlu1 %6939  ;;  %v6935_v51 = vpop.permute.xlu0 %6934  ;;  %v3575_v1 = vsel %vm9396_vm10, %v6921_v63, %v6922_v55  ;;  %vm9405_vm10 = vmmov %vm9404_vm6 }
 0x5c3   : >>> { %v6942_v57 = vunpack.i.h.bf16 %v6940_v62  ;;  %v6936_v9 = vunpack.i.l.bf16 %v6935_v51  ;;  %vm9406_vm12 = vmmov %vm9404_vm6 }
 0x5c4   : >>> { %5741 = vmatmul.mubr.msk.f32.vlgmr.msra.gmra.mrb[0].mxu1 %vm1632_vm2, %v9387_v6  ;;  %v6937_v6 = vunpack.i.h.bf16 %v6935_v51 }
 0x5c5   : >>> { %5995 = vmatpush1.bf16.msk.msra.mxu1 %vm8297_vm4, %v5993_v0  ;;  %3362 = vmatprep.mubr.f32.mxu1 %v9326_v7  ;;  %v6932_v0 = vunpack.i.h.bf16 %v6930_v56 }
 0x5c6   : >>> { %5998 = vmatprep.subr.msk.bf16.mxu1 %vm8285_vm15, %v5996_v48  ;;  %v6950_v53 = vpop.permute.xlu1 %6949  ;;  %v6945_v2 = vpop.permute.xlu0 %6944  ;;  %v6941_v48 = vunpack.i.l.bf16 %v6940_v62  ;;  %v3720_v62 = vsel %vm9401_vm7, %v6936_v9, %v6937_v6  ;;  %vm9410_vm7 = vmmov %vm9404_vm6 }
 0x5c7   : >>> { %v3576_v4 = vsel %vm9398_vm14, %v6932_v0, %v6926_v12  ;;  %v6947_v55 = vunpack.i.h.bf16 %v6945_v2  ;;  %v6946_v63 = vunpack.i.l.bf16 %v6945_v2  ;;  %v9403_v0 = vld [vmem:[#allocation36_spill] sm:$0xff]  ;;  %v6952_v3 = vunpack.i.h.bf16 %v6950_v53  ;;  %v9407_v2 = vld [vmem:[#allocation37_spill] sm:$0xff]  ;;  %vm9408_vm14 = vmmov %vm9404_vm6 }
 0x5c8   : >>> { %5742 = vmatmul.mubr.msk.f32.gmra.mrb[2].mxu1 %vm1632_vm2, %v9390_v59  ;;  %v9399_v59 = vld [vmem:[#allocation34_spill] sm:$0xff]  ;;  %v3722_v14 = vsel %vm9400_vm13, %v6941_v48, %v6942_v57  ;;  %v6008_v51 = vpack.c.bf16 %v3576_v4, %v3574_v54  ;;  %vm9409_vm13 = vmmov %vm9404_vm6 }
 0x5c9   : >>> { %6001 = vmatpush1.bf16.msk.msra.mxu1 %vm8297_vm4, %v5999_v46  ;;  %3368 = vmatprep.mubr.f32.mxu1 %v9326_v7  ;;  %v6010_v15 = vpack.c.bf16 %v3722_v14, %v3720_v62  ;;  %v3719_v57 = vsel %vm9405_vm10, %v6946_v63, %v6936_v9 }
 0x5ca   : >>> { %6003 = vmatprep.subr.bf16.mxu1 %v6002_v13  ;;  %v6960_v46 = vpop.permute.xlu1 %6959  ;;  %v6955_v56 = vpop.permute.xlu0 %6954  ;;  %v6006_v13 = vpack.c.bf16 %v3577_v11, %v3575_v1  ;;  %v6951_v11 = vunpack.i.l.bf16 %v6950_v53 }
 0x5cb   : >>> { %v6957_v10 = vunpack.i.h.bf16 %v6955_v56  ;;  %v6956_v60 = vunpack.i.l.bf16 %v6955_v56  ;;  %v6962_v6 = vunpack.i.h.bf16 %v6960_v46  ;;  %v6961_v1 = vunpack.i.l.bf16 %v6960_v46 }
 0x5cc   : >>> { %5743 = vmatmul.mubr.msk.f32.gmra.mrb[4].mxu1 %vm1632_vm2, %v9391_v52  ;;  %v3724_v53 = vsel %vm9408_vm14, %v6951_v11, %v6952_v3 }
 0x5cd   : >>> { %3374 = vmatprep.mubr.f32.mxu1 %v9326_v7  ;;  %v3723_v9 = vsel %vm9409_vm13, %v6961_v1, %v6951_v11  ;;  %v3725_v46 = vsel %vm9410_vm7, %v6962_v6, %v6956_v60  ;;  %v9415_v6 = vld [vmem:[#allocation40_spill] sm:$0xff] }
 0x5ce   : >>> { %v6970_v12 = vpop.permute.xlu1 %6969  ;;  %v6965_v52 = vpop.permute.xlu0 %6964 }
 0x5cf   : >>> { %v6972_v56 = vunpack.i.h.bf16 %v6970_v12  ;;  %v6966_v14 = vunpack.i.l.bf16 %v6965_v52 }
 0x5d0   : >>> { %5744 = vmatmul.mubr.msk.f32.gmra.mrb[6].mxu1 %vm1632_vm2, %v9395_v8  ;;  %v3721_v8 = vsel %vm9404_vm6, %v6947_v55, %v6941_v48  ;;  %vm9412_vm6 = vcmask 785408   ;;  %v6019_v55 = vpack.c.bf16 %v3725_v46, %v3723_v9 }
 0x5d1   : >>> { %3513 = vmatprep.mubr.f32.mxu1 %v9326_v7  ;;  %v6013_v48 = vpack.c.bf16 %v3721_v8, %v3719_v57  ;;  %vm9413_vm10 = vmmov %vm9412_vm6 }
 0x5d2   : >>> { %v6980_v54 = vpop.permute.xlu1 %6979  ;;  %v6975_v4 = vpop.permute.xlu0 %6974  ;;  %vm9417_vm14 = vmmov %vm9412_vm6 }
 0x5d3   : >>> { %v6982_v1 = vunpack.i.h.bf16 %v6980_v54  ;;  %vm9418_vm13 = vmmov %vm9412_vm6 }
 0x5d4   : >>> { %5753 = vmatmul.mubr.msk.f32.vlgmr.msra.gmra.mrb[0].mxu1 %vm1632_vm2, %v9399_v59  ;;  %v6971_v59 = vunpack.i.l.bf16 %v6970_v12  ;;  %vm9420_vm7 = vmmov %vm9412_vm6 }
 0x5d5   : >>> { %6005 = vmatpush1.bf16.msra.mxu1 %v6004_v58  ;;  %3519 = vmatprep.mubr.f32.mxu1 %v9326_v7  ;;  %v3726_v58 = vsel %vm9406_vm12, %v6956_v60, %v6957_v10  ;;  %v9414_v10 = vld [vmem:[#allocation39_spill] sm:$0xff]  ;;  %v6977_v60 = vunpack.i.h.bf16 %v6975_v4  ;;  %vm9416_vm12 = vmmov %vm9412_vm6 }
 0x5d6   : >>> { %6007 = vmatprep.subr.bf16.mxu1 %v6006_v13  ;;  %v6967_v13 = vunpack.i.h.bf16 %v6965_v52  ;;  %v6016_v62 = vpack.c.bf16 %v3726_v58, %v3724_v53  ;;  %v6990_v12 = vpop.permute.xlu1 %6989  ;;  %v6985_v52 = vpop.permute.xlu0 %6984  ;;  %v6981_v58 = vunpack.i.l.bf16 %v6980_v54 }
 0x5d7   : >>> { %v6987_v3 = vunpack.i.h.bf16 %v6985_v52  ;;  %v6986_v11 = vunpack.i.l.bf16 %v6985_v52  ;;  %v6991_v53 = vunpack.i.l.bf16 %v6990_v12 }
 0x5d8   : >>> { %5754 = vmatmul.mubr.msk.f32.gmra.mrb[2].mxu1 %vm1632_vm2, %v9402_v5  ;;  %v3877_v5 = vsel %vm9413_vm10, %v6966_v14, %v6967_v13  ;;  %v6992_v13 = vunpack.i.h.bf16 %v6990_v12  ;;  %v3881_v54 = vsel %vm9420_vm7, %v6981_v58, %v6982_v1  ;;  %vm9421_vm10 = vmmov %vm9412_vm6 }
 0x5d9   : >>> { %6009 = vmatpush1.bf16.msra.mxu1 %v6008_v51  ;;  %3525 = vmatprep.mubr.f32.mxu1 %v9326_v7  ;;  %v9411_v51 = vld [vmem:[#allocation38_spill] sm:$0xff] }
 0x5da   : >>> { %6012 = vmatprep.subr.msk.bf16.mxu1 %vm8321_vm1, %v6010_v15  ;;  %v3879_v15 = vsel %vm9412_vm6, %v6971_v59, %v6972_v56  ;;  %v7000_v8 = vpop.permute.xlu1 %6999  ;;  %v6995_v57 = vpop.permute.xlu0 %6994  ;;  %v3882_v12 = vsel %vm9421_vm10, %v6992_v13, %v6986_v11 }
 0x5db   : >>> { %v6022_v63 = vpack.c.bf16 %v3879_v15, %v3877_v5  ;;  %v7002_v9 = vunpack.i.h.bf16 %v7000_v8  ;;  %v7001_v46 = vunpack.i.l.bf16 %v7000_v8 }
 0x5dc   : >>> { %5755 = vmatmul.mubr.msk.f32.gmra.mrb[4].mxu1 %vm1632_vm2, %v9403_v0  ;;  %v6976_v0 = vunpack.i.l.bf16 %v6975_v4  ;;  %v9419_v4 = vld [vmem:[#allocation41_spill] sm:$0xff] }
 0x5dd   : >>> { %3531 = vmatprep.mubr.f32.mxu1 %v9326_v7 }
 0x5de   : >>> { %v3876_v56 = vsel %vm9417_vm14, %v6976_v0, %v6966_v14  ;;  %v7010_v15 = vpop.permute.xlu1 %7009  ;;  %v7005_v5 = vpop.permute.xlu0 %7004  ;;  %v3880_v14 = vsel %vm9412_vm6, %v6991_v53, %v6981_v58 }
 0x5df   : >>> { %v7012_v53 = vunpack.i.h.bf16 %v7010_v15 }
 0x5e0   : >>> { %5756 = vmatmul.mubr.msk.f32.gmra.mrb[6].mxu1 %vm1632_vm2, %v9407_v2  ;;  %v3878_v2 = vsel %vm9416_vm12, %v6977_v60, %v6971_v59  ;;  %vm9423_vm12 = vcmask 777216   ;;  %v6031_v60 = vpack.c.bf16 %v3882_v12, %v3880_v14 }
 0x5e1   : >>> { %3662 = vmatprep.mubr.f32.mxu1 %v9326_v7  ;;  %v6025_v59 = vpack.c.bf16 %v3878_v2, %v3876_v56  ;;  %vm9424_vm14 = vmmov %vm9423_vm12  ;;  %v9426_v2 = vld [vmem:[#allocation44_spill] sm:$0xff] }
 0x5e2   : >>> { %v7020_v0 = vpop.permute.xlu1 %7019  ;;  %vm9428_vm7 = vmmov %vm9423_vm12 }
 0x5e3   : >>> { %vm9429_vm6 = vmmov %vm9428_vm7 }
 0x5e4   : >>> { %5757 = vmatmul.mubr.msk.f32.vlgmr.msra.gmra.mrb[0].mxu1 %vm1632_vm2, %v9411_v51  ;;  %v6996_v51 = vunpack.i.l.bf16 %v6995_v57  ;;  %vm9431_vm10 = vmmov %vm9429_vm6 }
 0x5e5   : >>> { %6015 = vmatpush1.bf16.msk.msra.mxu1 %vm8348_vm0, %v6013_v48  ;;  %3668 = vmatprep.mubr.f32.mxu1 %v9326_v7  ;;  %v3883_v48 = vsel %vm9418_vm13, %v6986_v11, %v6987_v3  ;;  %v7015_v3 = vpop.permute.xlu0 %7014  ;;  %v9425_v11 = vld [vmem:[#allocation43_spill] sm:$0xff]  ;;  %vm9427_vm13 = vmmov %vm9423_vm12 }
 0x5e6   : >>> { %6018 = vmatprep.subr.msk.bf16.mxu1 %vm8321_vm1, %v6016_v62  ;;  %v6997_v62 = vunpack.i.h.bf16 %v6995_v57  ;;  %v6028_v52 = vpack.c.bf16 %v3883_v48, %v3881_v54  ;;  %v7007_v57 = vunpack.i.h.bf16 %v7005_v5  ;;  %v7017_v1 = vunpack.i.h.bf16 %v7015_v3  ;;  %v7030_v56 = vpop.permute.xlu1 %7029 }
 0x5e7   : >>> { %v7016_v58 = vunpack.i.l.bf16 %v7015_v3  ;;  %v7011_v48 = vunpack.i.l.bf16 %v7010_v15  ;;  %v7021_v54 = vunpack.i.l.bf16 %v7020_v0  ;;  %v7032_v14 = vunpack.i.h.bf16 %v7030_v56 }
 0x5e8   : >>> { %5758 = vmatmul.mubr.msk.f32.gmra.mrb[2].mxu1 %vm1632_vm2, %v9414_v10  ;;  %v4034_v10 = vsel %vm9424_vm14, %v6996_v51, %v6997_v62  ;;  %v7022_v62 = vunpack.i.h.bf16 %v7020_v0  ;;  %v7031_v12 = vunpack.i.l.bf16 %v7030_v56  ;;  %vm9433_vm14 = vmmov %vm9429_vm6 }
 0x5e9   : >>> { %6021 = vmatpush1.bf16.msk.msra.mxu1 %vm8348_vm0, %v6019_v55  ;;  %3674 = vmatprep.mubr.f32.mxu1 %v9326_v7  ;;  %v9422_v55 = vld [vmem:[#allocation42_spill] sm:$0xff]  ;;  %v7025_v13 = vpop.permute.xlu0 %7024 }
 0x5ea   : >>> { %6024 = vmatprep.subr.msk.bf16.mxu1 %vm8285_vm15, %v6022_v63  ;;  %v4036_v63 = vsel %vm9423_vm12, %v7001_v46, %v7002_v9  ;;  %vm9432_vm12 = vmmov %vm9429_vm6 }
 0x5eb   : >>> { %v6034_v8 = vpack.c.bf16 %v4036_v63, %v4034_v10  ;;  %v4038_v63 = vsel %vm9431_vm10, %v7011_v48, %v7012_v53 }
 0x5ec   : >>> { %5759 = vmatmul.mubr.msk.f32.gmra.mrb[4].mxu1 %vm1632_vm2, %v9415_v6  ;;  %v7006_v6 = vunpack.i.l.bf16 %v7005_v5  ;;  %v9430_v5 = vld [vmem:[#allocation45_spill] sm:$0xff] }
 0x5ed   : >>> { %3680 = vmatprep.mubr.f32.mxu1 %v9326_v7  ;;  %v7035_v10 = vpop.permute.xlu0 %7034 }
 0x5ee   : >>> { %v4033_v9 = vsel %vm9428_vm7, %v7006_v6, %v6996_v51  ;;  %v4039_v51 = vsel %vm9433_vm14, %v7022_v62, %v7016_v58  ;;  %v7036_v56 = vunpack.i.l.bf16 %v7035_v10 }
 0x5f0   : >>> { %5760 = vmatmul.mubr.msk.f32.gmra.mrb[6].mxu1 %vm1632_vm2, %v9419_v4  ;;  %v4035_v4 = vsel %vm9427_vm13, %v7007_v57, %v7001_v46  ;;  %v4037_v46 = vsel %vm9432_vm12, %v7021_v54, %v7011_v48  ;;  %vm9435_vm13 = vcmask 769024   ;;  %v7040_v57 = vpop.permute.xlu1 %7039 }
 0x5f1   : >>> { %3819 = vmatprep.mubr.f32.mxu1 %v9326_v7  ;;  %v6036_v15 = vpack.c.bf16 %v4035_v4, %v4033_v9  ;;  %v4185_v3 = vsel %vm9435_vm13, %v7031_v12, %v7032_v14  ;;  %vm9436_vm7 = vmmov %vm9435_vm13  ;;  %v7042_v9 = vunpack.i.h.bf16 %v7040_v57  ;;  %v7041_v62 = vunpack.i.l.bf16 %v7040_v57  ;;  %v9451_v57 = vld [vmem:[#allocation55_spill] sm:$0xff] }
 0x5f4   : >>> { %5769 = vmatmul.mubr.msk.f32.vlgmr.msra.gmra.mrb[0].mxu1 %vm1632_vm2, %v9422_v55  ;;  %v7026_v55 = vunpack.i.l.bf16 %v7025_v13  ;;  %v7050_v53 = vpop.permute.xlu1 %7049 }
 0x5f5   : >>> { %6027 = vmatpush1.bf16.msk.msra.mxu1 %vm8297_vm4, %v6025_v59  ;;  %3825 = vmatprep.mubr.f32.mxu1 %v9326_v7  ;;  %v4040_v59 = vsel %vm9429_vm6, %v7016_v58, %v7017_v1  ;;  %v9437_v1 = vld [vmem:[#allocation47_spill] sm:$0xff]  ;;  %v7045_v58 = vpop.permute.xlu0 %7044  ;;  %vm9439_vm6 = vmmov %vm9436_vm7  ;;  %v7051_v14 = vunpack.i.l.bf16 %v7050_v53 }
 0x5f6   : >>> { %6030 = vmatprep.subr.msk.bf16.mxu1 %vm8285_vm15, %v6028_v52  ;;  %v7027_v52 = vunpack.i.h.bf16 %v7025_v13  ;;  %v6038_v0 = vpack.c.bf16 %v4040_v59, %v4038_v63  ;;  %v9438_v13 = vld [vmem:[#allocation48_spill] sm:$0xff]  ;;  %v7047_v48 = vunpack.i.h.bf16 %v7045_v58  ;;  %v7046_v4 = vunpack.i.l.bf16 %v7045_v58  ;;  %vm9440_vm10 = vmmov %vm9439_vm6 }
 0x5f7   : >>> { %v4182_v59 = vsel %vm9440_vm10, %v7036_v56, %v7026_v55  ;;  %vm9442_vm12 = vmmov %vm9439_vm6 }
 0x5f8   : >>> { %5770 = vmatmul.mubr.msk.f32.gmra.mrb[2].mxu1 %vm1632_vm2, %v9425_v11  ;;  %v4183_v11 = vsel %vm9436_vm7, %v7026_v55, %v7027_v52  ;;  %v9441_v52 = vld [vmem:[#allocation49_spill] sm:$0xff]  ;;  %v4189_v63 = vsel %vm9442_vm12, %v7046_v4, %v7047_v48  ;;  %vm9443_vm14 = vmmov %vm9439_vm6 }
 0x5f9   : >>> { %6033 = vmatpush1.bf16.msk.msra.mxu1 %vm8297_vm4, %v6031_v60  ;;  %3831 = vmatprep.mubr.f32.mxu1 %v9326_v7  ;;  %v9434_v60 = vld [vmem:[#allocation46_spill] sm:$0xff]  ;;  %v6042_v6 = vpack.c.bf16 %v4185_v3, %v4183_v11  ;;  %vm9444_vm13 = vmmov %vm9439_vm6  ;;  %v9448_v3 = vld [vmem:[#allocation52_spill] sm:$0xff] }
 0x5fa   : >>> { %6035 = vmatprep.subr.bf16.mxu1 %v6034_v8  ;;  %v6040_v8 = vpack.c.bf16 %v4039_v51, %v4037_v46  ;;  %v4186_v51 = vsel %vm9444_vm13, %v7051_v14, %v7041_v62  ;;  %vm9445_vm7 = vmmov %vm9439_vm6  ;;  %v9449_v11 = vld [vmem:[#allocation53_spill] sm:$0xff] }
 0x5fb   : >>> { %v9456_v14 = vld [vmem:[#allocation9_spill] sm:$0xff] }
 0x5fc   : >>> { %5771 = vmatmul.mubr.msk.f32.gmra.mrb[4].mxu1 %vm1632_vm2, %v9426_v2  ;;  %v7037_v2 = vunpack.i.h.bf16 %v7035_v10 }
 0x5fd   : >>> { %3837 = vmatprep.mubr.f32.mxu1 %v9326_v7 }
 0x5fe   : >>> { %v4184_v54 = vsel %vm9439_vm6, %v7037_v2, %v7031_v12  ;;  %v9446_v12 = vld [vmem:[#allocation50_spill] sm:$0xff] }
 0x5ff   : >>> { %v6045_v46 = vpack.c.bf16 %v4184_v54, %v4182_v59 }
 0x600   : >>> { %5772 = vmatmul.mubr.msk.f32.gmra.mrb[6].mxu1 %vm1632_vm2, %v9430_v5  ;;  %v7052_v5 = vunpack.i.h.bf16 %v7050_v53  ;;  %v9454_v53 = vld [vmem:[#allocation11_spill] sm:$0xff] }
 0x601   : >>> { %3976 = vmatprep.mubr.f32.mxu1 %v9326_v7 }
 0x602   : >>> { %v4188_v10 = vsel %vm9445_vm7, %v7052_v5, %v7046_v4  ;;  %v9455_v4 = vld [vmem:[#allocation10_spill] sm:$0xff] }
 0x603   : >>> { %v6051_v55 = vpack.c.bf16 %v4188_v10, %v4186_v51 }
 0x604   : >>> { %5781 = vmatmul.mubr.msk.f32.vlgmr.msra.gmra.mrb[0].mxu1 %vm1632_vm2, %v9434_v60 }
 0x605   : >>> { %6037 = vmatpush1.bf16.msra.mxu1 %v6036_v15  ;;  %3982 = vmatprep.mubr.f32.mxu1 %v9326_v7  ;;  %v4187_v15 = vsel %vm9443_vm14, %v7041_v62, %v7042_v9 }
 0x606   : >>> { %6039 = vmatprep.subr.bf16.mxu1 %v6038_v0  ;;  %v6048_v60 = vpack.c.bf16 %v4189_v63, %v4187_v15  ;;  %v9447_v0 = vld [vmem:[#allocation51_spill] sm:$0xff]  ;;  %v9457_v63 = vld [vmem:[#allocation8_spill] sm:$0xff] }
 0x608   : >>> { %5782 = vmatmul.mubr.msk.f32.gmra.mrb[2].mxu1 %vm1632_vm2, %v9437_v1  ;;  %v9453_v1 = vld [vmem:[#allocation57_spill] sm:$0xff] }
 0x609   : >>> { %6041 = vmatpush1.bf16.msra.mxu1 %v6040_v8  ;;  %3988 = vmatprep.mubr.f32.mxu1 %v9326_v7  ;;  %v9450_v8 = vld [vmem:[#allocation54_spill] sm:$0xff] }
 0x60a   : >>> { %6044 = vmatprep.subr.msk.bf16.mxu1 %vm8321_vm1, %v6042_v6  ;;  %v9452_v6 = vld [vmem:[#allocation56_spill] sm:$0xff] }
 0x60c   : >>> { %5783 = vmatmul.mubr.msk.f32.gmra.mrb[4].mxu1 %vm1632_vm2, %v9438_v13 }
 0x60d   : >>> { %3994 = vmatprep.mubr.f32.mxu1 %v9326_v7 }
 0x610   : >>> { %5784 = vmatmul.mubr.msk.f32.gmra.mrb[6].mxu1 %vm1632_vm2, %v9441_v52 }
 0x611   : >>> { %4125 = vmatprep.mubr.f32.mxu1 %v9326_v7 }
 0x614   : >>> { %5785 = vmatmul.mubr.msk.f32.vlgmr.msra.gmra.mrb[0].mxu1 %vm1632_vm2, %v9446_v12 }
 0x615   : >>> { %6047 = vmatpush1.bf16.msk.msra.mxu1 %vm8348_vm0, %v6045_v46  ;;  %4131 = vmatprep.mubr.f32.mxu1 %v9326_v7 }
 0x616   : >>> { %6050 = vmatprep.subr.msk.bf16.mxu1 %vm8321_vm1, %v6048_v60  ;;  %v9458_v60 = vld [vmem:[#allocation7_spill] sm:$0xff] }
 0x618   : >>> { %5786 = vmatmul.mubr.msk.f32.gmra.mrb[2].mxu1 %vm1632_vm2, %v9447_v0 }
 0x619   : >>> { %6053 = vmatpush1.bf16.msk.msra.mxu1 %vm8348_vm0, %v6051_v55  ;;  %4137 = vmatprep.mubr.f32.mxu1 %v9326_v7  ;;  %v9459_v55 = vld [vmem:[#allocation6_spill] sm:$0xff] }
 0x61c   : >>> { %5787 = vmatmul.mubr.msk.f32.gmra.mrb[4].mxu1 %vm1632_vm2, %v9448_v3 }
 0x61d   : >>> { %4143 = vmatprep.mubr.f32.mxu1 %v9326_v7 }
 0x620   : >>> { %5788 = vmatmul.mubr.msk.f32.gmra.mrb[6].mxu1 %vm1632_vm2, %v9449_v11 }
 0x621   : >>> { %4282 = vmatprep.mubr.f32.mxu1 %v9326_v7 }
 0x624   : >>> { %5797 = vmatmul.mubr.msk.f32.vlgmr.msra.gmra.mrb[0].mxu1 %vm1632_vm2, %v9450_v8 }
 0x625   : >>> { %4288 = vmatprep.mubr.f32.mxu1 %v9326_v7 }
 0x628   : >>> { %5798 = vmatmul.mubr.msk.f32.gmra.mrb[2].mxu1 %vm1632_vm2, %v9451_v57 }
 0x629   : >>> { %4294 = vmatprep.mubr.f32.mxu1 %v9326_v7 }
 0x62c   : >>> { %5799 = vmatmul.mubr.msk.f32.gmra.mrb[4].mxu1 %vm1632_vm2, %v9452_v6  ;;  %v9460_v6 = vld [vmem:[#allocation5_spill] sm:$0xff] }
 0x62d   : >>> { %4300 = vmatprep.mubr.f32.mxu1 %v9326_v7 }
 0x630   : >>> { %5800 = vmatmul.mubr.msk.f32.gmra.mrb[6].mxu1 %vm1632_vm2, %v9453_v1 }
 0x6f7   : >>> { %v4284_v58 = vpop.f32.mrb[0].mxu1 }
 0x6f8   : >>> { %v4315_v2 = vmax.f32 %v4284_v58, 0.0  ;;  %v4286_v56 = vpop.f32.mrb[1].mxu1  ;;  %v9461_v58 = vld [vmem:[#allocation4_spill] sm:$0xff] }
 0x6f9   : >>> { %v4316_v13 = vmax.f32 %v4286_v56, 0.0 }
 0x6fa   : >>> { %v4323_v48 = vadd.f32 %v9454_v53, %v4315_v2  }
 0x6fb   : >>> { %v4324_v54 = vadd.f32 %v9455_v4, %v4316_v13   ;;  %v4290_v9 = vpop.f32.mrb[2].mxu1 }
 0x6fc   : >>> { %v4317_v62 = vmax.f32 %v4290_v9, 0.0  ;;  %v4292_v59 = vpop.f32.mrb[3].mxu1  ;;  %v9477_v53 = vmov (%p1516_p4), %v4323_v48 }
 0x6fd   : >>> { %v4318_v5 = vmax.f32 %v4292_v59, 0.0  ;;  %v9476_v56 = vmov (%p1516_p4), %v4324_v54 }
 0x6fe   : >>> { %v4325_v52 = vadd.f32 %v9456_v14, %v4317_v62  }
 0x6ff   : >>> { %v4326_v15 = vadd.f32 %v9457_v63, %v4318_v5   ;;  %v4296_v7 = vpop.f32.mrb[4].mxu1 }
 0x700   : >>> { %v4319_v46 = vmax.f32 %v4296_v7, 0.0  ;;  %v4298_v51 = vpop.f32.mrb[5].mxu1  ;;  %v9475_v59 = vmov (%p1516_p4), %v4325_v52 }
 0x701   : >>> { %v4320_v10 = vmax.f32 %v4298_v51, 0.0  ;;  %v9466_v63 = vmov %v4326_v15  ;;  %v9474_v62 = vmov (%p1516_p4), %v4326_v15 }
 0x702   : >>> { %v4327_v12 = vadd.f32 %v9458_v60, %v4319_v46  }
 0x703   : >>> { %v4328_v3 = vadd.f32 %v9459_v55, %v4320_v10   ;;  %v4302_v0 = vpop.f32.mrb[6].mxu1  ;;  %v9468_v55 = vmov %v4324_v54  ;;  %v9469_v10 = vmov %v4323_v48  ;;  %1518 = sbr.rel (!%p1516_p4) target bundleno = 586 (0x24a), region = 86 }
 0x704   : >>> { %v4321_v11 = vmax.f32 %v4302_v0, 0.0  ;;  %v4304_v8 = vpop.f32.mrb[7].mxu1  ;;  %v9465_v2 = vmov %v4327_v12  ;;  %v9467_v0 = vmov %v4325_v52  ;;  %v9473_v4 = vmov (%p1516_p4), %v4327_v12 }
 0x705   : >>> { %v4322_v57 = vmax.f32 %v4304_v8, 0.0  ;;  %v9464_v9 = vmov %v4328_v3 }
 0x706   : >>> { %v4329_v1 = vadd.f32 %v9460_v6, %v4321_v11   ;;  %v9472_v6 = vmov (%p1516_p4), %v4328_v3 }
 0x707   : >>> { %v4330_v13 = vadd.f32 %v9461_v58, %v4322_v57  }
 0x708   : >>> { %v9463_v7 = vmov %v4329_v1  ;;  %v9471_v8 = vmov (%p1516_p4), %v4329_v1 }
 0x709   : >>> { %v9462_v5 = vmov %v4330_v13  ;;  %v9470_v10 = vmov (%p1516_p4), %v4330_v13 }
 0x70a   : > { %1429 = sbr.rel (!%p1427_p5) target bundleno = 550 (0x226), region = 97  ;;  %v7053_v16 = vpack.i.bf16 (%p1427_p5), %v4324_v54, %v4323_v48  ;;  %v7063_v17 = vpack.i.bf16 (%p1427_p5), %v4328_v3, %v4327_v12  ;;  %v9478_v19 = vmov (%p1427_p5), 0.0   ;;  %v7058_v20 = vpack.i.bf16 (%p1427_p5), %v4326_v15, %v4325_v52  ;;  %v4334_v49 = vld [vmem:[%s9221_s4 + $0xc] sm:$0xf] (%p1427_p5)  ;;  %v4339_v47 = vld [vmem:[%s9221_s4 + $0x20] sm:$0xf] (%p1427_p5) }
 0x70b   : > { %4948 = vmatprep.mubr.f32.mxu0 (%p1427_p5), %v9478_v19  ;;  %4512 = vmatprep.mubr.f32.mxu1 (%p1427_p5), %v9478_v19  ;;  %v7068_v22 = vpack.i.bf16 (%p1427_p5), %v4330_v13, %v4329_v1  ;;  %vm9479_vm3 = vcmask (%p1427_p5), 138240  }
 0x70c   : > { %7054 = vrot.lane.b32.xlu0 (%p1427_p5), %v7053_v16, %s7465_s27  ;;  %7064 = vrot.lane.b32.xlu1 (%p1427_p5), %v7063_v17, %s7465_s27  ;;  %vm9480_vm5 = vmmov (%p1427_p5), %vm9479_vm3 }
 0x70d   : > { %vm9481_vm8 = vmmov (%p1427_p5), %vm9479_vm3 }
 0x70e   : > { %vm9482_vm9 = vmmov (%p1427_p5), %vm9479_vm3 }
 0x70f   : > { %vm9483_vm6 = vmmov (%p1427_p5), %vm9479_vm3 }
 0x710   : > { %7059 = vrot.lane.b32.xlu0 (%p1427_p5), %v7058_v20, %s7465_s27  ;;  %7069 = vrot.lane.b32.xlu1 (%p1427_p5), %v7068_v22, %s7465_s27  ;;  %vm9484_vm10 = vmmov (%p1427_p5), %vm9479_vm3 }
 0x711   : > { %vm9485_vm12 = vmmov %vm9479_vm3 }
 0x712   : > { %vm9486_vm14 = vmmov %vm9479_vm3 }
 0x713   : > { %vm9487_vm13 = vmmov %vm9479_vm3 }
 0x714   : > { %vm9488_vm7 = vmmov %vm9479_vm3 }
 0x77e   : > { %v7055_v23 = vpop.permute.xlu0 %7054  ;;  %v7065_v24 = vpop.permute.xlu1 %7064 }
 0x77f   : > { %v7057_v25 = vunpack.i.h.bf16 %v7055_v23  ;;  %v7056_v26 = vunpack.i.l.bf16 %v7055_v23  ;;  %v7067_v18 = vunpack.i.h.bf16 %v7065_v24  ;;  %v7066_v21 = vunpack.i.l.bf16 %v7065_v24 }
 0x781   : > { %v4384_v34 = vsel %vm9479_vm3, %v7057_v25, 0.0  ;;  %v8954_v35 = vsel %vm9480_vm5, %v7056_v26, %v7057_v25  ;;  %v8958_v37 = vsel %vm9481_vm8, 0.0, %v7056_v26  ;;  %v4386_v38 = vsel %vm9482_vm9, %v7067_v18, 0.0  ;;  %vm9489_vm5 = vmmov %vm9479_vm3 }
 0x782   : > { %v7060_v28 = vpop.permute.xlu0 %7059  ;;  %v7073_v29 = vpack.i.bf16 %v4384_v34, %v8954_v35  ;;  %v7070_v30 = vpop.permute.xlu1 %7069  ;;  %v8962_v39 = vsel %vm9483_vm6, %v7066_v21, %v7067_v18  ;;  %v8984_v53 = vsel %vm9479_vm3, 0.0, %v7066_v21  ;;  %vm9490_vm8 = vcmask 908288  }
 0x783   : > { %v7062_v27 = vunpack.i.h.bf16 %v7060_v28  ;;  %v7061_v31 = vunpack.i.l.bf16 %v7060_v28  ;;  %v7072_v33 = vunpack.i.h.bf16 %v7070_v30  ;;  %v7071_v36 = vunpack.i.l.bf16 %v7070_v30  ;;  %vm9491_vm9 = vmmov %vm9490_vm8 }
 0x784   : > { %7074 = vrot.lane.b32.xlu0 %v7073_v29, %s7468_s29  ;;  %v7088_v2 = vpack.i.bf16 %v4386_v38, %v8962_v39  ;;  %vm9492_vm6 = vmmov %vm9490_vm8  ;;  %vm9498_vm3 = vcmask 1039360  }
 0x785   : > { %v4385_v32 = vsel %vm9484_vm10, %v7062_v27, 0.0  ;;  %v8967_v40 = vsel %vm9485_vm12, %v7061_v31, %v7062_v27  ;;  %v8970_v41 = vsel %vm9486_vm14, 0.0, %v7061_v31  ;;  %v4387_v42 = vsel %vm9487_vm13, %v7072_v33, 0.0  ;;  %vm9493_vm10 = vmmov %vm9492_vm6 }
 0x786   : > { %v8974_v43 = vsel %vm9488_vm7, %v7071_v36, %v7072_v33  ;;  %v7078_v44 = vpack.i.bf16 %v4385_v32, %v8967_v40  ;;  %v7083_v45 = vpack.i.bf16 %v8970_v41, %v8958_v37  ;;  %v8987_v48 = vsel %vm9489_vm5, 0.0, %v7071_v36  ;;  %vm9494_vm12 = vmmov %vm9492_vm6  ;;  %v4335_v33 = vld [vmem:[%s9221_s4 + $0x10] sm:$0xf] }
 0x787   : > { %v7093_v56 = vpack.i.bf16 %v4387_v42, %v8974_v43  ;;  %v7098_v4 = vpack.i.bf16 %v8987_v48, %v8984_v53  ;;  %v6062_v54 = vpack.c.bf16 %v8967_v40, %v8954_v35  ;;  %v6065_v9 = vpack.c.bf16 %v8970_v41, %v8958_v37  ;;  %vm9495_vm14 = vmmov %vm9492_vm6  ;;  %v4336_v35 = vld [vmem:[%s9221_s4 + $0x14] sm:$0xf] }
 0x788   : > { %7079 = vrot.lane.b32.xlu1 %v7078_v44, %s7468_s29  ;;  %7084 = vrot.lane.b32.xlu0 %v7083_v45, %s7468_s29  ;;  %v6068_v62 = vpack.c.bf16 %v8974_v43, %v8962_v39  ;;  %v6071_v59 = vpack.c.bf16 %v8987_v48, %v8984_v53  ;;  %vm9496_vm13 = vmmov %vm9492_vm6  ;;  %v4331_v39 = vld [vmem:[%s9221_s4] sm:$0xf] }
 0x789   : > { %vm9497_vm7 = vmmov %vm9492_vm6 }
 0x78a   : > { %vm9499_vm5 = vmmov %vm9498_vm3 }
 0x78c   : > { %7089 = vrot.lane.b32.xlu1 %v7088_v2, %s7468_s29  ;;  %7094 = vrot.lane.b32.xlu0 %v7093_v56, %s7468_s29 }
 0x790   : > { %7099 = vrot.lane.b32.xlu1 %v7098_v4, %s7468_s29  ;;  %7104 = vrot.lane.b32.xlu0 %v7073_v29, %s7467_s28 }
 0x794   : > { %7109 = vrot.lane.b32.xlu1 %v7078_v44, %s7467_s28  ;;  %7114 = vrot.lane.b32.xlu0 %v7073_v29, %s7469_s30 }
 0x798   : > { %7119 = vrot.lane.b32.xlu1 %v7078_v44, %s7469_s30  ;;  %7124 = vrot.lane.b32.xlu0 %v7083_v45, %s7467_s28 }
 0x79c   : > { %7129 = vrot.lane.b32.xlu1 %v7083_v45, %s7469_s30  ;;  %7134 = vrot.lane.b32.xlu0 %v7088_v2, %s7467_s28 }
 0x7a0   : > { %7139 = vrot.lane.b32.xlu1 %v7093_v56, %s7467_s28  ;;  %7144 = vrot.lane.b32.xlu0 %v7088_v2, %s7469_s30 }
 0x7a4   : > { %7149 = vrot.lane.b32.xlu1 %v7093_v56, %s7469_s30  ;;  %7154 = vrot.lane.b32.xlu0 %v7098_v4, %s7467_s28 }
 0x7a8   : > { %7159 = vrot.lane.b32.xlu1 %v7098_v4, %s7469_s30  ;;  %7164 = vrot.lane.b32.xlu0 %v7073_v29, %s7470_s6 }
 0x7ac   : > { %7169 = vrot.lane.b32.xlu1 %v7078_v44, %s7470_s6  ;;  %7174 = vrot.lane.b32.xlu0 %v7083_v45, %s7470_s6 }
 0x7b0   : > { %7179 = vrot.lane.b32.xlu1 %v7088_v2, %s7470_s6  ;;  %7184 = vrot.lane.b32.xlu0 %v7093_v56, %s7470_s6 }
 0x7b4   : > { %7189 = vrot.lane.b32.xlu1 %v7098_v4, %s7470_s6  ;;  %7194 = vrot.lane.b32.xlu0 %v7073_v29, %s7471_s7 }
 0x7b8   : > { %7199 = vrot.lane.b32.xlu1 %v7078_v44, %s7471_s7  ;;  %7204 = vrot.lane.b32.xlu0 %v7073_v29, %s7472_s8 }
 0x7bc   : > { %7209 = vrot.lane.b32.xlu1 %v7078_v44, %s7472_s8  ;;  %7214 = vrot.lane.b32.xlu0 %v7083_v45, %s7471_s7 }
 0x7c0   : > { %7219 = vrot.lane.b32.xlu1 %v7083_v45, %s7472_s8  ;;  %7224 = vrot.lane.b32.xlu0 %v7088_v2, %s7471_s7 }
 0x7c4   : > { %7229 = vrot.lane.b32.xlu1 %v7093_v56, %s7471_s7  ;;  %7234 = vrot.lane.b32.xlu0 %v7088_v2, %s7472_s8 }
 0x7c8   : > { %7239 = vrot.lane.b32.xlu1 %v7093_v56, %s7472_s8  ;;  %7244 = vrot.lane.b32.xlu0 %v7098_v4, %s7471_s7 }
 0x7cc   : > { %7249 = vrot.lane.b32.xlu1 %v7098_v4, %s7472_s8  ;;  %7254 = vrot.lane.b32.xlu0 %v7073_v29, %s7473_s9 }
 0x7d0   : > { %7259 = vrot.lane.b32.xlu1 %v7078_v44, %s7473_s9  ;;  %7264 = vrot.lane.b32.xlu0 %v7073_v29, %s7474_s10 }
 0x7d4   : > { %7269 = vrot.lane.b32.xlu1 %v7078_v44, %s7474_s10  ;;  %7274 = vrot.lane.b32.xlu0 %v7083_v45, %s7473_s9 }
 0x7d8   : > { %7279 = vrot.lane.b32.xlu1 %v7083_v45, %s7474_s10  ;;  %7284 = vrot.lane.b32.xlu0 %v7088_v2, %s7473_s9 }
 0x7dc   : > { %7289 = vrot.lane.b32.xlu1 %v7093_v56, %s7473_s9  ;;  %7294 = vrot.lane.b32.xlu0 %v7088_v2, %s7474_s10 }
 0x7e0   : > { %7299 = vrot.lane.b32.xlu1 %v7093_v56, %s7474_s10  ;;  %7304 = vrot.lane.b32.xlu0 %v7098_v4, %s7473_s9 }
 0x7e4   : > { %7309 = vrot.lane.b32.xlu1 %v7098_v4, %s7474_s10 }
 0x7f6   : > { %v7075_v5 = vpop.permute.xlu0 %7074 }
 0x7f7   : > { %v7077_v14 = vunpack.i.h.bf16 %v7075_v5  ;;  %v7076_v52 = vunpack.i.l.bf16 %v7075_v5 }
 0x7f9   : > { %v4866_v60 = vsel %vm9490_vm8, %v7076_v52, %v7077_v14  ;;  %vm9500_vm8 = vcmask 900096  }
 0x7fa   : > { %v7080_v63 = vpop.permute.xlu1 %7079  ;;  %v7085_v15 = vpop.permute.xlu0 %7084 }
 0x7fb   : > { %v7082_v7 = vunpack.i.h.bf16 %v7080_v63  ;;  %v7081_v46 = vunpack.i.l.bf16 %v7080_v63  ;;  %v7087_v51 = vunpack.i.h.bf16 %v7085_v15  ;;  %v7086_v10 = vunpack.i.l.bf16 %v7085_v15 }
 0x7fd   : > { %v4868_v12 = vsel %vm9491_vm9, %v7081_v46, %v7082_v7  ;;  %v4865_v55 = vsel %vm9492_vm6, %v7086_v10, %v7076_v52  ;;  %v4867_v3 = vsel %vm9493_vm10, %v7087_v51, %v7081_v46  ;;  %vm9501_vm9 = vmmov %vm9500_vm8 }
 0x7fe   : > { %v7090_v0 = vpop.permute.xlu1 %7089  ;;  %v7095_v11 = vpop.permute.xlu0 %7094  ;;  %v6098_v8 = vpack.c.bf16 %v4868_v12, %v4866_v60  ;;  %v6100_v57 = vpack.c.bf16 %v4867_v3, %v4865_v55  ;;  %vm9502_vm6 = vmmov %vm9498_vm3 }
 0x7ff   : > { %v7092_v6 = vunpack.i.h.bf16 %v7090_v0  ;;  %v7091_v1 = vunpack.i.l.bf16 %v7090_v0  ;;  %v7097_v58 = vunpack.i.h.bf16 %v7095_v11  ;;  %v7096_v13 = vunpack.i.l.bf16 %v7095_v11  ;;  %vm9503_vm10 = vmmov %vm9498_vm3 }
 0x800   : > { %6099 = vmatprep.subr.bf16.mxu0 %v6098_v8 }
 0x801   : > { %v4870_v16 = vsel %vm9494_vm12, %v7091_v1, %v7092_v6  ;;  %v4872_v17 = vsel %vm9495_vm14, %v7096_v13, %v7097_v58  ;;  %6101 = vmatpush1.bf16.msra.mxu0 %v6100_v57  ;;  %vm9504_vm12 = vmmov %vm9500_vm8 }
 0x802   : > { %v7100_v20 = vpop.permute.xlu1 %7099  ;;  %v7105_v22 = vpop.permute.xlu0 %7104  ;;  %v6102_v23 = vpack.c.bf16 %v4872_v17, %v4870_v16  ;;  %vm9505_vm14 = vmmov %vm9500_vm8 }
 0x803   : > { %v7102_v24 = vunpack.i.h.bf16 %v7100_v20  ;;  %v7101_v25 = vunpack.i.l.bf16 %v7100_v20  ;;  %v7107_v21 = vunpack.i.h.bf16 %v7105_v22  ;;  %v7106_v34 = vunpack.i.l.bf16 %v7105_v22 }
 0x804   : > { %6103 = vmatprep.subr.bf16.mxu0 %v6102_v23 }
 0x805   : > { %v4869_v26 = vsel %vm9496_vm13, %v7101_v25, %v7091_v1  ;;  %v4871_v18 = vsel %vm9497_vm7, %v7102_v24, %v7096_v13  ;;  %v4429_v32 = vsel %vm9498_vm3, %v7106_v34, %v7107_v21  ;;  %vm9506_vm13 = vmmov %vm9498_vm3 }
 0x806   : > { %v7110_v28 = vpop.permute.xlu1 %7109  ;;  %v7115_v29 = vpop.permute.xlu0 %7114  ;;  %v6104_v30 = vpack.c.bf16 %v4871_v18, %v4869_v26  ;;  %vm9507_vm7 = vmmov %vm9498_vm3 }
 0x807   : > { %v7112_v27 = vunpack.i.h.bf16 %v7110_v28  ;;  %v7111_v31 = vunpack.i.l.bf16 %v7110_v28  ;;  %v7117_v36 = vunpack.i.h.bf16 %v7115_v29  ;;  %v7116_v38 = vunpack.i.l.bf16 %v7115_v29  ;;  %vm9508_vm3 = vmmov %vm9500_vm8 }
 0x808   : > { %6105 = vmatpush1.bf16.msra.mxu0 %v6104_v30 }
 0x809   : > { %v4431_v42 = vsel %vm9499_vm5, %v7111_v31, %v7112_v27  ;;  %v4982_v52 = vsel %vm9500_vm8, %v7116_v38, %v7117_v36  ;;  %vm9509_vm5 = vmmov %vm9508_vm3 }
 0x80a   : > { %v7120_v44 = vpop.permute.xlu1 %7119  ;;  %v7125_v45 = vpop.permute.xlu0 %7124  ;;  %v6054_v2 = vpack.c.bf16 %v4431_v42, %v4429_v32  ;;  %vm9510_vm8 = vmmov %vm9502_vm6 }
 0x80b   : > { %v7122_v56 = vunpack.i.h.bf16 %v7120_v44  ;;  %v7121_v4 = vunpack.i.l.bf16 %v7120_v44  ;;  %v7127_v5 = vunpack.i.h.bf16 %v7125_v45  ;;  %v7126_v14 = vunpack.i.l.bf16 %v7125_v45  ;;  %5829 = vmatmul.mubr.msk.f32.vlgmr.msra.gmra.mrb[0].mxu0 %vm1632_vm2, %v4335_v33 }
 0x80c   : > { %6055 = vmatprep.subr.bf16.mxu1 %v6054_v2  ;;  %5072 = vmatprep.mubr.f32.mxu0 %v9478_v19  ;;  %v4332_v2 = vld [vmem:[%s9221_s4 + $0x4] sm:$0xf] }
 0x80d   : > { %v4984_v63 = vsel %vm9501_vm9, %v7121_v4, %v7122_v56  ;;  %v4428_v15 = vsel %vm9502_vm6, %v7126_v14, %v7106_v34  ;;  %v4430_v7 = vsel %vm9503_vm10, %v7127_v5, %v7111_v31  ;;  %vm9511_vm9 = vmmov %vm9502_vm6 }
 0x80e   : > { %v7130_v46 = vpop.permute.xlu1 %7129  ;;  %v7135_v51 = vpop.permute.xlu0 %7134  ;;  %v6056_v10 = vpack.c.bf16 %v4430_v7, %v4428_v15  ;;  %v6106_v60 = vpack.c.bf16 %v4984_v63, %v4982_v52  ;;  %vm9512_vm6 = vmmov %vm9508_vm3 }
 0x80f   : > { %v7132_v12 = vunpack.i.h.bf16 %v7130_v46  ;;  %v7131_v55 = vunpack.i.l.bf16 %v7130_v46  ;;  %v7137_v11 = vunpack.i.h.bf16 %v7135_v51  ;;  %v7136_v8 = vunpack.i.l.bf16 %v7135_v51  ;;  %vm9513_vm10 = vmmov %vm9508_vm3 }
 0x810   : > { %6057 = vmatpush1.bf16.msra.mxu1 %v6056_v10  ;;  %6108 = vmatprep.subr.msk.bf16.mxu0 %vm8321_vm1, %v6106_v60 }
 0x811   : > { %v4983_v3 = vsel %vm9504_vm12, %v7132_v12, %v7121_v4  ;;  %v4981_v0 = vsel %vm9505_vm14, %v7131_v55, %v7116_v38  ;;  %v4433_v16 = vsel %vm9506_vm13, %v7136_v8, %v7137_v11  ;;  %vm9514_vm12 = vcmask 785408  }
 0x812   : > { %v6109_v57 = vpack.c.bf16 %v4983_v3, %v4981_v0  ;;  %v7140_v6 = vpop.permute.xlu1 %7139  ;;  %v7145_v1 = vpop.permute.xlu0 %7144  ;;  %vm9515_vm14 = vmmov %vm9514_vm12 }
 0x813   : > { %v7142_v58 = vunpack.i.h.bf16 %v7140_v6  ;;  %v7141_v13 = vunpack.i.l.bf16 %v7140_v6  ;;  %v7147_v20 = vunpack.i.h.bf16 %v7145_v1  ;;  %v7146_v22 = vunpack.i.l.bf16 %v7145_v1  ;;  %vm9516_vm13 = vmmov %vm9514_vm12 }
 0x814   : > { %6111 = vmatpush1.bf16.msk.msra.mxu0 %vm8348_vm0, %v6109_v57 }
 0x815   : > { %v4435_v17 = vsel %vm9507_vm7, %v7141_v13, %v7142_v58  ;;  %v4986_v28 = vsel %vm9508_vm3, %v7146_v22, %v7147_v20  ;;  %vm9517_vm7 = vmmov %vm9514_vm12 }
 0x816   : > { %v7150_v23 = vpop.permute.xlu1 %7149  ;;  %v7155_v24 = vpop.permute.xlu0 %7154  ;;  %v6058_v25 = vpack.c.bf16 %v4435_v17, %v4433_v16  ;;  %vm9518_vm3 = vmmov %vm9517_vm7 }
 0x817   : > { %v7152_v26 = vunpack.i.h.bf16 %v7150_v23  ;;  %v7151_v18 = vunpack.i.l.bf16 %v7150_v23  ;;  %v7157_v21 = vunpack.i.h.bf16 %v7155_v24  ;;  %v7156_v34 = vunpack.i.l.bf16 %v7155_v24  ;;  %v4337_v23 = vld [vmem:[%s9221_s4 + $0x18] sm:$0xf] }
 0x818   : > { %6059 = vmatprep.subr.bf16.mxu1 %v6058_v25 }
 0x819   : > { %v4988_v29 = vsel %vm9509_vm5, %v7151_v18, %v7152_v26  ;;  %v4434_v30 = vsel %vm9510_vm8, %v7157_v21, %v7141_v13  ;;  %v4432_v27 = vsel %vm9511_vm9, %v7156_v34, %v7136_v8  ;;  %vm9519_vm5 = vmmov %vm9518_vm3 }
 0x81a   : > { %v7160_v31 = vpop.permute.xlu1 %7159  ;;  %v7165_v33 = vpop.permute.xlu0 %7164  ;;  %v6060_v36 = vpack.c.bf16 %v4434_v30, %v4432_v27  ;;  %v6112_v38 = vpack.c.bf16 %v4988_v29, %v4986_v28  ;;  %vm9520_vm8 = vmmov %vm9518_vm3 }
 0x81b   : > { %v7162_v32 = vunpack.i.h.bf16 %v7160_v31  ;;  %v7161_v42 = vunpack.i.l.bf16 %v7160_v31  ;;  %v7167_v44 = vunpack.i.h.bf16 %v7165_v33  ;;  %v7166_v45 = vunpack.i.l.bf16 %v7165_v33  ;;  %vm9521_vm9 = vmmov %vm9518_vm3 }
 0x81c   : > { %6061 = vmatpush1.bf16.msra.mxu1 %v6060_v36  ;;  %6114 = vmatprep.subr.msk.bf16.mxu0 %vm8321_vm1, %v6112_v38 }
 0x81d   : > { %v4985_v56 = vsel %vm9512_vm6, %v7161_v42, %v7146_v22  ;;  %v4987_v4 = vsel %vm9513_vm10, %v7162_v32, %v7151_v18  ;;  %6064 = vmatprep.subr.msk.bf16.mxu1 %vm8285_vm15, %v6062_v54  ;;  %v5106_v51 = vsel %vm9514_vm12, %v7166_v45, %v7167_v44  ;;  %vm9522_vm6 = vcmask 777216  }
 0x81e   : > { %v6115_v5 = vpack.c.bf16 %v4987_v4, %v4985_v56  ;;  %v7170_v14 = vpop.permute.xlu1 %7169  ;;  %v7175_v52 = vpop.permute.xlu0 %7174  ;;  %vm9523_vm10 = vmmov %vm9522_vm6 }
 0x81f   : > { %v7172_v63 = vunpack.i.h.bf16 %v7170_v14  ;;  %v7171_v15 = vunpack.i.l.bf16 %v7170_v14  ;;  %v7177_v7 = vunpack.i.h.bf16 %v7175_v52  ;;  %v7176_v46 = vunpack.i.l.bf16 %v7175_v52  ;;  %5801 = vmatmul.mubr.msk.f32.vlgmr.msra.gmra.mrb[0].mxu1 %vm1632_vm2, %v4332_v2  ;;  %vm9524_vm12 = vmmov %vm9522_vm6 }
 0x820   : > { %6067 = vmatpush1.bf16.msk.msra.mxu1 %vm8297_vm4, %v6065_v9  ;;  %6117 = vmatpush1.bf16.msk.msra.mxu0 %vm8348_vm0, %v6115_v5 }
 0x821   : > { %v5108_v40 = vsel %vm9515_vm14, %v7171_v15, %v7172_v63  ;;  %v5107_v54 = vsel %vm9516_vm13, %v7177_v7, %v7171_v15  ;;  %v5105_v10 = vsel %vm9517_vm7, %v7176_v46, %v7166_v45  ;;  %6070 = vmatprep.subr.msk.bf16.mxu1 %vm8285_vm15, %v6068_v62  ;;  %4586 = vmatprep.mubr.f32.mxu1 %v9478_v19  ;;  %vm9525_vm14 = vmmov %vm9522_vm6 }
 0x822   : > { %v6121_v37 = vpack.c.bf16 %v5107_v54, %v5105_v10  ;;  %v7180_v41 = vpop.permute.xlu1 %7179  ;;  %v7185_v9 = vpop.permute.xlu0 %7184  ;;  %v6118_v60 = vpack.c.bf16 %v5108_v40, %v5106_v51  ;;  %vm9526_vm13 = vmmov %vm9522_vm6 }
 0x823   : > { %v7182_v12 = vunpack.i.h.bf16 %v7180_v41  ;;  %v7181_v55 = vunpack.i.l.bf16 %v7180_v41  ;;  %v7187_v3 = vunpack.i.h.bf16 %v7185_v9  ;;  %v7186_v0 = vunpack.i.l.bf16 %v7185_v9  ;;  %5838 = vmatmul.mubr.msk.f32.vlgmr.msra.gmra.mrb[0].mxu0 %vm1632_vm2, %v4336_v35  ;;  %vm9527_vm7 = vmmov %vm9522_vm6 }
 0x824   : > { %6073 = vmatpush1.bf16.msk.msra.mxu1 %vm8297_vm4, %v6071_v59  ;;  %6120 = vmatprep.subr.msk.bf16.mxu0 %vm8285_vm15, %v6118_v60 }
 0x825   : > { %v5110_v43 = vsel %vm9518_vm3, %v7181_v55, %v7182_v12  ;;  %v5112_v62 = vsel %vm9519_vm5, %v7186_v0, %v7187_v3  ;;  %6123 = vmatpush1.bf16.msk.msra.mxu0 %vm8297_vm4, %v6121_v37  ;;  %5196 = vmatprep.mubr.f32.mxu0 %v9478_v19  ;;  %vm9528_vm3 = vmmov %vm9522_vm6 }
 0x826   : > { %v7190_v53 = vpop.permute.xlu1 %7189  ;;  %v7195_v48 = vpop.permute.xlu0 %7194  ;;  %v6124_v11 = vpack.c.bf16 %v5112_v62, %v5110_v43  ;;  %vm9529_vm5 = vmmov %vm9528_vm3 }
 0x827   : > { %v7192_v59 = vunpack.i.h.bf16 %v7190_v53  ;;  %v7191_v8 = vunpack.i.l.bf16 %v7190_v53  ;;  %5810 = vmatmul.mubr.msk.f32.vlgmr.msra.gmra.mrb[0].mxu1 %vm1632_vm2, %v4331_v39  ;;  %v7197_v1 = vunpack.i.h.bf16 %v7195_v48  ;;  %v7196_v58 = vunpack.i.l.bf16 %v7195_v48 }
 0x828   : > { %6126 = vmatprep.subr.msk.bf16.mxu0 %vm8285_vm15, %v6124_v11  ;;  %4708 = vmatprep.mubr.f32.mxu1 %v9478_v19 }
 0x829   : > { %v5109_v57 = vsel %vm9520_vm8, %v7191_v8, %v7181_v55  ;;  %v5111_v6 = vsel %vm9521_vm9, %v7192_v59, %v7186_v0  ;;  %v4618_v24 = vsel %vm547_vm11, %v7196_v58, %v7197_v1  ;;  %v4333_v1 = vld [vmem:[%s9221_s4 + $0x8] sm:$0xf]  ;;  %vm9532_vm9 = vcmask 769024  }
 0x82a   : > { %v6127_v13 = vpack.c.bf16 %v5111_v6, %v5109_v57  ;;  %v7200_v16 = vpop.permute.xlu1 %7199  ;;  %v7205_v17 = vpop.permute.xlu0 %7204 }
 0x82b   : > { %v7202_v20 = vunpack.i.h.bf16 %v7200_v16  ;;  %v7201_v22 = vunpack.i.l.bf16 %v7200_v16  ;;  %v7207_v26 = vunpack.i.h.bf16 %v7205_v17  ;;  %v7206_v18 = vunpack.i.l.bf16 %v7205_v17 }
 0x82c   : > { %6129 = vmatpush1.bf16.msk.msra.mxu0 %vm8297_vm4, %v6127_v13 }
 0x82d   : > { %v4620_v25 = vsel %vm547_vm11, %v7201_v22, %v7202_v20  ;;  %v5230_v33 = vsel %vm9522_vm6, %v7206_v18, %v7207_v26  ;;  %v4338_v26 = vld [vmem:[%s9221_s4 + $0x1c] sm:$0xf]  ;;  %vm9533_vm6 = vmmov %vm9532_vm9 }
 0x82e   : > { %v7210_v21 = vpop.permute.xlu1 %7209  ;;  %v7215_v34 = vpop.permute.xlu0 %7214  ;;  %v6074_v28 = vpack.c.bf16 %v4620_v25, %v4618_v24 }
 0x82f   : > { %v7212_v29 = vunpack.i.h.bf16 %v7210_v21  ;;  %v7211_v30 = vunpack.i.l.bf16 %v7210_v21  ;;  %v7217_v27 = vunpack.i.h.bf16 %v7215_v34  ;;  %v7216_v31 = vunpack.i.l.bf16 %v7215_v34  ;;  %5847 = vmatmul.mubr.msk.f32.vlgmr.msra.gmra.mrb[0].mxu0 %vm1632_vm2, %v4337_v23 }
 0x830   : > { %6076 = vmatprep.subr.msk.bf16.mxu1 %vm8321_vm1, %v6074_v28  ;;  %5312 = vmatprep.mubr.f32.mxu0 %v9478_v19 }
 0x831   : > { %v5232_v36 = vsel %vm9523_vm10, %v7211_v30, %v7212_v29  ;;  %v4619_v38 = vsel %vm547_vm11, %v7217_v27, %v7201_v22  ;;  %v4617_v32 = vsel %vm547_vm11, %v7216_v31, %v7196_v58 }
 0x832   : > { %v6077_v42 = vpack.c.bf16 %v4619_v38, %v4617_v32  ;;  %v7220_v44 = vpop.permute.xlu1 %7219  ;;  %v7225_v45 = vpop.permute.xlu0 %7224  ;;  %v6130_v2 = vpack.c.bf16 %v5232_v36, %v5230_v33 }
 0x833   : > { %v7222_v56 = vunpack.i.h.bf16 %v7220_v44  ;;  %v7221_v4 = vunpack.i.l.bf16 %v7220_v44  ;;  %v7227_v52 = vunpack.i.h.bf16 %v7225_v45  ;;  %v7226_v63 = vunpack.i.l.bf16 %v7225_v45 }
 0x834   : > { %6079 = vmatpush1.bf16.msk.msra.mxu1 %vm8348_vm0, %v6077_v42  ;;  %6131 = vmatprep.subr.bf16.mxu0 %v6130_v2 }
 0x835   : > { %v5229_v5 = vsel %vm9524_vm12, %v7221_v4, %v7206_v18  ;;  %v5231_v14 = vsel %vm9525_vm14, %v7222_v56, %v7211_v30  ;;  %v4622_v40 = vsel %vm547_vm11, %v7226_v63, %v7227_v52  ;;  %vm9536_vm14 = vmmov %vm9533_vm6 }
 0x836   : > { %v6132_v15 = vpack.c.bf16 %v5231_v14, %v5229_v5  ;;  %v7230_v7 = vpop.permute.xlu1 %7229  ;;  %v7235_v46 = vpop.permute.xlu0 %7234 }
 0x837   : > { %v7232_v51 = vunpack.i.h.bf16 %v7230_v7  ;;  %v7231_v35 = vunpack.i.l.bf16 %v7230_v7  ;;  %v7237_v10 = vunpack.i.h.bf16 %v7235_v46  ;;  %v7236_v37 = vunpack.i.l.bf16 %v7235_v46 }
 0x838   : > { %6133 = vmatpush1.bf16.msra.mxu0 %v6132_v15 }
 0x839   : > { %v4624_v54 = vsel %vm547_vm11, %v7231_v35, %v7232_v51  ;;  %v5234_v39 = vsel %vm9526_vm13, %v7236_v37, %v7237_v10  ;;  %vm9537_vm13 = vmmov %vm9533_vm6 }
 0x83a   : > { %v7240_v41 = vpop.permute.xlu1 %7239  ;;  %v7245_v9 = vpop.permute.xlu0 %7244  ;;  %v6080_v60 = vpack.c.bf16 %v4624_v54, %v4622_v40 }
 0x83b   : > { %v7242_v12 = vunpack.i.h.bf16 %v7240_v41  ;;  %v7241_v55 = vunpack.i.l.bf16 %v7240_v41  ;;  %v7247_v3 = vunpack.i.h.bf16 %v7245_v9  ;;  %v7246_v0 = vunpack.i.l.bf16 %v7245_v9 }
 0x83c   : > { %6082 = vmatprep.subr.msk.bf16.mxu1 %vm8321_vm1, %v6080_v60 }
 0x83d   : > { %v5236_v43 = vsel %vm9527_vm7, %v7241_v55, %v7242_v12  ;;  %v4623_v62 = vsel %vm547_vm11, %v7247_v3, %v7231_v35  ;;  %v4621_v53 = vsel %vm547_vm11, %v7246_v0, %v7226_v63  ;;  %vm9530_vm11 = vcmask 916480  }
 0x83e   : > { %v6083_v48 = vpack.c.bf16 %v4623_v62, %v4621_v53  ;;  %v7250_v11 = vpop.permute.xlu1 %7249  ;;  %v7255_v59 = vpop.permute.xlu0 %7254  ;;  %v6134_v8 = vpack.c.bf16 %v5236_v43, %v5234_v39  ;;  %vm9531_vm8 = vmmov %vm9530_vm11 }
 0x83f   : > { %v7252_v57 = vunpack.i.h.bf16 %v7250_v11  ;;  %v7251_v6 = vunpack.i.l.bf16 %v7250_v11  ;;  %v7257_v16 = vunpack.i.h.bf16 %v7255_v59  ;;  %v7256_v17 = vunpack.i.l.bf16 %v7255_v59  ;;  %vm9534_vm10 = vmmov %vm9531_vm8 }
 0x840   : > { %6085 = vmatpush1.bf16.msk.msra.mxu1 %vm8348_vm0, %v6083_v48  ;;  %6135 = vmatprep.subr.bf16.mxu0 %v6134_v8  ;;  %vm9535_vm12 = vmmov %vm9531_vm8 }
 0x841   : > { %v5233_v58 = vsel %vm9528_vm3, %v7251_v6, %v7236_v37  ;;  %v5235_v13 = vsel %vm9529_vm5, %v7252_v57, %v7241_v55  ;;  %v4742_v18 = vsel %vm9530_vm11, %v7256_v17, %v7257_v16  ;;  %vm9538_vm7 = vmmov %vm9531_vm8 }
 0x842   : > { %v6136_v20 = vpack.c.bf16 %v5235_v13, %v5233_v58  ;;  %v7260_v22 = vpop.permute.xlu1 %7259  ;;  %v7265_v23 = vpop.permute.xlu0 %7264  ;;  %vm9539_vm3 = vmmov %vm9538_vm7 }
 0x843   : > { %v7262_v24 = vunpack.i.h.bf16 %v7260_v22  ;;  %v7261_v25 = vunpack.i.l.bf16 %v7260_v22  ;;  %5819 = vmatmul.mubr.msk.f32.vlgmr.msra.gmra.mrb[0].mxu1 %vm1632_vm2, %v4333_v1  ;;  %v7267_v34 = vunpack.i.h.bf16 %v7265_v23  ;;  %v7266_v28 = vunpack.i.l.bf16 %v7265_v23  ;;  %vm9540_vm5 = vmmov %vm9533_vm6 }
 0x844   : > { %6137 = vmatpush1.bf16.msra.mxu0 %v6136_v20  ;;  %4832 = vmatprep.mubr.f32.mxu1 %v9478_v19  ;;  %vm9541_vm11 = vmmov %vm9540_vm5 }
 0x845   : > { %v4744_v21 = vsel %vm9531_vm8, %v7261_v25, %v7262_v24  ;;  %v5346_v32 = vsel %vm9532_vm9, %v7266_v28, %v7267_v34  ;;  %vm9542_vm8 = vmmov %vm9539_vm3 }
 0x846   : > { %v7270_v29 = vpop.permute.xlu1 %7269  ;;  %v7275_v30 = vpop.permute.xlu0 %7274  ;;  %v6086_v27 = vpack.c.bf16 %v4744_v21, %v4742_v18  ;;  %vm9543_vm9 = vmmov %vm9539_vm3  ;;  %v9547_v18 = vld [vmem:[#allocation3_spill] sm:$0xff] }
 0x847   : > { %v7272_v31 = vunpack.i.h.bf16 %v7270_v29  ;;  %v7271_v33 = vunpack.i.l.bf16 %v7270_v29  ;;  %v7277_v36 = vunpack.i.h.bf16 %v7275_v30  ;;  %v7276_v38 = vunpack.i.l.bf16 %v7275_v30  ;;  %5848 = vmatmul.mubr.msk.f32.vlgmr.msra.gmra.mrb[0].mxu0 %vm1632_vm2, %v4338_v26 }
 0x848   : > { %6088 = vmatprep.subr.msk.bf16.mxu1 %vm8285_vm15, %v6086_v27  ;;  %5436 = vmatprep.mubr.f32.mxu0 %v9478_v19 }
 0x849   : > { %v5348_v42 = vsel %vm9533_vm6, %v7271_v33, %v7272_v31  ;;  %v4743_v44 = vsel %vm9534_vm10, %v7277_v36, %v7261_v25  ;;  %v4741_v45 = vsel %vm9535_vm12, %v7276_v38, %v7256_v17  ;;  %vm9545_vm6 = vmmov %vm9540_vm5  ;;  %v9546_v25 = vld [vmem:[#allocation2_spill] sm:$0xff] }
 0x84a   : > { %v6089_v2 = vpack.c.bf16 %v4743_v44, %v4741_v45  ;;  %v7280_v56 = vpop.permute.xlu1 %7279  ;;  %v7285_v4 = vpop.permute.xlu0 %7284  ;;  %v6138_v5 = vpack.c.bf16 %v5348_v42, %v5346_v32 }
 0x84b   : > { %v7282_v14 = vunpack.i.h.bf16 %v7280_v56  ;;  %v7281_v52 = vunpack.i.l.bf16 %v7280_v56  ;;  %v7287_v15 = vunpack.i.h.bf16 %v7285_v4  ;;  %v7286_v7 = vunpack.i.l.bf16 %v7285_v4 }
 0x84c   : > { %6091 = vmatpush1.bf16.msk.msra.mxu1 %vm8297_vm4, %v6089_v2  ;;  %6140 = vmatprep.subr.msk.bf16.mxu0 %vm8321_vm1, %v6138_v5 }
 0x84d   : > { %v5345_v19 = vsel %vm9536_vm14, %v7281_v52, %v7266_v28  ;;  %v5347_v63 = vsel %vm9537_vm13, %v7282_v14, %v7271_v33  ;;  %v4746_v10 = vsel %vm9538_vm7, %v7286_v7, %v7287_v15 }
 0x84e   : > { %v6141_v46 = vpack.c.bf16 %v5347_v63, %v5345_v19  ;;  %v7290_v51 = vpop.permute.xlu1 %7289  ;;  %v7295_v35 = vpop.permute.xlu0 %7294 }
 0x84f   : > { %v7292_v40 = vunpack.i.h.bf16 %v7290_v51  ;;  %v7291_v54 = vunpack.i.l.bf16 %v7290_v51  ;;  %v7297_v41 = vunpack.i.h.bf16 %v7295_v35  ;;  %v7296_v9 = vunpack.i.l.bf16 %v7295_v35 }
 0x850   : > { %6143 = vmatpush1.bf16.msk.msra.mxu0 %vm8348_vm0, %v6141_v46 }
 0x851   : > { %v4748_v37 = vsel %vm9539_vm3, %v7291_v54, %v7292_v40  ;;  %v5350_v62 = vsel %vm9540_vm5, %v7296_v9, %v7297_v41 }
 0x852   : > { %v7300_v60 = vpop.permute.xlu1 %7299  ;;  %v7305_v12 = vpop.permute.xlu0 %7304  ;;  %v6092_v55 = vpack.c.bf16 %v4748_v37, %v4746_v10 }
 0x853   : > { %v7302_v3 = vunpack.i.h.bf16 %v7300_v60  ;;  %v7301_v0 = vunpack.i.l.bf16 %v7300_v60  ;;  %v7307_v39 = vunpack.i.h.bf16 %v7305_v12  ;;  %v7306_v43 = vunpack.i.l.bf16 %v7305_v12 }
 0x854   : > { %6094 = vmatprep.subr.msk.bf16.mxu1 %vm8285_vm15, %v6092_v55  ;;  %vm9544_vm15 = vmmov %vm9540_vm5 }
 0x855   : > { %v5352_v53 = vsel %vm9541_vm11, %v7301_v0, %v7302_v3  ;;  %v4747_v48 = vsel %vm9542_vm8, %v7307_v39, %v7291_v54  ;;  %v4745_v11 = vsel %vm9543_vm9, %v7306_v43, %v7286_v7 }
 0x856   : > { %v6095_v59 = vpack.c.bf16 %v4747_v48, %v4745_v11  ;;  %v7310_v8 = vpop.permute.xlu1 %7309  ;;  %v6144_v57 = vpack.c.bf16 %v5352_v53, %v5350_v62 }
 0x857   : > { %v7312_v6 = vunpack.i.h.bf16 %v7310_v8  ;;  %v7311_v1 = vunpack.i.l.bf16 %v7310_v8 }
 0x858   : > { %6097 = vmatpush1.bf16.msk.msra.mxu1 %vm8297_vm4, %v6095_v59  ;;  %6146 = vmatprep.subr.msk.bf16.mxu0 %vm8321_vm1, %v6144_v57 }
 0x859   : > { %v5349_v58 = vsel %vm9544_vm15, %v7311_v1, %v7296_v9  ;;  %v5351_v13 = vsel %vm9545_vm6, %v7312_v6, %v7301_v0 }
 0x85a   : > { %v6147_v16 = vpack.c.bf16 %v5351_v13, %v5349_v58 }
 0x85b   : > { %5828 = vmatmul.mubr.msk.f32.vlgmr.msra.gmra.mrb[0].mxu1 %vm1632_vm2, %v4334_v49 }
 0x85c   : > { %6149 = vmatpush1.bf16.msk.msra.mxu0 %vm8348_vm0, %v6147_v16 }
 0x85f   : > { %5857 = vmatmul.mubr.msk.f32.vlgmr.msra.gmra.mrb[0].mxu0 %vm1632_vm2, %v4339_v47 }
 0x92e   : > { %v4834_v61 = vpop.f32.mrb[0].mxu1 }
 0x92f   : > { %v4836_v17 = vpop.f32.mrb[1].mxu1 }
 0x932   : > { %v5438_v20 = vpop.f32.mrb[0].mxu0 }
 0x933   : > { %v6344_v22 = vadd.f32 %v5438_v20, %v4834_v61  ;;  %v5440_v23 = vpop.f32.mrb[1].mxu0 }
 0x934   : > { %v6345_v24 = vadd.f32 %v5440_v23, %v4836_v17 }
 0x935   : > { %v5446_v26 = vadd.f32 %v6344_v22, %v9546_v25 }
 0x936   : > { %v5447_v21 = vadd.f32 %v6345_v24, %v9547_v18 }
 0x938   : > { %v5450_v34 = vcombine.low %v5446_v26, %v5447_v21 }
 0x93a   : > { %5452 = vst [vmem:[%s7529_s26] sm:$0xff] %v5450_v34 }
 0x93b PF: > { %s15_s18 = sadd.s32 1, %s7391_s18  }
 0x93c   : > { %p12_p6 = scmp.ge.s32.totalorder %s15_s18, 4  }
 0x93e   :  { %14 = sbr.rel (!%p12_p6) target bundleno = 1 (0x1), region = 108 }

</bundles_post_ra>
